<compile_context>
chip_gen: v5e
topology: v5e:2x2
jax: 0.10.0
libtpu: 0.0.40
codegen_flags: <defaults>
</compile_context>

<pallas_src>
import numpy as np
import jax
import jax.numpy as jnp
from jax import lax
from jax.experimental import pallas as pl
from jax.experimental.pallas import tpu as pltpu

_VMEM = pl.BlockSpec(memory_space=pltpu.MemorySpace.VMEM)


# ----------------------------- fused Pallas kernel -----------------------------

def _build_kernel(N, H, W, C, P, z_dim, NS_pad):
    Hp, Wp = H + 2, W + 2
    deltas = [(dy - 1) * Wp + (dx - 1) for dy in range(3) for dx in range(3)]
    inv_cnt = 1.0 / float(N * H * W)   # BatchNorm2d divisor (valid pixels only)
    eps = 1e-5

    def shift(v, d):
        # out[:, q] = v[:, (q + d) mod NS_pad] as a single XLU lane rotation.
        # For every position that is actually kept downstream the read stays
        # inside the same padded image, so the wrap-around never matters.
        if d % NS_pad == 0:
            return v
        return pltpu.roll(v, shift=(-d) % NS_pad, axis=1)

    def kernel(x_ref, m_ref, pool_ref, w13_ref, p13_ref, w24_ref, p24_ref,
               w5_ref, b5_ref, w1_ref, p1_ref, w23_ref, b23_ref,
               a_ref, z_ref):
        masks = m_ref[...]                      # (5, NS_pad) f32
        valid = masks[0:1, :]                   # float weight for BN statistics
        # hoisted boolean border masks (reused by both repad() calls)
        m_w0 = masks[1:2, :] > 0.5              # w == 0      (left pad column)
        m_wl = masks[2:3, :] > 0.5              # w == Wp-1   (right pad column)
        m_h0 = masks[3:4, :] > 0.5              # h == 0      (top pad row)
        m_hl = masks[4:5, :] > 0.5              # h == Hp-1   (bottom pad row)

        def conv(act, w, bias, cin):
            # im2col on the flat padded layout: 9 lane rolls stacked on the
            # sublane axis, then ONE MXU matmul with K = 9*cin (accumulation
            # happens inside the MXU, not as 8 serial VPU adds).
            cols = jnp.concatenate([shift(act, d) for d in deltas], axis=0)
            return jnp.dot(w, cols, preferred_element_type=jnp.float32) + bias

        def bn_relu(y, gamma, beta):
            # BatchNorm2d, train-mode batch stats over the valid pixels only.
            mean = jnp.sum(y * valid, axis=1, keepdims=True) * inv_cnt
            diff = (y - mean) * valid
            var = jnp.sum(diff * diff, axis=1, keepdims=True) * inv_cnt
            yn = (y - mean) * lax.rsqrt(var + eps) * gamma + beta
            return jnp.maximum(yn, 0.0)

        def repad(y):
            # Rebuild replication padding: border positions copy their nearest
            # valid neighbour (columns first, then rows -> corners fall out).
            y = jnp.where(m_w0, shift(y, 1), y)
            y = jnp.where(m_wl, shift(y, -1), y)
            y = jnp.where(m_h0, shift(y, Wp), y)
            y = jnp.where(m_hl, shift(y, -Wp), y)
            return y

        x = x_ref[...]                                             # (C, NS_pad)

        # stage 1: conv1 (z branch) & conv3 (a branch) merged -- shared input x.
        p13 = p13_ref[...]
        y1 = conv(x, w13_ref[...], p13[:, 0:1], C)                 # (2C, NS_pad)
        y1 = repad(bn_relu(y1, p13[:, 1:2], p13[:, 2:3]))

        # stage 2: conv2 (z half) & conv4 (a half) merged (block-diag weights).
        p24 = p24_ref[...]
        y2 = conv(y1, w24_ref[...], p24[:, 0:1], 2 * C)            # (2C, NS_pad)
        y2 = bn_relu(y2, p24[:, 1:2], p24[:, 2:3])
        z2 = y2[0:C, :]                                            # -> pooling
        a2 = repad(y2[C:2 * C, :])                                 # -> conv5

        # a branch: conv5 + channel softmax (fused epilogue).
        y5 = conv(a2, w5_ref[...], b5_ref[...], C)                 # (P, NS_pad)
        e = jnp.exp(y5 - jnp.max(y5, axis=0, keepdims=True))
        s = jnp.sum(e, axis=0, keepdims=True)
        inv = pl.reciprocal(s, approx=True)
        inv = inv * (2.0 - s * inv)        # one Newton step -> ~f32-exact softmax
        a_ref[...] = e * inv

        # z branch: masked global average pool as one lane-axis contraction,
        # then fc1 + BatchNorm1d + ReLU, then merged fc2 & fc3.
        zp = lax.dot_general(z2, pool_ref[...],
                             dimension_numbers=(((1,), (1,)), ((), ())),
                             preferred_element_type=jnp.float32)   # (C, N)
        p1 = p1_ref[...]
        h = jnp.dot(w1_ref[...], zp,
                    preferred_element_type=jnp.float32) + p1[:, 0:1]   # (8P, N)
        hm = jnp.mean(h, axis=1, keepdims=True)
        hd = h - hm
        hv = jnp.mean(hd * hd, axis=1, keepdims=True)
        h = jnp.maximum(hd * lax.rsqrt(hv + eps) * p1[:, 1:2] + p1[:, 2:3], 0.0)
        z_ref[...] = (jnp.dot(w23_ref[...], h,
                              preferred_element_type=jnp.float32) + b23_ref[...])

    return kernel


# --------------------------- host-side packing helpers --------------------------

def _conv_w_to_mat(w):
    # PyTorch conv weight (Cout, Cin, 3, 3) -> (Cout, 9*Cin); column order is
    # (dy, dx, cin), matching the im2col stack order inside the kernel.
    cout, cin = w.shape[0], w.shape[1]
    return jnp.transpose(w, (0, 2, 3, 1)).reshape(cout, 9 * cin)


def _make_masks(N, H, W, NS_pad):
    Hp, Wp = H + 2, W + 2
    m = np.zeros((5, N, Hp, Wp), np.float32)
    m[0, :, 1:H + 1, 1:W + 1] = 1.0      # valid interior
    m[1, :, :, 0] = 1.0                  # left padded column
    m[2, :, :, Wp - 1] = 1.0             # right padded column
    m[3, :, 0, :] = 1.0                  # top padded row
    m[4, :, Hp - 1, :] = 1.0             # bottom padded row
    m = m.reshape(5, N * Hp * Wp)
    out = np.zeros((5, NS_pad), np.float32)   # pad columns: all masks zero
    out[:, :m.shape[1]] = m
    return out


def _make_pool_t(N, H, W, NS_pad):
    # Lane-dense (N, NS_pad) pooling matrix: AdaptiveAvgPool2d((1,1)) over the
    # valid pixels of each image, expressed as one lane-axis contraction.
    Hp, Wp = H + 2, W + 2
    p = np.zeros((N, N, Hp, Wp), np.float32)
    for n in range(N):
        p[n, n, 1:H + 1, 1:W + 1] = 1.0 / float(H * W)
    p = p.reshape(N, N * Hp * Wp)
    out = np.zeros((N, NS_pad), np.float32)
    out[:, :p.shape[1]] = p
    return out


def _pack_params(params, C, P, z_dim):
    # conv1 + conv3 share their input -> one (2C, 9C) weight matrix.
    w13 = jnp.concatenate([_conv_w_to_mat(params["conv1_w"]),
                           _conv_w_to_mat(params["conv3_w"])], axis=0)
    p13 = jnp.stack([jnp.concatenate([params["conv1_b"], params["conv3_b"]]),
                     jnp.concatenate([params["bn1_g"], params["bn3_g"]]),
                     jnp.concatenate([params["bn1_b"], params["bn3_b"]])], axis=1)
    # conv2 (z half) + conv4 (a half): block-diagonal (2C, 9*2C) weight matrix.
    w2 = jnp.transpose(params["conv2_w"], (0, 2, 3, 1))          # (C, 3, 3, C)
    w4 = jnp.transpose(params["conv4_w"], (0, 2, 3, 1))
    top = jnp.concatenate([w2, jnp.zeros_like(w2)], axis=3)
    bot = jnp.concatenate([jnp.zeros_like(w4), w4], axis=3)
    w24 = jnp.concatenate([top, bot], axis=0).reshape(2 * C, 9 * 2 * C)
    p24 = jnp.stack([jnp.concatenate([params["conv2_b"], params["conv4_b"]]),
                     jnp.concatenate([params["bn2_g"], params["bn4_g"]]),
                     jnp.concatenate([params["bn2_b"], params["bn4_b"]])], axis=1)
    w5 = _conv_w_to_mat(params["conv5_w"])                       # (P, 9C)
    b5 = params["conv5_b"].reshape(P, 1)
    w1 = params["fc1_w"].T                                       # (8P, C)
    p1 = jnp.stack([params["fc1_b"], params["bnfc_g"], params["bnfc_b"]], axis=1)
    # fc2 + fc3 share their input -> one (2*z_dim, 8P) weight matrix.
    w23 = jnp.concatenate([params["fc2_w"].T, params["fc3_w"].T], axis=0)
    b23 = jnp.concatenate([params["fc2_b"], params["fc3_b"]]).reshape(2 * z_dim, 1)
    return (w13, p13, w24, p24, w5, b5, w1, p1, w23, b23)


# ------------------------------- forward wrapper --------------------------------

def encoder_cnn_forward(params, y_nchw):
    # Input is NCHW (PyTorch convention); returns (mu, log_var, a) with
    # mu/log_var (N, z_dim) and a (N, P, H, W), like EncoderCNN.forward.
    N, C, H, W = y_nchw.shape
    P = params["conv5_w"].shape[0]
    z_dim = params["fc2_w"].shape[1]
    Hp, Wp = H + 2, W + 2
    NS = N * Hp * Wp
    NS_pad = ((NS + 127) // 128) * 128       # lane-dense flat spatial axis

    # NCHW -> channel-major, replication-padded, spatially flattened (C, NS_pad).
    x = jnp.transpose(y_nchw.astype(jnp.float32), (1, 0, 2, 3))
    x = jnp.pad(x, ((0, 0), (0, 0), (1, 1), (1, 1)), mode="edge")
    x = x.reshape(C, NS)
    x = jnp.pad(x, ((0, 0), (0, NS_pad - NS)))   # pad tail is masked invalid

    masks = jnp.asarray(_make_masks(N, H, W, NS_pad))
    pool_t = jnp.asarray(_make_pool_t(N, H, W, NS_pad))
    packed = _pack_params(params, C, P, z_dim)

    kernel = _build_kernel(N, H, W, C, P, z_dim, NS_pad)
    a_flat, z_out = pl.pallas_call(
        kernel,
        out_shape=(jax.ShapeDtypeStruct((P, NS_pad), jnp.float32),
                   jax.ShapeDtypeStruct((2 * z_dim, N), jnp.float32)),
        in_specs=[_VMEM] * 13,
        out_specs=(_VMEM, _VMEM),
    )(x, masks, pool_t, *packed)

    a = a_flat[:, :NS].reshape(P, N, Hp, Wp)[:, :, 1:H + 1, 1:W + 1]
    a = jnp.transpose(a, (1, 0, 2, 3))                            # (N, P, H, W)
    mu = z_out[:z_dim, :].T                                       # (N, z_dim)
    log_var = z_out[z_dim:, :].T
    # TODO(synk): reparameterize() uses torch.randn and is not part of forward();
    # it is intentionally not implemented here.
    return mu, log_var, a


# ------------------------------ deterministic init -------------------------------

def init_params(key, P, Channel, z_dim):
    ks = jax.random.split(key, 16)

    def kaiming_conv(k, cout, cin):           # kaiming_uniform_ (fan_in, gain=sqrt(2))
        fan_in = cin * 9
        bound = jnp.sqrt(2.0) * jnp.sqrt(3.0 / fan_in)
        return jax.random.uniform(k, (cout, cin, 3, 3), jnp.float32, -bound, bound)

    def xavier_linear(k, out_f, in_f):        # xavier_uniform_; stored as (in, out)
        bound = jnp.sqrt(6.0 / (in_f + out_f))
        return jax.random.uniform(k, (in_f, out_f), jnp.float32, -bound, bound)

    def bn_gamma(k, n):                       # normal_(1.0, 0.02)
        return 1.0 + 0.02 * jax.random.normal(k, (n,), jnp.float32)

    zeros = lambda n: jnp.zeros((n,), jnp.float32)

    return {
        "conv1_w": kaiming_conv(ks[0], Channel, Channel), "conv1_b": zeros(Channel),
        "bn1_g": bn_gamma(ks[1], Channel), "bn1_b": zeros(Channel),
        "conv2_w": kaiming_conv(ks[2], Channel, Channel), "conv2_b": zeros(Channel),
        "bn2_g": bn_gamma(ks[3], Channel), "bn2_b": zeros(Channel),
        "conv3_w": kaiming_conv(ks[4], Channel, Channel), "conv3_b": zeros(Channel),
        "bn3_g": bn_gamma(ks[5], Channel), "bn3_b": zeros(Channel),
        "conv4_w": kaiming_conv(ks[6], Channel, Channel), "conv4_b": zeros(Channel),
        "bn4_g": bn_gamma(ks[7], Channel), "bn4_b": zeros(Channel),
        "conv5_w": kaiming_conv(ks[8], P, Channel), "conv5_b": zeros(P),
        "fc1_w": xavier_linear(ks[9], P * 8, Channel), "fc1_b": zeros(P * 8),
        "bnfc_g": bn_gamma(ks[10], P * 8), "bnfc_b": zeros(P * 8),
        "fc2_w": xavier_linear(ks[11], z_dim, P * 8), "fc2_b": zeros(z_dim),
        "fc3_w": xavier_linear(ks[12], z_dim, P * 8), "fc3_b": zeros(z_dim),
    }


# --------------------------------------- main ------------------------------------

if __name__ == "__main__":
    P, Channel, z_dim = 4, 4, 8
    N, H, W = 2, 16, 16

    key = jax.random.PRNGKey(0)
    k_x, k_p = jax.random.split(key)
    params = init_params(k_p, P, Channel, z_dim)
    x = jax.random.normal(k_x, (N, Channel, H, W), jnp.float32)

    fwd = jax.jit(encoder_cnn_forward)
    mu, log_var, a = jax.block_until_ready(fwd(params, x))

    assert mu.shape == (N, z_dim)
    assert log_var.shape == (N, z_dim)
    assert a.shape == (N, P, H, W)
    assert bool(jnp.all(jnp.isfinite(mu))) and bool(jnp.all(jnp.isfinite(log_var)))
    assert bool(jnp.all(jnp.isfinite(a)))
    # softmax over the channel dim sums to ~1 (approx reciprocal + Newton step)
    assert bool(jnp.allclose(jnp.sum(a, axis=1), 1.0, atol=1e-3))

    print("KERNEL_OK")
</pallas_src>

<mosaic_0001>
module attributes {stable_mosaic.version = 11 : i64} {
  func.func @kernel(%arg0: memref<4x768xf32, #tpu.memory_space<vmem>>, %arg1: memref<5x768xf32, #tpu.memory_space<vmem>>, %arg2: memref<2x768xf32, #tpu.memory_space<vmem>>, %arg3: memref<8x36xf32, #tpu.memory_space<vmem>>, %arg4: memref<8x3xf32, #tpu.memory_space<vmem>>, %arg5: memref<8x72xf32, #tpu.memory_space<vmem>>, %arg6: memref<8x3xf32, #tpu.memory_space<vmem>>, %arg7: memref<4x36xf32, #tpu.memory_space<vmem>>, %arg8: memref<4x1xf32, #tpu.memory_space<vmem>>, %arg9: memref<32x4xf32, #tpu.memory_space<vmem>>, %arg10: memref<32x3xf32, #tpu.memory_space<vmem>>, %arg11: memref<16x32xf32, #tpu.memory_space<vmem>>, %arg12: memref<16x1xf32, #tpu.memory_space<vmem>>, %arg13: memref<4x768xf32, #tpu.memory_space<vmem>>, %arg14: memref<16x2xf32, #tpu.memory_space<vmem>>) attributes {dimension_semantics = [], scalar_prefetch = 0 : i64, scratch_operands = 0 : i64, tpu.core_type = #tpu.core_type<tc>} {
    %c0 = arith.constant 0 : index
    %c0_0 = arith.constant 0 : index
    %0 = vector.load %arg1[%c0, %c0_0] : memref<5x768xf32, #tpu.memory_space<vmem>>, vector<5x768xf32>
    %1 = vector.extract_strided_slice %0 {offsets = [0, 0], sizes = [1, 768], strides = [1, 1]} : vector<5x768xf32> to vector<1x768xf32>
    %2 = vector.extract_strided_slice %0 {offsets = [1, 0], sizes = [1, 768], strides = [1, 1]} : vector<5x768xf32> to vector<1x768xf32>
    %cst = arith.constant 5.000000e-01 : f32
    %3 = vector.broadcast %cst : f32 to vector<1x768xf32>
    %4 = arith.cmpf ogt, %2, %3 : vector<1x768xf32>
    %5 = vector.extract_strided_slice %0 {offsets = [2, 0], sizes = [1, 768], strides = [1, 1]} : vector<5x768xf32> to vector<1x768xf32>
    %cst_1 = arith.constant 5.000000e-01 : f32
    %6 = vector.broadcast %cst_1 : f32 to vector<1x768xf32>
    %7 = arith.cmpf ogt, %5, %6 : vector<1x768xf32>
    %8 = vector.extract_strided_slice %0 {offsets = [3, 0], sizes = [1, 768], strides = [1, 1]} : vector<5x768xf32> to vector<1x768xf32>
    %cst_2 = arith.constant 5.000000e-01 : f32
    %9 = vector.broadcast %cst_2 : f32 to vector<1x768xf32>
    %10 = arith.cmpf ogt, %8, %9 : vector<1x768xf32>
    %11 = vector.extract_strided_slice %0 {offsets = [4, 0], sizes = [1, 768], strides = [1, 1]} : vector<5x768xf32> to vector<1x768xf32>
    %cst_3 = arith.constant 5.000000e-01 : f32
    %12 = vector.broadcast %cst_3 : f32 to vector<1x768xf32>
    %13 = arith.cmpf ogt, %11, %12 : vector<1x768xf32>
    %c0_4 = arith.constant 0 : index
    %c0_5 = arith.constant 0 : index
    %14 = vector.load %arg0[%c0_4, %c0_5] : memref<4x768xf32, #tpu.memory_space<vmem>>, vector<4x768xf32>
    %c0_6 = arith.constant 0 : index
    %c0_7 = arith.constant 0 : index
    %15 = vector.load %arg4[%c0_6, %c0_7] : memref<8x3xf32, #tpu.memory_space<vmem>>, vector<8x3xf32>
    %c0_8 = arith.constant 0 : index
    %c0_9 = arith.constant 0 : index
    %16 = vector.load %arg3[%c0_8, %c0_9] : memref<8x36xf32, #tpu.memory_space<vmem>>, vector<8x36xf32>
    %17 = vector.extract_strided_slice %15 {offsets = [0, 0], sizes = [8, 1], strides = [1, 1]} : vector<8x3xf32> to vector<8x1xf32>
    %c19_i32 = arith.constant 19 : i32
    %18 = tpu.dynamic_rotate %14 by %c19_i32 dim 1 : vector<4x768xf32>, i32 -> vector<4x768xf32>
    %c18_i32 = arith.constant 18 : i32
    %19 = tpu.dynamic_rotate %14 by %c18_i32 dim 1 : vector<4x768xf32>, i32 -> vector<4x768xf32>
    %c17_i32 = arith.constant 17 : i32
    %20 = tpu.dynamic_rotate %14 by %c17_i32 dim 1 : vector<4x768xf32>, i32 -> vector<4x768xf32>
    %c1_i32 = arith.constant 1 : i32
    %21 = tpu.dynamic_rotate %14 by %c1_i32 dim 1 : vector<4x768xf32>, i32 -> vector<4x768xf32>
    %c767_i32 = arith.constant 767 : i32
    %22 = tpu.dynamic_rotate %14 by %c767_i32 dim 1 : vector<4x768xf32>, i32 -> vector<4x768xf32>
    %c751_i32 = arith.constant 751 : i32
    %23 = tpu.dynamic_rotate %14 by %c751_i32 dim 1 : vector<4x768xf32>, i32 -> vector<4x768xf32>
    %c750_i32 = arith.constant 750 : i32
    %24 = tpu.dynamic_rotate %14 by %c750_i32 dim 1 : vector<4x768xf32>, i32 -> vector<4x768xf32>
    %c749_i32 = arith.constant 749 : i32
    %25 = tpu.dynamic_rotate %14 by %c749_i32 dim 1 : vector<4x768xf32>, i32 -> vector<4x768xf32>
    %26 = tpu.concatenate %18, %19, %20, %21, %14, %22, %23, %24, %25 in 0 : vector<4x768xf32>, vector<4x768xf32>, vector<4x768xf32>, vector<4x768xf32>, vector<4x768xf32>, vector<4x768xf32>, vector<4x768xf32>, vector<4x768xf32>, vector<4x768xf32> -> vector<36x768xf32>
    %cst_10 = arith.constant dense<0.000000e+00> : vector<8x768xf32>
    %27 = tpu.matmul %16, %26, %cst_10 {dimension_numbers = #tpu.dot_dimension_numbers<[1], [0], [0], [1], [0, 0, 1, 1], [], []>} : vector<8x36xf32>, vector<36x768xf32>, vector<8x768xf32> -> vector<8x768xf32>
    %28 = vector.broadcast %17 : vector<8x1xf32> to vector<8x768xf32>
    %29 = arith.addf %27, %28 : vector<8x768xf32>
    %30 = vector.extract_strided_slice %15 {offsets = [0, 1], sizes = [8, 1], strides = [1, 1]} : vector<8x3xf32> to vector<8x1xf32>
    %31 = vector.extract_strided_slice %15 {offsets = [0, 2], sizes = [8, 1], strides = [1, 1]} : vector<8x3xf32> to vector<8x1xf32>
    %32 = vector.broadcast %1 : vector<1x768xf32> to vector<8x768xf32>
    %33 = arith.mulf %29, %32 : vector<8x768xf32>
    %cst_11 = arith.constant dense<0.000000e+00> : vector<8xf32>
    %34 = vector.multi_reduction <add>, %33, %cst_11 [1] : vector<8x768xf32> to vector<8xf32>
    %35 = vector.shape_cast %34 : vector<8xf32> to vector<8x1xf32>
    %cst_12 = arith.constant 0.001953125 : f32
    %36 = vector.broadcast %cst_12 : f32 to vector<8x1xf32>
    %37 = arith.mulf %35, %36 : vector<8x1xf32>
    %38 = vector.broadcast %37 : vector<8x1xf32> to vector<8x768xf32>
    %39 = arith.subf %29, %38 : vector<8x768xf32>
    %40 = vector.broadcast %1 : vector<1x768xf32> to vector<8x768xf32>
    %41 = arith.mulf %39, %40 : vector<8x768xf32>
    %42 = arith.mulf %41, %41 : vector<8x768xf32>
    %cst_13 = arith.constant dense<0.000000e+00> : vector<8xf32>
    %43 = vector.multi_reduction <add>, %42, %cst_13 [1] : vector<8x768xf32> to vector<8xf32>
    %44 = vector.shape_cast %43 : vector<8xf32> to vector<8x1xf32>
    %cst_14 = arith.constant 0.001953125 : f32
    %45 = vector.broadcast %cst_14 : f32 to vector<8x1xf32>
    %46 = arith.mulf %44, %45 : vector<8x1xf32>
    %47 = vector.broadcast %37 : vector<8x1xf32> to vector<8x768xf32>
    %48 = arith.subf %29, %47 : vector<8x768xf32>
    %cst_15 = arith.constant 9.99999974E-6 : f32
    %49 = vector.broadcast %cst_15 : f32 to vector<8x1xf32>
    %50 = arith.addf %46, %49 : vector<8x1xf32>
    %51 = math.rsqrt %50 : vector<8x1xf32>
    %52 = vector.broadcast %51 : vector<8x1xf32> to vector<8x768xf32>
    %53 = arith.mulf %48, %52 : vector<8x768xf32>
    %54 = vector.broadcast %30 : vector<8x1xf32> to vector<8x768xf32>
    %55 = arith.mulf %53, %54 : vector<8x768xf32>
    %56 = vector.broadcast %31 : vector<8x1xf32> to vector<8x768xf32>
    %57 = arith.addf %55, %56 : vector<8x768xf32>
    %cst_16 = arith.constant 0.000000e+00 : f32
    %58 = vector.broadcast %cst_16 : f32 to vector<8x768xf32>
    %59 = arith.maximumf %57, %58 : vector<8x768xf32>
    %c767_i32_17 = arith.constant 767 : i32
    %60 = tpu.dynamic_rotate %59 by %c767_i32_17 dim 1 : vector<8x768xf32>, i32 -> vector<8x768xf32>
    %61 = vector.shape_cast %4 : vector<1x768xi1> to vector<1x768xi1>
    %62 = vector.broadcast %61 : vector<1x768xi1> to vector<8x768xi1>
    %63 = arith.select %62, %60, %59 : vector<8x768xi1>, vector<8x768xf32>
    %c1_i32_18 = arith.constant 1 : i32
    %64 = tpu.dynamic_rotate %63 by %c1_i32_18 dim 1 : vector<8x768xf32>, i32 -> vector<8x768xf32>
    %65 = vector.shape_cast %7 : vector<1x768xi1> to vector<1x768xi1>
    %66 = vector.broadcast %65 : vector<1x768xi1> to vector<8x768xi1>
    %67 = arith.select %66, %64, %63 : vector<8x768xi1>, vector<8x768xf32>
    %c750_i32_19 = arith.constant 750 : i32
    %68 = tpu.dynamic_rotate %67 by %c750_i32_19 dim 1 : vector<8x768xf32>, i32 -> vector<8x768xf32>
    %69 = vector.shape_cast %10 : vector<1x768xi1> to vector<1x768xi1>
    %70 = vector.broadcast %69 : vector<1x768xi1> to vector<8x768xi1>
    %71 = arith.select %70, %68, %67 : vector<8x768xi1>, vector<8x768xf32>
    %c18_i32_20 = arith.constant 18 : i32
    %72 = tpu.dynamic_rotate %71 by %c18_i32_20 dim 1 : vector<8x768xf32>, i32 -> vector<8x768xf32>
    %73 = vector.shape_cast %13 : vector<1x768xi1> to vector<1x768xi1>
    %74 = vector.broadcast %73 : vector<1x768xi1> to vector<8x768xi1>
    %75 = arith.select %74, %72, %71 : vector<8x768xi1>, vector<8x768xf32>
    %c0_21 = arith.constant 0 : index
    %c0_22 = arith.constant 0 : index
    %76 = vector.load %arg6[%c0_21, %c0_22] : memref<8x3xf32, #tpu.memory_space<vmem>>, vector<8x3xf32>
    %c0_23 = arith.constant 0 : index
    %c0_24 = arith.constant 0 : index
    %77 = vector.load %arg5[%c0_23, %c0_24] : memref<8x72xf32, #tpu.memory_space<vmem>>, vector<8x72xf32>
    %78 = vector.extract_strided_slice %76 {offsets = [0, 0], sizes = [8, 1], strides = [1, 1]} : vector<8x3xf32> to vector<8x1xf32>
    %c19_i32_25 = arith.constant 19 : i32
    %79 = tpu.dynamic_rotate %75 by %c19_i32_25 dim 1 : vector<8x768xf32>, i32 -> vector<8x768xf32>
    %c18_i32_26 = arith.constant 18 : i32
    %80 = tpu.dynamic_rotate %75 by %c18_i32_26 dim 1 : vector<8x768xf32>, i32 -> vector<8x768xf32>
    %c17_i32_27 = arith.constant 17 : i32
    %81 = tpu.dynamic_rotate %75 by %c17_i32_27 dim 1 : vector<8x768xf32>, i32 -> vector<8x768xf32>
    %c1_i32_28 = arith.constant 1 : i32
    %82 = tpu.dynamic_rotate %75 by %c1_i32_28 dim 1 : vector<8x768xf32>, i32 -> vector<8x768xf32>
    %c767_i32_29 = arith.constant 767 : i32
    %83 = tpu.dynamic_rotate %75 by %c767_i32_29 dim 1 : vector<8x768xf32>, i32 -> vector<8x768xf32>
    %c751_i32_30 = arith.constant 751 : i32
    %84 = tpu.dynamic_rotate %75 by %c751_i32_30 dim 1 : vector<8x768xf32>, i32 -> vector<8x768xf32>
    %c750_i32_31 = arith.constant 750 : i32
    %85 = tpu.dynamic_rotate %75 by %c750_i32_31 dim 1 : vector<8x768xf32>, i32 -> vector<8x768xf32>
    %c749_i32_32 = arith.constant 749 : i32
    %86 = tpu.dynamic_rotate %75 by %c749_i32_32 dim 1 : vector<8x768xf32>, i32 -> vector<8x768xf32>
    %87 = tpu.concatenate %79, %80, %81, %82, %75, %83, %84, %85, %86 in 0 : vector<8x768xf32>, vector<8x768xf32>, vector<8x768xf32>, vector<8x768xf32>, vector<8x768xf32>, vector<8x768xf32>, vector<8x768xf32>, vector<8x768xf32>, vector<8x768xf32> -> vector<72x768xf32>
    %cst_33 = arith.constant dense<0.000000e+00> : vector<8x768xf32>
    %88 = tpu.matmul %77, %87, %cst_33 {dimension_numbers = #tpu.dot_dimension_numbers<[1], [0], [0], [1], [0, 0, 1, 1], [], []>} : vector<8x72xf32>, vector<72x768xf32>, vector<8x768xf32> -> vector<8x768xf32>
    %89 = vector.broadcast %78 : vector<8x1xf32> to vector<8x768xf32>
    %90 = arith.addf %88, %89 : vector<8x768xf32>
    %91 = vector.extract_strided_slice %76 {offsets = [0, 1], sizes = [8, 1], strides = [1, 1]} : vector<8x3xf32> to vector<8x1xf32>
    %92 = vector.extract_strided_slice %76 {offsets = [0, 2], sizes = [8, 1], strides = [1, 1]} : vector<8x3xf32> to vector<8x1xf32>
    %93 = vector.broadcast %1 : vector<1x768xf32> to vector<8x768xf32>
    %94 = arith.mulf %90, %93 : vector<8x768xf32>
    %cst_34 = arith.constant dense<0.000000e+00> : vector<8xf32>
    %95 = vector.multi_reduction <add>, %94, %cst_34 [1] : vector<8x768xf32> to vector<8xf32>
    %96 = vector.shape_cast %95 : vector<8xf32> to vector<8x1xf32>
    %cst_35 = arith.constant 0.001953125 : f32
    %97 = vector.broadcast %cst_35 : f32 to vector<8x1xf32>
    %98 = arith.mulf %96, %97 : vector<8x1xf32>
    %99 = vector.broadcast %98 : vector<8x1xf32> to vector<8x768xf32>
    %100 = arith.subf %90, %99 : vector<8x768xf32>
    %101 = vector.broadcast %1 : vector<1x768xf32> to vector<8x768xf32>
    %102 = arith.mulf %100, %101 : vector<8x768xf32>
    %103 = arith.mulf %102, %102 : vector<8x768xf32>
    %cst_36 = arith.constant dense<0.000000e+00> : vector<8xf32>
    %104 = vector.multi_reduction <add>, %103, %cst_36 [1] : vector<8x768xf32> to vector<8xf32>
    %105 = vector.shape_cast %104 : vector<8xf32> to vector<8x1xf32>
    %cst_37 = arith.constant 0.001953125 : f32
    %106 = vector.broadcast %cst_37 : f32 to vector<8x1xf32>
    %107 = arith.mulf %105, %106 : vector<8x1xf32>
    %108 = vector.broadcast %98 : vector<8x1xf32> to vector<8x768xf32>
    %109 = arith.subf %90, %108 : vector<8x768xf32>
    %cst_38 = arith.constant 9.99999974E-6 : f32
    %110 = vector.broadcast %cst_38 : f32 to vector<8x1xf32>
    %111 = arith.addf %107, %110 : vector<8x1xf32>
    %112 = math.rsqrt %111 : vector<8x1xf32>
    %113 = vector.broadcast %112 : vector<8x1xf32> to vector<8x768xf32>
    %114 = arith.mulf %109, %113 : vector<8x768xf32>
    %115 = vector.broadcast %91 : vector<8x1xf32> to vector<8x768xf32>
    %116 = arith.mulf %114, %115 : vector<8x768xf32>
    %117 = vector.broadcast %92 : vector<8x1xf32> to vector<8x768xf32>
    %118 = arith.addf %116, %117 : vector<8x768xf32>
    %cst_39 = arith.constant 0.000000e+00 : f32
    %119 = vector.broadcast %cst_39 : f32 to vector<8x768xf32>
    %120 = arith.maximumf %118, %119 : vector<8x768xf32>
    %121 = vector.extract_strided_slice %120 {offsets = [0, 0], sizes = [4, 768], strides = [1, 1]} : vector<8x768xf32> to vector<4x768xf32>
    %122 = vector.extract_strided_slice %120 {offsets = [4, 0], sizes = [4, 768], strides = [1, 1]} : vector<8x768xf32> to vector<4x768xf32>
    %c767_i32_40 = arith.constant 767 : i32
    %123 = tpu.dynamic_rotate %122 by %c767_i32_40 dim 1 : vector<4x768xf32>, i32 -> vector<4x768xf32>
    %124 = vector.shape_cast %4 : vector<1x768xi1> to vector<1x768xi1>
    %125 = vector.broadcast %124 : vector<1x768xi1> to vector<4x768xi1>
    %126 = arith.select %125, %123, %122 : vector<4x768xi1>, vector<4x768xf32>
    %c1_i32_41 = arith.constant 1 : i32
    %127 = tpu.dynamic_rotate %126 by %c1_i32_41 dim 1 : vector<4x768xf32>, i32 -> vector<4x768xf32>
    %128 = vector.shape_cast %7 : vector<1x768xi1> to vector<1x768xi1>
    %129 = vector.broadcast %128 : vector<1x768xi1> to vector<4x768xi1>
    %130 = arith.select %129, %127, %126 : vector<4x768xi1>, vector<4x768xf32>
    %c750_i32_42 = arith.constant 750 : i32
    %131 = tpu.dynamic_rotate %130 by %c750_i32_42 dim 1 : vector<4x768xf32>, i32 -> vector<4x768xf32>
    %132 = vector.shape_cast %10 : vector<1x768xi1> to vector<1x768xi1>
    %133 = vector.broadcast %132 : vector<1x768xi1> to vector<4x768xi1>
    %134 = arith.select %133, %131, %130 : vector<4x768xi1>, vector<4x768xf32>
    %c18_i32_43 = arith.constant 18 : i32
    %135 = tpu.dynamic_rotate %134 by %c18_i32_43 dim 1 : vector<4x768xf32>, i32 -> vector<4x768xf32>
    %136 = vector.shape_cast %13 : vector<1x768xi1> to vector<1x768xi1>
    %137 = vector.broadcast %136 : vector<1x768xi1> to vector<4x768xi1>
    %138 = arith.select %137, %135, %134 : vector<4x768xi1>, vector<4x768xf32>
    %c0_44 = arith.constant 0 : index
    %c0_45 = arith.constant 0 : index
    %139 = vector.load %arg7[%c0_44, %c0_45] : memref<4x36xf32, #tpu.memory_space<vmem>>, vector<4x36xf32>
    %c0_46 = arith.constant 0 : index
    %c0_47 = arith.constant 0 : index
    %140 = vector.load %arg8[%c0_46, %c0_47] : memref<4x1xf32, #tpu.memory_space<vmem>>, vector<4x1xf32>
    %c19_i32_48 = arith.constant 19 : i32
    %141 = tpu.dynamic_rotate %138 by %c19_i32_48 dim 1 : vector<4x768xf32>, i32 -> vector<4x768xf32>
    %c18_i32_49 = arith.constant 18 : i32
    %142 = tpu.dynamic_rotate %138 by %c18_i32_49 dim 1 : vector<4x768xf32>, i32 -> vector<4x768xf32>
    %c17_i32_50 = arith.constant 17 : i32
    %143 = tpu.dynamic_rotate %138 by %c17_i32_50 dim 1 : vector<4x768xf32>, i32 -> vector<4x768xf32>
    %c1_i32_51 = arith.constant 1 : i32
    %144 = tpu.dynamic_rotate %138 by %c1_i32_51 dim 1 : vector<4x768xf32>, i32 -> vector<4x768xf32>
    %c767_i32_52 = arith.constant 767 : i32
    %145 = tpu.dynamic_rotate %138 by %c767_i32_52 dim 1 : vector<4x768xf32>, i32 -> vector<4x768xf32>
    %c751_i32_53 = arith.constant 751 : i32
    %146 = tpu.dynamic_rotate %138 by %c751_i32_53 dim 1 : vector<4x768xf32>, i32 -> vector<4x768xf32>
    %c750_i32_54 = arith.constant 750 : i32
    %147 = tpu.dynamic_rotate %138 by %c750_i32_54 dim 1 : vector<4x768xf32>, i32 -> vector<4x768xf32>
    %c749_i32_55 = arith.constant 749 : i32
    %148 = tpu.dynamic_rotate %138 by %c749_i32_55 dim 1 : vector<4x768xf32>, i32 -> vector<4x768xf32>
    %149 = tpu.concatenate %141, %142, %143, %144, %138, %145, %146, %147, %148 in 0 : vector<4x768xf32>, vector<4x768xf32>, vector<4x768xf32>, vector<4x768xf32>, vector<4x768xf32>, vector<4x768xf32>, vector<4x768xf32>, vector<4x768xf32>, vector<4x768xf32> -> vector<36x768xf32>
    %cst_56 = arith.constant dense<0.000000e+00> : vector<4x768xf32>
    %150 = tpu.matmul %139, %149, %cst_56 {dimension_numbers = #tpu.dot_dimension_numbers<[1], [0], [0], [1], [0, 0, 1, 1], [], []>} : vector<4x36xf32>, vector<36x768xf32>, vector<4x768xf32> -> vector<4x768xf32>
    %151 = vector.broadcast %140 : vector<4x1xf32> to vector<4x768xf32>
    %152 = arith.addf %150, %151 : vector<4x768xf32>
    %cst_57 = arith.constant dense<0xFF800000> : vector<768xf32>
    %153 = vector.multi_reduction <maximumf>, %152, %cst_57 [0] : vector<4x768xf32> to vector<768xf32>
    %154 = vector.shape_cast %153 : vector<768xf32> to vector<1x768xf32>
    %155 = vector.broadcast %154 : vector<1x768xf32> to vector<4x768xf32>
    %156 = arith.subf %152, %155 : vector<4x768xf32>
    %157 = math.exp %156 : vector<4x768xf32>
    %cst_58 = arith.constant dense<0.000000e+00> : vector<768xf32>
    %158 = vector.multi_reduction <add>, %157, %cst_58 [0] : vector<4x768xf32> to vector<768xf32>
    %159 = vector.shape_cast %158 : vector<768xf32> to vector<1x768xf32>
    %160 = tpu.reciprocal %159 {approx = true} : vector<1x768xf32> -> vector<1x768xf32>
    %161 = arith.mulf %159, %160 : vector<1x768xf32>
    %cst_59 = arith.constant 2.000000e+00 : f32
    %162 = vector.broadcast %cst_59 : f32 to vector<1x768xf32>
    %163 = arith.subf %162, %161 : vector<1x768xf32>
    %164 = arith.mulf %160, %163 : vector<1x768xf32>
    %165 = vector.broadcast %164 : vector<1x768xf32> to vector<4x768xf32>
    %166 = arith.mulf %157, %165 : vector<4x768xf32>
    %c0_60 = arith.constant 0 : index
    %c0_61 = arith.constant 0 : index
    %167 = vector.load %arg13[%c0_60, %c0_61] : memref<4x768xf32, #tpu.memory_space<vmem>>, vector<4x768xf32>
    tpu.vector_store %arg13[%c0_60, %c0_61], %166 {strides = array<i32>} : memref<4x768xf32, #tpu.memory_space<vmem>>, vector<4x768xf32>,
    %c0_62 = arith.constant 0 : index
    %c0_63 = arith.constant 0 : index
    %168 = vector.load %arg2[%c0_62, %c0_63] : memref<2x768xf32, #tpu.memory_space<vmem>>, vector<2x768xf32>
    %cst_64 = arith.constant dense<0.000000e+00> : vector<4x2xf32>
    %169 = tpu.matmul %121, %168, %cst_64 {dimension_numbers = #tpu.dot_dimension_numbers<[1], [1], [0], [0], [0, 0, 1, 0], [], []>} : vector<4x768xf32>, vector<2x768xf32>, vector<4x2xf32> -> vector<4x2xf32>
    %c0_65 = arith.constant 0 : index
    %c0_66 = arith.constant 0 : index
    %170 = vector.load %arg10[%c0_65, %c0_66] : memref<32x3xf32, #tpu.memory_space<vmem>>, vector<32x3xf32>
    %c0_67 = arith.constant 0 : index
    %c0_68 = arith.constant 0 : index
    %171 = vector.load %arg9[%c0_67, %c0_68] : memref<32x4xf32, #tpu.memory_space<vmem>>, vector<32x4xf32>
    %cst_69 = arith.constant dense<0.000000e+00> : vector<32x2xf32>
    %172 = tpu.matmul %171, %169, %cst_69 {dimension_numbers = #tpu.dot_dimension_numbers<[1], [0], [0], [1], [0, 0, 1, 1], [], []>} : vector<32x4xf32>, vector<4x2xf32>, vector<32x2xf32> -> vector<32x2xf32>
    %173 = vector.extract_strided_slice %170 {offsets = [0, 0], sizes = [32, 1], strides = [1, 1]} : vector<32x3xf32> to vector<32x1xf32>
    %174 = vector.broadcast %173 : vector<32x1xf32> to vector<32x2xf32>
    %175 = arith.addf %172, %174 : vector<32x2xf32>
    %cst_70 = arith.constant dense<0.000000e+00> : vector<32xf32>
    %176 = vector.multi_reduction <add>, %175, %cst_70 [1] : vector<32x2xf32> to vector<32xf32>
    %177 = vector.shape_cast %176 : vector<32xf32> to vector<32x1xf32>
    %cst_71 = arith.constant 2.000000e+00 : f32
    %178 = vector.broadcast %cst_71 : f32 to vector<32x1xf32>
    %179 = arith.divf %177, %178 : vector<32x1xf32>
    %180 = vector.broadcast %179 : vector<32x1xf32> to vector<32x2xf32>
    %181 = arith.subf %175, %180 : vector<32x2xf32>
    %182 = arith.mulf %181, %181 : vector<32x2xf32>
    %cst_72 = arith.constant dense<0.000000e+00> : vector<32xf32>
    %183 = vector.multi_reduction <add>, %182, %cst_72 [1] : vector<32x2xf32> to vector<32xf32>
    %184 = vector.shape_cast %183 : vector<32xf32> to vector<32x1xf32>
    %cst_73 = arith.constant 2.000000e+00 : f32
    %185 = vector.broadcast %cst_73 : f32 to vector<32x1xf32>
    %186 = arith.divf %184, %185 : vector<32x1xf32>
    %cst_74 = arith.constant 9.99999974E-6 : f32
    %187 = vector.broadcast %cst_74 : f32 to vector<32x1xf32>
    %188 = arith.addf %186, %187 : vector<32x1xf32>
    %189 = math.rsqrt %188 : vector<32x1xf32>
    %190 = vector.broadcast %189 : vector<32x1xf32> to vector<32x2xf32>
    %191 = arith.mulf %181, %190 : vector<32x2xf32>
    %192 = vector.extract_strided_slice %170 {offsets = [0, 1], sizes = [32, 1], strides = [1, 1]} : vector<32x3xf32> to vector<32x1xf32>
    %193 = vector.broadcast %192 : vector<32x1xf32> to vector<32x2xf32>
    %194 = arith.mulf %191, %193 : vector<32x2xf32>
    %195 = vector.extract_strided_slice %170 {offsets = [0, 2], sizes = [32, 1], strides = [1, 1]} : vector<32x3xf32> to vector<32x1xf32>
    %196 = vector.broadcast %195 : vector<32x1xf32> to vector<32x2xf32>
    %197 = arith.addf %194, %196 : vector<32x2xf32>
    %cst_75 = arith.constant 0.000000e+00 : f32
    %198 = vector.broadcast %cst_75 : f32 to vector<32x2xf32>
    %199 = arith.maximumf %197, %198 : vector<32x2xf32>
    %c0_76 = arith.constant 0 : index
    %c0_77 = arith.constant 0 : index
    %200 = vector.load %arg11[%c0_76, %c0_77] : memref<16x32xf32, #tpu.memory_space<vmem>>, vector<16x32xf32>
    %cst_78 = arith.constant dense<0.000000e+00> : vector<16x2xf32>
    %201 = tpu.matmul %200, %199, %cst_78 {dimension_numbers = #tpu.dot_dimension_numbers<[1], [0], [0], [1], [0, 0, 1, 1], [], []>} : vector<16x32xf32>, vector<32x2xf32>, vector<16x2xf32> -> vector<16x2xf32>
    %c0_79 = arith.constant 0 : index
    %c0_80 = arith.constant 0 : index
    %202 = vector.load %arg12[%c0_79, %c0_80] : memref<16x1xf32, #tpu.memory_space<vmem>>, vector<16x1xf32>
    %203 = vector.broadcast %202 : vector<16x1xf32> to vector<16x2xf32>
    %204 = arith.addf %201, %203 : vector<16x2xf32>
    %c0_81 = arith.constant 0 : index
    %c0_82 = arith.constant 0 : index
    %205 = vector.load %arg14[%c0_81, %c0_82] : memref<16x2xf32, #tpu.memory_space<vmem>>, vector<16x2xf32>
    tpu.vector_store %arg14[%c0_81, %c0_82], %204 {strides = array<i32>} : memref<16x2xf32, #tpu.memory_space<vmem>>, vector<16x2xf32>,
    return
  }
}

</mosaic_0001>

<bundles_post_ra>
// kernel: encoder_cnn_forward.1
= control target key start
LH: loop header
LB: loop body
LE: loop exit
PB: predicated region body
PF: predicated region fallthrough
CT: control target
= control target key end

     0   :  { %s2746_s19 = smov 18   ;;  %s2747_s20 = smov 17   ;;  %vm4671_vm4 = vcmask 1043456   ;;  %vm4670_vm9 = vcmask 293888   ;;  %s4655_s0 = inlined_call_operand.vmem [shape: f32[4,768], index: 0, kind: input, shape index: {}]   ;;  %s4656_s4 = inlined_call_operand.vmem [shape: f32[8,3], index: 4, kind: input, shape index: {}]   ;;  %s4657_s3 = inlined_call_operand.vmem [shape: f32[8,36], index: 3, kind: input, shape index: {}]   ;;  %s4658_s1 = inlined_call_operand.vmem [shape: f32[5,768], index: 1, kind: input, shape index: {}]   ;;  %s4659_s5 = inlined_call_operand.vmem [shape: f32[8,72], index: 5, kind: input, shape index: {}]   ;;  %s4660_s6 = inlined_call_operand.vmem [shape: f32[8,3], index: 6, kind: input, shape index: {}]   ;;  %s4661_s2 = inlined_call_operand.vmem [shape: f32[2,768], index: 2, kind: input, shape index: {}]   ;;  %s4662_s7 = inlined_call_operand.vmem [shape: f32[4,36], index: 7, kind: input, shape index: {}]   ;;  %s4663_s10 = inlined_call_operand.vmem [shape: f32[32,3], index: 10, kind: input, shape index: {}]   ;;  %s4664_s9 = inlined_call_operand.vmem [shape: f32[32,4], index: 9, kind: input, shape index: {}]   ;;  %s4665_s8 = inlined_call_operand.vmem [shape: f32[4,1], index: 8, kind: input, shape index: {}]   ;;  %s4666_s12 = inlined_call_operand.vmem [shape: f32[16,1], index: 12, kind: input, shape index: {}]   ;;  %s4667_s13 = inlined_call_operand.vmem [shape: f32[4,768], index: 13, kind: output, shape index: {0}]   ;;  %s4668_s11 = inlined_call_operand.vmem [shape: f32[16,32], index: 11, kind: input, shape index: {}]   ;;  %s4669_s14 = inlined_call_operand.vmem [shape: f32[16,2], index: 14, kind: output, shape index: {1}]  }
   0x1   :  { %v2835_v0 = vld [vmem:[%s4655_s0] sm:$0xff]  ;;  %v2840_v1 = vld [vmem:[%s4655_s0 + $0x8] sm:$0xff]  ;;  %v2845_v2 = vld [vmem:[%s4655_s0 + $0x10] sm:$0xff]  ;;  %s2745_s0 = smov 19   ;;  %s2748_s21 = smov 1  }
   0x2   :  { %66 = vst [vmem:[#allocation1] ss:$2 sm:$0xff] %v2835_v0  ;;  %s2749_s22 = smov 127   ;;  %s2750_s23 = smov 111  }
   0x3   :  { %68 = vst [vmem:[#allocation1 + $0x10] ss:$2 sm:$0xff] %v2840_v1  ;;  %s2751_s24 = smov 110   ;;  %s2752_s25 = smov 109  }
   0x4   :  { %70 = vst [vmem:[#allocation1 + $0x20] ss:$2 sm:$0xff] %v2845_v2 }
   0x9   :  { %v72_v3 = vld.sshfl [vmem:[#allocation1 + $0x8] sm:$0xff pattern:$0x75316420]  ;;  %v71_v4 = vld.sshfl [vmem:[#allocation1] sm:$0xff pattern:$0x75316420] }
   0xa   :  { %v73_v5 = vld.sshfl [vmem:[#allocation1 + $0x10] sm:$0xff pattern:$0x75316420]  ;;  %v2850_v6 = vld.sshfl [vmem:[#allocation1 + $0x18] sm:$0xff pattern:$0x75316420] }
   0xb   :  { %106 = vst [vmem:[#allocation1 + $0x10] ss:$2 sm:$0xff] %v2840_v1  ;;  %v2326_v7 = vpack.i.bf16 %v73_v5, %v72_v3  ;;  %v76_v8 = vld.sshfl [vmem:[#allocation1 + $0x28] sm:$0xff pattern:$0x75316420] }
   0xc   :  { %v2321_v9 = vpack.i.bf16 %v76_v8, %v71_v4  ;;  %104 = vst [vmem:[#allocation1] ss:$2 sm:$0xff] %v2835_v0  ;;  %v2854_v10 = vld.sshfl [vmem:[#allocation1 + $0x20] sm:$0xff pattern:$0x75316420] }
   0xd   :  { %2327 = vrot.lane.b32.xlu1 %v2326_v7, %s2745_s0  ;;  %108 = vst [vmem:[#allocation1 + $0x20] ss:$2 sm:$0xff] %v2845_v2 }
   0xe   :  { %2322 = vrot.lane.b32.xlu2 %v2321_v9, %s2745_s0 }
  0x12   :  { %v112_v11 = vld.sshfl [vmem:[#allocation1 + $0x18] sm:$0xff pattern:$0x75316420]  ;;  %v111_v12 = vld.sshfl [vmem:[#allocation1 + $0x10] sm:$0xff pattern:$0x75316420] }
  0x13   :  { %v110_v13 = vld.sshfl [vmem:[#allocation1 + $0x8] sm:$0xff pattern:$0x75316420]  ;;  %142 = vst [vmem:[#allocation1 + $0x10] ss:$2 sm:$0xff] %v2840_v1 }
  0x14   :  { %v2336_v14 = vpack.i.bf16 %v111_v12, %v110_v13  ;;  %v109_v15 = vld.sshfl [vmem:[#allocation1] sm:$0xff pattern:$0x75316420]  ;;  %v114_v17 = vld.sshfl [vmem:[#allocation1 + $0x28] sm:$0xff pattern:$0x75316420] }
  0x15   :  { %v2860_v16 = vld.sshfl [vmem:[#allocation1 + $0x20] sm:$0xff pattern:$0x75316420]  ;;  %140 = vst [vmem:[#allocation1] ss:$2 sm:$0xff] %v2835_v0  ;;  %v2331_v18 = vpack.i.bf16 %v114_v17, %v109_v15 }
  0x16   :  { %127 = vrot.lane.b32.xlu2 %v112_v11, %s2746_s19  ;;  %2337 = vrot.lane.b32.xlu1 %v2336_v14, %s2746_s19  ;;  %144 = vst [vmem:[#allocation1 + $0x20] ss:$2 sm:$0xff] %v2845_v2 }
  0x17   :  { %2332 = vrot.lane.b32.xlu0 %v2331_v18, %s2746_s19 }
  0x1a   :  { %v147_v19 = vld.sshfl [vmem:[#allocation1 + $0x10] sm:$0xff pattern:$0x75316420]  ;;  %v2867_v20 = vld.sshfl [vmem:[#allocation1 + $0x18] sm:$0xff pattern:$0x75316420] }
  0x1b   :  { %178 = vst [vmem:[#allocation1 + $0x10] ss:$2 sm:$0xff] %v2840_v1 }
  0x1c   :  { %v146_v21 = vld.sshfl [vmem:[#allocation1 + $0x8] sm:$0xff pattern:$0x75316420]  ;;  %v145_v22 = vld.sshfl [vmem:[#allocation1] sm:$0xff pattern:$0x75316420] }
  0x1d   :  { %v2346_v23 = vpack.i.bf16 %v147_v19, %v146_v21  ;;  %v2870_v24 = vld.sshfl [vmem:[#allocation1 + $0x20] sm:$0xff pattern:$0x75316420]  ;;  %v150_v25 = vld.sshfl [vmem:[#allocation1 + $0x28] sm:$0xff pattern:$0x75316420]  ;;  %v95_v19 = vlaneseq }
  0x1e   :  { %180 = vst [vmem:[#allocation1 + $0x20] ss:$2 sm:$0xff] %v2845_v2  ;;  %v2341_v26 = vpack.i.bf16 %v150_v25, %v145_v22 }
  0x1f   :  { %2347 = vrot.lane.b32.xlu2 %v2346_v23, %s2747_s20  ;;  %176 = vst [vmem:[#allocation1] ss:$2 sm:$0xff] %v2835_v0  ;;  %v2957_v22 = vand.u32 127, %v95_v19 }
  0x20   :  { %2342 = vrot.lane.b32.xlu1 %v2341_v26, %s2747_s20 }
  0x21   :  { %vm4672_vm0 = vcmp.lt.s32.totalorder %v2957_v22, 19  ;;  %vm4678_vm1 = vcmp.lt.s32.totalorder %v2957_v22, 18  ;;  %vm4676_vm2 = vcmp.lt.s32.totalorder %v2957_v22, 1  ;;  %vm4674_vm3 = vcmp.lt.s32.totalorder %v2957_v22, 127 }
  0x22   :  { %v184_v27 = vld.sshfl [vmem:[#allocation1 + $0x18] sm:$0xff pattern:$0x75316420]  ;;  %v183_v28 = vld.sshfl [vmem:[#allocation1 + $0x10] sm:$0xff pattern:$0x75316420] }
  0x23   :  { %199 = vrot.lane.b32.xlu0 %v184_v27, %s2748_s21  ;;  %214 = vst [vmem:[#allocation1 + $0x10] ss:$2 sm:$0xff] %v2840_v1  ;;  %vm4673_vm5 = vcmp.lt.s32.totalorder %v2957_v22, 17  ;;  %vm4680_vm6 = vcmp.lt.s32.totalorder %v2957_v22, 110  ;;  %vm4677_vm7 = vcmp.lt.s32.totalorder %v2957_v22, 109  ;;  %vm4675_vm8 = vcmp.lt.s32.totalorder %v2957_v22, 111 }
  0x25   :  { %v2878_v29 = vld.sshfl [vmem:[#allocation1 + $0x20] sm:$0xff pattern:$0x75316420]  ;;  %v186_v30 = vld.sshfl [vmem:[#allocation1 + $0x28] sm:$0xff pattern:$0x75316420] }
  0x26   :  { %v182_v31 = vld.sshfl [vmem:[#allocation1 + $0x8] sm:$0xff pattern:$0x75316420]  ;;  %v181_v32 = vld.sshfl [vmem:[#allocation1] sm:$0xff pattern:$0x75316420] }
  0x27   :  { %v2356_v33 = vpack.i.bf16 %v183_v28, %v182_v31  ;;  %216 = vst [vmem:[#allocation1 + $0x20] ss:$2 sm:$0xff] %v2845_v2  ;;  %v2351_v34 = vpack.i.bf16 %v186_v30, %v181_v32 }
  0x28   :  { %212 = vst [vmem:[#allocation1] ss:$2 sm:$0xff] %v2835_v0 }
  0x29   :  { %2357 = vrot.lane.b32.xlu1 %v2356_v33, %s2748_s21  ;;  %2352 = vrot.lane.b32.xlu2 %v2351_v34, %s2748_s21 }
  0x2a   :  { %v219_v35 = vld.sshfl [vmem:[#allocation1 + $0x10] sm:$0xff pattern:$0x75316420]  ;;  %v220_v36 = vld.sshfl [vmem:[#allocation1 + $0x18] sm:$0xff pattern:$0x75316420] }
  0x2b   :  { %v2366_v37 = vpack.i.bf16 %v220_v36, %v219_v35  ;;  %250 = vst [vmem:[#allocation1 + $0x10] ss:$2 sm:$0xff] %v2840_v1 }
  0x2d   :  { %2367 = vrot.lane.b32.xlu0 %v2366_v37, %s2749_s22 }
  0x2e   :  { %v221_v38 = vld.sshfl [vmem:[#allocation1 + $0x20] sm:$0xff pattern:$0x75316420]  ;;  %v222_v39 = vld.sshfl [vmem:[#allocation1 + $0x28] sm:$0xff pattern:$0x75316420] }
  0x2f   :  { %v2371_v40 = vpack.i.bf16 %v222_v39, %v221_v38  ;;  %252 = vst [vmem:[#allocation1 + $0x20] ss:$2 sm:$0xff] %v2845_v2  ;;  %v217_v41 = vld.sshfl [vmem:[#allocation1] sm:$0xff pattern:$0x75316420] }
  0x30   :  { %v218_v42 = vld.sshfl [vmem:[#allocation1 + $0x8] sm:$0xff pattern:$0x75316420] }
  0x31   :  { %2372 = vrot.lane.b32.xlu2 %v2371_v40, %s2749_s22  ;;  %v2361_v43 = vpack.i.bf16 %v218_v42, %v217_v41  ;;  %248 = vst [vmem:[#allocation1] ss:$2 sm:$0xff] %v2835_v0 }
  0x32   :  { %v255_v44 = vld.sshfl [vmem:[#allocation1 + $0x10] sm:$0xff pattern:$0x75316420]  ;;  %v256_v45 = vld.sshfl [vmem:[#allocation1 + $0x18] sm:$0xff pattern:$0x75316420] }
  0x33   :  { %2362 = vrot.lane.b32.xlu1 %v2361_v43, %s2749_s22  ;;  %286 = vst [vmem:[#allocation1 + $0x10] ss:$2 sm:$0xff] %v2840_v1  ;;  %v2381_v49 = vpack.i.bf16 %v256_v45, %v255_v44 }
  0x36   :  { %v257_v46 = vld.sshfl [vmem:[#allocation1 + $0x20] sm:$0xff pattern:$0x75316420]  ;;  %v258_v47 = vld.sshfl [vmem:[#allocation1 + $0x28] sm:$0xff pattern:$0x75316420] }
  0x37   :  { %v2386_v48 = vpack.i.bf16 %v258_v47, %v257_v46  ;;  %288 = vst [vmem:[#allocation1 + $0x20] ss:$2 sm:$0xff] %v2845_v2 }
  0x38   :  { %v253_v50 = vld.sshfl [vmem:[#allocation1] sm:$0xff pattern:$0x75316420]  ;;  %v254_v51 = vld.sshfl [vmem:[#allocation1 + $0x8] sm:$0xff pattern:$0x75316420] }
  0x39   :  { %2387 = vrot.lane.b32.xlu0 %v2386_v48, %s2750_s23  ;;  %v2376_v52 = vpack.i.bf16 %v254_v51, %v253_v50  ;;  %284 = vst [vmem:[#allocation1] ss:$2 sm:$0xff] %v2835_v0 }
  0x3a   :  { %v291_v53 = vld.sshfl [vmem:[#allocation1 + $0x10] sm:$0xff pattern:$0x75316420]  ;;  %v292_v54 = vld.sshfl [vmem:[#allocation1 + $0x18] sm:$0xff pattern:$0x75316420] }
  0x3b   :  { %2382 = vrot.lane.b32.xlu1 %v2381_v49, %s2750_s23  ;;  %322 = vst [vmem:[#allocation1 + $0x10] ss:$2 sm:$0xff] %v2840_v1  ;;  %2377 = vrot.lane.b32.xlu2 %v2376_v52, %s2750_s23  ;;  %v2396_v4 = vpack.i.bf16 %v292_v54, %v291_v53 }
  0x3e   :  { %v293_v55 = vld.sshfl [vmem:[#allocation1 + $0x20] sm:$0xff pattern:$0x75316420]  ;;  %v294_v56 = vld.sshfl [vmem:[#allocation1 + $0x28] sm:$0xff pattern:$0x75316420] }
  0x3f   :  { %v2401_v57 = vpack.i.bf16 %v294_v56, %v293_v55  ;;  %324 = vst [vmem:[#allocation1 + $0x20] ss:$2 sm:$0xff] %v2845_v2 }
  0x40   :  { %v289_v58 = vld.sshfl [vmem:[#allocation1] sm:$0xff pattern:$0x75316420]  ;;  %v290_v59 = vld.sshfl [vmem:[#allocation1 + $0x8] sm:$0xff pattern:$0x75316420] }
  0x41   :  { %v2391_v60 = vpack.i.bf16 %v290_v59, %v289_v58  ;;  %320 = vst [vmem:[#allocation1] ss:$2 sm:$0xff] %v2835_v0 }
  0x42   :  { %v328_v61 = vld.sshfl [vmem:[#allocation1 + $0x18] sm:$0xff pattern:$0x75316420]  ;;  %v327_v62 = vld.sshfl [vmem:[#allocation1 + $0x10] sm:$0xff pattern:$0x75316420] }
  0x43   :  { %2402 = vrot.lane.b32.xlu2 %v2401_v57, %s2751_s24  ;;  %2392 = vrot.lane.b32.xlu0 %v2391_v60, %s2751_s24  ;;  %394 = vst [vmem:[#allocation1 + $0x10] ss:$2 sm:$0xff] %v2840_v1 }
  0x46   :  { %v330_v63 = vld.sshfl [vmem:[#allocation1 + $0x28] sm:$0xff pattern:$0x75316420]  ;;  %v329_v3 = vld.sshfl [vmem:[#allocation1 + $0x20] sm:$0xff pattern:$0x75316420] }
  0x47   :  { %396 = vst [vmem:[#allocation1 + $0x20] ss:$2 sm:$0xff] %v2845_v2 }
  0x48   :  { %v326_v5 = vld.sshfl [vmem:[#allocation1 + $0x8] sm:$0xff pattern:$0x75316420]  ;;  %v325_v7 = vld.sshfl [vmem:[#allocation1] sm:$0xff pattern:$0x75316420] }
  0x49   :  { %339 = vrot.lane.b32.xlu1 %v326_v5, %s2752_s25  ;;  %392 = vst [vmem:[#allocation1] ss:$2 sm:$0xff] %v2835_v0 }
  0x4b   :  { %343 = vrot.lane.b32.xlu2 %v328_v61, %s2752_s25  ;;  %2397 = vrot.lane.b32.xlu0 %v2396_v4, %s2751_s24 }
  0x51   :  { %341 = vrot.lane.b32.xlu1 %v327_v62, %s2752_s25 }
  0x53   :  { %347 = vrot.lane.b32.xlu2 %v330_v63, %s2752_s25  ;;  %337 = vrot.lane.b32.xlu0 %v325_v7, %s2752_s25 }
  0x59   :  { %89 = vrot.lane.b32.xlu1 %v2850_v6, %s2745_s0 }
  0x5b   :  { %165 = vrot.lane.b32.xlu2 %v2870_v24, %s2747_s20  ;;  %163 = vrot.lane.b32.xlu0 %v2867_v20, %s2747_s20 }
  0x61   :  { %129 = vrot.lane.b32.xlu1 %v2860_v16, %s2746_s19 }
  0x63   :  { %345 = vrot.lane.b32.xlu0 %v329_v3, %s2752_s25 }
  0x68   :  { %v2923_v0 = vpop.permute.xlu2 %2322 }
  0x69   :  { %v2325_v23 = vunpack.i.h.bf16 %v2923_v0  ;;  %v2324_v24 = vunpack.i.l.bf16 %v2923_v0 }
  0x6b   :  { %201 = vrot.lane.b32.xlu0 %v2878_v29, %s2748_s21  ;;  %v2976_v31 = vsel %vm4672_vm0, %v2325_v23, %v2324_v24 }
  0x70   :  { %v2927_v2 = vpop.permute.xlu2 %127 }
  0x73   :  { %91 = vrot.lane.b32.xlu0 %v2854_v10, %s2745_s0 }
  0x79   :  { %v2933_v9 = vpop.permute.xlu2 %2347 }
  0x7a   :  { %v2349_v28 = vunpack.i.l.bf16 %v2933_v9 }
  0x7f   :  { %v2925_v1 = vpop.permute.xlu1 %2327 }
  0x80   :  { %v2329_v29 = vunpack.i.l.bf16 %v2925_v1 }
  0x83   :  { %v2939_v13 = vpop.permute.xlu2 %2352 }
  0x84   :  { %v2355_v25 = vunpack.i.h.bf16 %v2939_v13  ;;  %v2354_v26 = vunpack.i.l.bf16 %v2939_v13 }
  0x86   :  { %v2985_v34 = vsel %vm4676_vm2, %v2355_v25, %v2354_v26 }
  0x87   :  { %v380_v48 = vrot.slane %v2985_v34, 4 }
  0x88   :  { %v2929_v6 = vpop.permute.xlu1 %2337 }
  0x89   :  { %v2931_v8 = vpop.permute.xlu0 %2332  ;;  %v2339_v32 = vunpack.i.l.bf16 %v2929_v6 }
  0x8a   :  { %v2334_v33 = vunpack.i.l.bf16 %v2931_v8  ;;  %v2335_v40 = vunpack.i.h.bf16 %v2931_v8 }
  0x8b   :  { %v2945_v15 = vpop.permute.xlu2 %2372 }
  0x8c   :  { %v2375_v44 = vunpack.i.h.bf16 %v2945_v15  ;;  %v138_v49 = vsel %vm4678_vm1, %v2334_v33, %v2339_v32  ;;  %v139_v61 = vsel %vm4678_vm1, %v2335_v40, %v2334_v33 }
  0x92   :  { %v2935_v11 = vpop.permute.xlu1 %2342 }
  0x93   :  { %v2344_v46 = vunpack.i.l.bf16 %v2935_v11  ;;  %v2345_v57 = vunpack.i.h.bf16 %v2935_v11 }
  0x95   :  { %v2937_v12 = vpop.permute.xlu0 %199  ;;  %v2951_v18 = vpop.permute.xlu2 %2377  ;;  %v174_v4 = vsel %vm4673_vm5, %v2344_v46, %v2349_v28 }
  0x96   :  { %v2380_v50 = vunpack.i.h.bf16 %v2951_v18  ;;  %v2379_v58 = vunpack.i.l.bf16 %v2951_v18 }
  0x98   :  { %v282_v19 = vsel %vm4675_vm8, %v2379_v58, %v2380_v50 }
  0x9b   :  { %v2941_v14 = vpop.permute.xlu1 %2357 }
  0x9c   :  { %v2359_v41 = vunpack.i.l.bf16 %v2941_v14 }
  0x9d   :  { %v2963_v27 = vpop.permute.xlu2 %2402 }
  0x9e   :  { %v210_v56 = vsel %vm4676_vm2, %v2354_v26, %v2359_v41  ;;  %v2405_v5 = vunpack.i.h.bf16 %v2963_v27 }
  0x9f   :  { %v2943_v10 = vpop.permute.xlu0 %2367  ;;  %v381_v33 = vrot.slane %v210_v56, 4 }
  0xa0   :  { %v2369_v35 = vunpack.i.l.bf16 %v2943_v10 }
  0xa5   :  { %v2947_v16 = vpop.permute.xlu1 %2362  ;;  %v3017_v53 = vpop.permute.xlu2 %343 }
  0xa6   :  { %v2365_v36 = vunpack.i.h.bf16 %v2947_v16  ;;  %v2364_v42 = vunpack.i.l.bf16 %v2947_v16  ;;  %v2360_v16 = vunpack.i.h.bf16 %v2941_v14 }
  0xa8   :  { %v245_v52 = vsel %vm4674_vm3, %v2365_v36, %v2369_v35  ;;  %v246_v55 = vsel %vm4674_vm3, %v2364_v42, %v2365_v36  ;;  %v209_v18 = vsel %vm4676_vm2, %v2359_v41, %v2360_v16 }
  0xa9   :  { %v416_v3 = vrot.slane %v245_v52, 4  ;;  %v415_v26 = vrot.slane %v246_v55, 4  ;;  %v363_v52 = vrot.slane %v138_v49, 4  ;;  %v2370_v55 = vunpack.i.h.bf16 %v2943_v10 }
  0xaa   :  { %v2340_v49 = vunpack.i.h.bf16 %v2929_v6 }
  0xab   :  { %v2949_v17 = vpop.permute.xlu0 %2387 }
  0xac   :  { %v137_v14 = vsel %vm4678_vm1, %v2339_v32, %v2340_v49 }
  0xad   :  { %v2953_v20 = vpop.permute.xlu1 %2382 }
  0xae   :  { %v2384_v45 = vunpack.i.l.bf16 %v2953_v20 }
  0xb0   :  { %v281_v60 = vsel %vm4675_vm8, %v2380_v50, %v2384_v45  ;;  %v102_v50 = vsel %vm4672_vm0, %v2324_v24, %v2329_v29  ;;  %v2350_v24 = vunpack.i.h.bf16 %v2933_v9 }
  0xb2   :  { %v173_v32 = vsel %vm4673_vm5, %v2349_v28, %v2350_v24 }
  0xb5   :  { %v2955_v21 = vpop.permute.xlu0 %2392 }
  0xb6   :  { %v2395_v37 = vunpack.i.h.bf16 %v2955_v21  ;;  %v2394_v38 = vunpack.i.l.bf16 %v2955_v21  ;;  %v398_v21 = vld.sshfl [vmem:[#allocation1 + $0x8] sm:$0xff pattern:$0x75316420] }
  0xb8   :  { %v318_v51 = vsel %vm4680_vm6, %v2394_v38, %v2395_v37 }
  0xb9   :  { %v433_v63 = vrot.slane %v318_v51, 4  ;;  %v175_v51 = vsel %vm4673_vm5, %v2345_v57, %v2344_v46  ;;  %v459_v46 = vsel %vm4671_vm4, %v398_v21, %v416_v3  ;;  %v447_v21 = vsel %vm4671_vm4, %v102_v50, %v363_v52  ;;  %v3126_v52 = vld [vmem:[%s4657_s3] sm:$0xff] }
  0xbb   :  { %v340_v30 = vpop.permute.xlu1 %339  ;;  %v464_v56 = vsel %vm4671_vm4, %v282_v19, %v433_v63  ;;  %v2390_v63 = vunpack.i.h.bf16 %v2949_v17  ;;  %v247_v19 = vsel %vm4674_vm3, %v2375_v44, %v2364_v42  ;;  %v2385_v42 = vunpack.i.h.bf16 %v2953_v20 }
  0xbc   :  { %v420_v50 = vrot.slane %v247_v19, 4  ;;  %v2330_v20 = vunpack.i.h.bf16 %v2925_v1  ;;  %v364_v19 = vrot.slane %v137_v14, 4 }
  0xbd   :  { %v2991_v39 = vpop.permute.xlu0 %2397 }
  0xbe   :  { %v2399_v43 = vunpack.i.l.bf16 %v2991_v39  ;;  %v2400_v34 = vunpack.i.h.bf16 %v2991_v39 }
  0xc0   :  { %v317_v47 = vsel %vm4680_vm6, %v2395_v37, %v2399_v43 }
  0xc1   :  { %v434_v54 = vrot.slane %v317_v47, 4  ;;  %v397_v47 = vld.sshfl [vmem:[#allocation1] sm:$0xff pattern:$0x75316420] }
  0xc2   :  { %v458_v3 = vsel %vm4671_vm4, %v397_v47, %v415_v26 }
  0xc3   :  { %v342_v59 = vpop.permute.xlu1 %341  ;;  %v465_v37 = vsel %vm4671_vm4, %v281_v60, %v434_v54  ;;  %v3068_v54 = vld [vmem:[%s4656_s4] sm:$0xff]  ;;  %v319_v60 = vsel %vm4680_vm6, %v2405_v5, %v2394_v38  ;;  %v316_v38 = vsel %vm4680_vm6, %v2399_v43, %v2400_v34 }
  0xc4   :  { %v353_v62 = vsel %vm4677_vm7, %v340_v30, %v342_v59  ;;  %v438_v26 = vrot.slane %v319_v60, 4  ;;  %v352_v47 = vsel %vm4677_vm7, %v342_v59, %v3017_v53  ;;  %v280_v59 = vsel %vm4675_vm8, %v2384_v45, %v2385_v42  ;;  %v399_v45 = vld.sshfl [vmem:[#allocation1 + $0x10] sm:$0xff pattern:$0x75316420] }
  0xc5   :  { %2274 = vmatpush.msk.msra.mxu1 %vm4671_vm4, %v353_v62  ;;  %v338_v7 = vpop.permute.xlu0 %337  ;;  %v4691_v62 = vmov 0   ;;  %v382_v60 = vrot.slane %v209_v18, 4 }
  0xc6   :  { %v354_v36 = vsel %vm4677_vm7, %v338_v7, %v340_v30  ;;  %v362_v30 = vrot.slane %v139_v61, 4  ;;  %2406 = vset.pattern.permute.xlu1 %v4691_v62  ;;  %2589 = vset.pattern.permute.xlu0 %v4691_v62  ;;  %v453_v61 = vsel %vm4671_vm4, %v174_v4, %v381_v33  ;;  %v452_v4 = vsel %vm4671_vm4, %v175_v51, %v380_v48 }
  0xc7   :  { %2272 = vmatpush.msk.msra.mxu2 %vm4671_vm4, %v354_v36  ;;  %529 = vmatpush.msra.mxu1 %v465_v37  ;;  %v2404_v33 = vunpack.i.l.bf16 %v2963_v27  ;;  %v348_v36 = vpop.permute.xlu2 %347  ;;  %v244_v48 = vsel %vm4674_vm3, %v2369_v35, %v2370_v55  ;;  %v435_v51 = vrot.slane %v316_v38, 4  ;;  %v283_v35 = vsel %vm4675_vm8, %v2390_v63, %v2379_v58 }
  0xc8   :  { %472 = vperm.xlu1 %2406, %v3068_v54   ;;  %2699 = vset.pattern.permute.xlu2 %v4691_v62  ;;  %v446_v43 = vsel %vm4671_vm4, %v2976_v31, %v362_v30  ;;  %v355_v31 = vsel %vm4677_vm7, %v348_v36, %v338_v7  ;;  %v402_v7 = vld.sshfl [vmem:[#allocation1 + $0x28] sm:$0xff pattern:$0x75316420]  ;;  %v2374_v30 = vunpack.i.l.bf16 %v2945_v15  ;;  %v469_v58 = vsel %vm4671_vm4, %v283_v35, %v438_v26 }
  0xc9   :  { %509 = vmatpush.msra.mxu2 %v464_v56  ;;  %530 = vmatpush.msra.mxu1 %v459_v46  ;;  %v417_v56 = vrot.slane %v244_v48, 4  ;;  %v466_v41 = vsel %vm4671_vm4, %v280_v59, %v435_v51  ;;  %v463_v46 = vsel %vm4671_vm4, %v402_v7, %v420_v50  ;;  %v314_v38 = vsel %vm4680_vm6, %v2404_v33, %v2405_v5 }
  0xca   :  { %v242_v27 = vsel %vm4674_vm3, %v2374_v30, %v2375_v44  ;;  %v437_v10 = vrot.slane %v314_v38, 4  ;;  %v3274_v38 = vld [vmem:[%s4658_s1 + $0x10] sm:$0x1f] }
  0xcb   :  { %510 = vmatpush.msra.mxu2 %v458_v3  ;;  %531 = vmatpush.msra.mxu1 %v453_v61  ;;  %v315_v61 = vsel %vm4680_vm6, %v2400_v34, %v2404_v33  ;;  %v2389_v3 = vunpack.i.l.bf16 %v2949_v17  ;;  %v460_v39 = vsel %vm4671_vm4, %v399_v45, %v417_v56  ;;  %v243_v34 = vsel %vm4674_vm3, %v2370_v55, %v2374_v30  ;;  %v90_v5 = vpop.permute.xlu1 %89  ;;  %v400_v33 = vld.sshfl [vmem:[#allocation1 + $0x18] sm:$0xff pattern:$0x75316420] }
  0xcc   :  { %v436_v28 = vrot.slane %v315_v61, 4  ;;  %v100_v9 = vsel %vm4672_vm0, %v2330_v20, %v90_v5  ;;  %vm54_vm15 = vcmp.gt.f32.partialorder %v3274_v38, 0.5 }
  0xcd   :  { %v3109_v37 = vpop.permute.xlu0 %163  ;;  %511 = vmatpush.msra.mxu2 %v452_v4  ;;  %532 = vmatpush.msra.mxu1 %v447_v21  ;;  %v101_v4 = vsel %vm4672_vm0, %v2329_v29, %v2330_v20  ;;  %v278_v15 = vsel %vm4675_vm8, %v2389_v3, %v2390_v63  ;;  %v418_v29 = vrot.slane %v243_v34, 4  ;;  %v279_v26 = vsel %vm4675_vm8, %v2385_v42, %v2389_v3  ;;  %v401_v63 = vld.sshfl [vmem:[#allocation1 + $0x20] sm:$0xff pattern:$0x75316420] }
  0xce   :  { %2275 = vmatmul.msk.f32.vlgmr.msra.gmra.mxu1 %vm4670_vm9, %v3126_v52  ;;  %v448_v44 = vsel %vm4671_vm4, %v101_v4, %v364_v19  ;;  %v467_v17 = vsel %vm4671_vm4, %v279_v26, %v436_v28  ;;  %v172_v48 = vsel %vm4673_vm5, %v2350_v24, %v3109_v37  ;;  %v468_v42 = vsel %vm4671_vm4, %v278_v15, %v437_v10  ;;  %v3293_v10 = vld [vmem:[%s4658_s1 + $0x20] sm:$0x1f]  ;;  %v3298_v15 = vld [vmem:[%s4658_s1 + $0x28] sm:$0x1f] }
  0xcf   :  { %2282 = vmatpush.msk.msrb.mxu1 %vm4671_vm4, %v355_v31  ;;  %512 = vmatpush.msra.mxu2 %v446_v43  ;;  %v454_v43 = vsel %vm4671_vm4, %v173_v32, %v382_v60  ;;  %v461_v31 = vsel %vm4671_vm4, %v400_v33, %v418_v29  ;;  %v166_v35 = vpop.permute.xlu2 %165  ;;  %v3279_v28 = vperm.slane %v3274_v38, 0  ;;  %v3301_v29 = vperm.slane %v3293_v10, 0 }
  0xd0   :  { %2273 = vmatmul.msk.f32.vlgmr.msra.gmra.mxu2 %vm4670_vm9, %v3126_v52  ;;  %v170_v56 = vsel %vm4673_vm5, %v166_v35, %v2345_v57  ;;  %v171_v13 = vsel %vm4673_vm5, %v3109_v37, %v166_v35 }
  0xd1   :  { %2276 = vmatpush.msk.msrb.mxu2 %vm4671_vm4, %v352_v47  ;;  %609 = vmatpush.msrb.mxu1 %v469_v58 }
  0xd3   :  { %549 = vmatpush.msrb.mxu2 %v466_v41  ;;  %610 = vmatpush.msrb.mxu1 %v463_v46  ;;  %v130_v18 = vpop.permute.xlu1 %129  ;;  %v3263_v46 = vld [vmem:[%s4658_s1 + $0x8] sm:$0x1f] }
  0xd4   :  { %v134_v20 = vsel %vm4678_vm1, %v130_v18, %v2335_v40  ;;  %v135_v11 = vsel %vm4678_vm1, %v2927_v2, %v130_v18  ;;  %vm53_vm13 = vcmp.gt.f32.partialorder %v3263_v46, 0.5 }
  0xd5   :  { %550 = vmatpush.msrb.mxu2 %v460_v39  ;;  %v346_v21 = vpop.permute.xlu0 %345  ;;  %v366_v57 = vrot.slane %v135_v11, 4  ;;  %v367_v37 = vrot.slane %v134_v20, 4 }
  0xd6   :  { %v351_v55 = vsel %vm4677_vm7, %v3017_v53, %v346_v21  ;;  %v350_v1 = vsel %vm4677_vm7, %v346_v21, %v348_v36  ;;  %v419_v53 = vrot.slane %v242_v27, 4  ;;  %v208_v36 = vsel %vm4676_vm2, %v2360_v16, %v2937_v12  ;;  %v3284_v27 = vld [vmem:[%s4658_s1 + $0x18] sm:$0x1f] }
  0xd7   :  { %551 = vmatpush.msrb.mxu2 %v454_v43  ;;  %2278 = vmatpush.msk.msra.mxu3 %vm4671_vm4, %v351_v55  ;;  %v136_v16 = vsel %vm4678_vm1, %v2340_v49, %v2927_v2  ;;  %v383_v47 = vrot.slane %v208_v36, 4  ;;  %v3288_v43 = vperm.slane %v3284_v27, 0 }
  0xd8   :  { %2280 = vmatpush.msk.msra.mxu0 %vm4671_vm4, %v350_v1  ;;  %v462_v24 = vsel %vm4671_vm4, %v401_v63, %v419_v53  ;;  %v365_v50 = vrot.slane %v136_v16, 4  ;;  %v3305_v63 = vperm.slane %v3298_v15, 0 }
  0xd9   :  { %552 = vmatpush.msrb.mxu2 %v448_v44  ;;  %569 = vmatpush.msra.mxu3 %v467_v17  ;;  %v455_v51 = vsel %vm4671_vm4, %v172_v48, %v383_v47 }
  0xda   :  { %2277 = vmatmul.msk.f32.vlgmr.msrb.gmra.mxu2 %vm4670_vm9, %v3126_v52  ;;  %589 = vmatpush.msra.mxu0 %v468_v42  ;;  %v449_v7 = vsel %vm4671_vm4, %v100_v9, %v365_v50  ;;  %v4699_v9 = vmov 1  }
  0xdb   :  { %570 = vmatpush.msra.mxu3 %v461_v31  ;;  %2407 = vset.pattern.permute.xlu1 %v4699_v9 }
  0xdc   :  { %590 = vmatpush.msra.mxu0 %v462_v24  ;;  %681 = vperm.xlu1 %2407, %v3068_v54   ;;  %v4693_v24 = vmov 2  }
  0xdd   :  { %571 = vmatpush.msra.mxu3 %v455_v51  ;;  %v202_v6 = vpop.permute.xlu0 %201 }
  0xde   :  { %v206_v49 = vsel %vm4676_vm2, %v202_v6, %v2355_v25  ;;  %v207_v59 = vsel %vm4676_vm2, %v2937_v12, %v202_v6 }
  0xdf   :  { %v384_v30 = vrot.slane %v207_v59, 4  ;;  %v385_v58 = vrot.slane %v206_v49, 4  ;;  %572 = vmatpush.msra.mxu3 %v449_v7 }
  0xe0   :  { %2279 = vmatmul.msk.f32.vlgmr.msra.gmra.mxu3 %vm4670_vm9, %v3126_v52 }
  0xe1   :  { %v456_v12 = vsel %vm4671_vm4, %v171_v13, %v384_v30  ;;  %v457_v25 = vsel %vm4671_vm4, %v170_v56, %v385_v58 }
  0xe2   :  { %591 = vmatpush.msra.mxu0 %v456_v12  ;;  %611 = vmatpush.msrb.mxu1 %v457_v25 }
  0xe4   :  { %2408 = vset.pattern.permute.xlu1 %v4693_v24 }
  0xe5   :  { %v92_v45 = vpop.permute.xlu0 %91  ;;  %691 = vperm.xlu1 %2408, %v3068_v54  }
  0xe6   :  { %v98_v14 = vsel %vm4672_vm0, %v92_v45, %v2325_v23  ;;  %v99_v8 = vsel %vm4672_vm0, %v90_v5, %v92_v45  ;;  %v3258_v23 = vld [vmem:[%s4658_s1] sm:$0x1f] }
  0xe7   :  { %v450_v41 = vsel %vm4671_vm4, %v99_v8, %v366_v57  ;;  %v451_v40 = vsel %vm4671_vm4, %v98_v14, %v367_v37  ;;  %v3266_v32 = vperm.slane %v3258_v23, 0  ;;  %vm52_vm14 = vcmp.gt.f32.partialorder %v3258_v23, 0.5 }
  0xe8   :  { %592 = vmatpush.msra.mxu0 %v450_v41  ;;  %612 = vmatpush.msrb.mxu1 %v451_v40 }
  0xe9   :  { %2281 = vmatmul.msk.f32.vlgmr.msra.gmra.mxu0 %vm4670_vm9, %v3126_v52  ;;  %2283 = vmatmul.msk.f32.vlgmr.msrb.gmra.mxu1 %vm4670_vm9, %v3126_v52  ;;  %v3269_v52 = vperm.slane %v3263_v46, 0 }
  0xed   :  { %2697 = vset.pattern.permute.xlu1 %v4691_v62 }
 0x13a   :  { %v473_v0 = vpop.permute.xlu1 %472 }
 0x14b   :  { %v534_v60 = vpop.f32.mrf.mxu1 }
 0x14c   :  { %v535_v3 = vadd.f32 %v534_v60, %v473_v0 }
 0x14e   :  { %v624_v34 = vmul.f32 %v3269_v52, %v535_v3 }
 0x153   :  { %v514_v2 = vpop.f32.mrf.mxu2 }
 0x154   :  { %v515_v61 = vadd.f32 %v514_v2, %v473_v0 }
 0x156   :  { %v623_v19 = vmul.f32 %v3266_v32, %v515_v61 }
 0x158   :  { %v629_v5 = vadd.f32 %v624_v34, %v623_v19  ;;  %v682_v34 = vpop.permute.xlu1 %681 }
 0x15d   :  { %v554_v39 = vpop.f32.mrf.mxu2 }
 0x15e   :  { %v555_v4 = vadd.f32 %v554_v39, %v473_v0 }
 0x160   :  { %v625_v21 = vmul.f32 %v3279_v28, %v555_v4 }
 0x162   :  { %v630_v44 = vadd.f32 %v629_v5, %v625_v21 }
 0x163   :  { %v574_v55 = vpop.f32.mrf.mxu3 }
 0x164   :  { %v575_v1 = vadd.f32 %v574_v55, %v473_v0 }
 0x166   :  { %v626_v26 = vmul.f32 %v3288_v43, %v575_v1  ;;  %v594_v33 = vpop.f32.mrf.mxu0  ;;  %v614_v53 = vpop.f32.mrf.mxu1 }
 0x167   :  { %v595_v36 = vadd.f32 %v594_v33, %v473_v0  ;;  %v615_v17 = vadd.f32 %v614_v53, %v473_v0  ;;  %v692_v53 = vpop.permute.xlu1 %691 }
 0x168   :  { %v631_v48 = vadd.f32 %v630_v44, %v626_v26 }
 0x169   :  { %v627_v42 = vmul.f32 %v3301_v29, %v595_v36  ;;  %v628_v16 = vmul.f32 %v3305_v63, %v615_v17 }
 0x16b   :  { %v632_v31 = vadd.f32 %v631_v48, %v627_v42 }
 0x16d   :  { %v633_v47 = vadd.f32 %v632_v31, %v628_v16 }
 0x16f   :  { %634 = vadd.xlane.f32.xlu2 %v633_v47 }
 0x1e2   :  { %v635_v51 = vpop.xlane.xlu2 %634 }
 0x1e3   :  { %v636_v50 = vmul.f32 0.001953125, %v635_v51 }
 0x1e5   :  { %v637_v35 = vsub.f32 %v515_v61, %v636_v50  ;;  %v638_v6 = vsub.f32 %v535_v3, %v636_v50  ;;  %v639_v49 = vsub.f32 %v555_v4, %v636_v50  ;;  %v640_v59 = vsub.f32 %v575_v1, %v636_v50 }
 0x1e6   :  { %v641_v7 = vsub.f32 %v595_v36, %v636_v50  ;;  %v642_v56 = vsub.f32 %v615_v17, %v636_v50 }
 0x1e7   :  { %v643_v18 = vmul.f32 %v637_v35, %v3266_v32  ;;  %v644_v30 = vmul.f32 %v638_v6, %v3269_v52  ;;  %v645_v58 = vmul.f32 %v639_v49, %v3279_v28  ;;  %v646_v13 = vmul.f32 %v640_v59, %v3288_v43 }
 0x1e8   :  { %v647_v25 = vmul.f32 %v641_v7, %v3301_v29  ;;  %v648_v57 = vmul.f32 %v642_v56, %v3305_v63 }
 0x1e9   :  { %v649_v12 = vmul.f32 %v643_v18, %v643_v18  ;;  %v650_v54 = vmul.f32 %v644_v30, %v644_v30  ;;  %v651_v20 = vmul.f32 %v645_v58, %v645_v58  ;;  %v652_v37 = vmul.f32 %v646_v13, %v646_v13 }
 0x1ea   :  { %v653_v14 = vmul.f32 %v647_v25, %v647_v25  ;;  %v654_v41 = vmul.f32 %v648_v57, %v648_v57 }
 0x1eb   :  { %v655_v11 = vadd.f32 %v650_v54, %v649_v12 }
 0x1ed   :  { %v656_v45 = vadd.f32 %v655_v11, %v651_v20 }
 0x1ef   :  { %v657_v8 = vadd.f32 %v656_v45, %v652_v37  ;;  %v3329_v37 = vsel %vm53_vm13, 1, %v4691_v62 }
 0x1f1   :  { %v658_v40 = vadd.f32 %v657_v8, %v653_v14  ;;  %v731_v14 = vperm.slane %v3329_v37, 1 }
 0x1f3   :  { %v659_v2 = vadd.f32 %v658_v40, %v654_v41  ;;  %vm3341_vm13 = vcmp.eq.s32.totalorder %v731_v14, 1 }
 0x1f5   :  { %660 = vadd.xlane.f32.xlu0 %v659_v2  ;;  %v3346_v2 = vsel %vm54_vm15, 1, %v4691_v62 }
 0x268   :  { %v661_v0 = vpop.xlane.xlu0 %660 }
 0x269   :  { %v662_v60 = vmul.f32 0.001953125, %v661_v0 }
 0x26b   :  { %v663_v61 = vadd.f32 1e-05, %v662_v60 }
 0x26d   :  { %2707 = vrsqrt.f32 %v663_v61  ;;  %vm670_vm11 = vweird.f32 %v663_v61 }
 0x273   :  { %v2708_v3 = vpop.eup %2707 }
 0x274   :  { %v665_v39 = vmul.f32 %v2708_v3, %v663_v61  ;;  %vm671_vm10 = vweird.f32 %v2708_v3  ;;  %v732_v61 = vperm.slane %v3346_v2, 1 }
 0x275   :  { %vm672_vm12 = vmor %vm670_vm11, %vm671_vm10  ;;  %vm55_vm10 = vcmp.gt.f32.partialorder %v3284_v27, 0.5  ;;  %vm56_vm11 = vcmp.gt.f32.partialorder %v3293_v10, 0.5 }
 0x276   :  { %v666_v19 = vmul.f32 %v2708_v3, %v665_v39  ;;  %v3351_v10 = vsel %vm56_vm11, 1, %v4691_v62  ;;  %vm3370_vm15 = vcmp.eq.s32.totalorder %v732_v61, 1 }
 0x278   :  { %v667_v4 = vmul.f32 0.5, %v666_v19  ;;  %v734_v19 = vperm.slane %v3351_v10, 1 }
 0x27a   :  { %v668_v5 = vsub.f32 1.5, %v667_v4 }
 0x27c   :  { %v669_v21 = vmul.f32 %v2708_v3, %v668_v5 }
 0x27e   :  { %v673_v55 = vsel %vm672_vm12, %v2708_v3, %v669_v21  ;;  %vm57_vm12 = vcmp.gt.f32.partialorder %v3298_v15, 0.5  ;;  %v3354_v15 = vsel %vm55_vm10, 1, %v4691_v62  ;;  %vm3374_vm10 = vcmp.eq.s32.totalorder %v734_v19, 1 }
 0x27f   :  { %v674_v1 = vmul.f32 %v673_v55, %v637_v35  ;;  %v675_v44 = vmul.f32 %v673_v55, %v638_v6  ;;  %v676_v26 = vmul.f32 %v673_v55, %v639_v49  ;;  %v677_v33 = vmul.f32 %v673_v55, %v640_v59 }
 0x280   :  { %v678_v50 = vmul.f32 %v673_v55, %v641_v7  ;;  %v679_v13 = vmul.f32 %v673_v55, %v642_v56  ;;  %v3326_v56 = vsel %vm52_vm14, 1, %v4691_v62  ;;  %v3357_v0 = vsel %vm57_vm12, 1, %v4691_v62 }
 0x281   :  { %v684_v36 = vmul.f32 %v682_v34, %v674_v1  ;;  %v685_v17 = vmul.f32 %v682_v34, %v675_v44  ;;  %v686_v16 = vmul.f32 %v682_v34, %v676_v26  ;;  %v687_v31 = vmul.f32 %v682_v34, %v677_v33 }
 0x282   :  { %v688_v49 = vmul.f32 %v682_v34, %v678_v50  ;;  %v689_v59 = vmul.f32 %v682_v34, %v679_v13  ;;  %v730_v45 = vperm.slane %v3326_v56, 1  ;;  %v733_v34 = vperm.slane %v3354_v15, 1 }
 0x283   :  { %v694_v48 = vadd.f32 %v692_v53, %v684_v36  ;;  %v695_v42 = vadd.f32 %v692_v53, %v685_v17  ;;  %v696_v30 = vadd.f32 %v692_v53, %v686_v16  ;;  %v697_v58 = vadd.f32 %v692_v53, %v687_v31 }
 0x284   :  { %v698_v54 = vadd.f32 %v692_v53, %v688_v49  ;;  %v699_v25 = vadd.f32 %v692_v53, %v689_v59  ;;  %vm3337_vm14 = vcmp.eq.s32.totalorder %v730_v45, 1  ;;  %v735_v21 = vperm.slane %v3357_v0, 1 }
 0x285   :  { %v700_v47 = vmax.f32 %v694_v48, 0.0  ;;  %v701_v51 = vmax.f32 %v695_v42, 0.0  ;;  %v702_v35 = vmax.f32 %v696_v30, 0.0  ;;  %v703_v6 = vmax.f32 %v697_v58, 0.0 }
 0x286   :  { %v704_v20 = vmax.f32 %v698_v54, 0.0  ;;  %v705_v11 = vmax.f32 %v699_v25, 0.0  ;;  %vm3378_vm11 = vcmp.eq.s32.totalorder %v733_v34, 1  ;;  %vm3384_vm12 = vcmp.eq.s32.totalorder %v735_v21, 1 }
 0x287   :  { %v2409_v18 = vpack.i.bf16 %v701_v51, %v700_v47  ;;  %v2414_v12 = vpack.i.bf16 %v703_v6, %v702_v35  ;;  %v769_v13 = vperm.slane %v3354_v15, 2 }
 0x288   :  { %v2419_v57 = vpack.i.bf16 %v705_v11, %v704_v20 }
 0x289   :  { %2410 = vrot.lane.b32.xlu1 %v2409_v18, %s2749_s22  ;;  %vm3408_vm9 = vcmp.eq.s32.totalorder %v769_v13, 1 }
 0x291   :  { %2415 = vrot.lane.b32.xlu1 %v2414_v12, %s2749_s22  ;;  %v766_v12 = vperm.slane %v3326_v56, 2 }
 0x293   :  { %vm3418_vm0 = vcmp.eq.s32.totalorder %v766_v12, 1  ;;  %v807_v12 = vperm.slane %v3357_v0, 3 }
 0x299   :  { %2420 = vrot.lane.b32.xlu1 %v2419_v57, %s2749_s22 }
 0x2fb   :  { %v2411_v7 = vpop.permute.xlu1 %2410 }
 0x2fc   :  { %v2413_v8 = vunpack.i.h.bf16 %v2411_v7  ;;  %v2412_v41 = vunpack.i.l.bf16 %v2411_v7 }
 0x2fe   :  { %v722_v38 = vsel %vm4674_vm3, %v2412_v41, %v2413_v8 }
 0x2ff   :  { %v742_v3 = vsel %vm3337_vm14, %v722_v38, %v700_v47 }
 0x303   :  { %v2416_v23 = vpop.permute.xlu1 %2415 }
 0x304   :  { %v2417_v27 = vunpack.i.l.bf16 %v2416_v23  ;;  %v2418_v4 = vunpack.i.h.bf16 %v2416_v23  ;;  %v4733_v23 = vmov 0 }
 0x306   :  { %v721_v60 = vsel %vm4674_vm3, %v2413_v8, %v2417_v27  ;;  %v720_v33 = vsel %vm4674_vm3, %v2417_v27, %v2418_v4 }
 0x307   :  { %v743_v39 = vsel %vm3341_vm13, %v721_v60, %v701_v51  ;;  %v744_v31 = vsel %vm3370_vm15, %v720_v33, %v702_v35  ;;  %v770_v35 = vperm.slane %v3351_v10, 2  ;;  %v768_v60 = vperm.slane %v3346_v2, 2 }
 0x308   :  { %v2424_v5 = vpack.i.bf16 %v743_v39, %v742_v3 }
 0x309   :  { %vm3412_vm4 = vcmp.eq.s32.totalorder %v770_v35, 1 }
 0x30a   :  { %2425 = vrot.lane.b32.xlu2 %v2424_v5, %s2748_s21 }
 0x30b   :  { %v2421_v55 = vpop.permute.xlu1 %2420 }
 0x30c   :  { %v2423_v53 = vunpack.i.h.bf16 %v2421_v55  ;;  %v2422_v36 = vunpack.i.l.bf16 %v2421_v55 }
 0x30e   :  { %v718_v48 = vsel %vm4674_vm3, %v2422_v36, %v2423_v53  ;;  %v719_v42 = vsel %vm4674_vm3, %v2418_v4, %v2422_v36  ;;  %v723_v16 = vsel %vm4674_vm3, %v2423_v53, %v2412_v41  ;;  %v4731_v41 = vmov 0 }
 0x30f   :  { %v746_v47 = vsel %vm3374_vm10, %v718_v48, %v704_v20  ;;  %v745_v51 = vsel %vm3378_vm11, %v719_v42, %v703_v6  ;;  %v747_v50 = vsel %vm3384_vm12, %v723_v16, %v705_v11  ;;  %v767_v6 = vperm.slane %v3329_v37, 2 }
 0x310   :  { %v2429_v18 = vpack.i.bf16 %v746_v47, %v744_v31  ;;  %v2434_v30 = vpack.i.bf16 %v745_v51, %v747_v50  ;;  %v4727_v20 = vmov 0  ;;  %v4729_v11 = vmov 0 }
 0x311   :  { %v4728_v20 = vsel %vm3408_vm9, 4294967295, %v4727_v20  ;;  %v4730_v11 = vsel %vm3412_vm4, 4294967295, %v4729_v11  ;;  %v4732_v41 = vsel %vm3418_vm0, 4294967295, %v4731_v41  ;;  %vm3422_vm5 = vcmp.eq.s32.totalorder %v767_v6, 1 }
 0x312   :  { %2430 = vrot.lane.b32.xlu1 %v2429_v18, %s2748_s21  ;;  %2435 = vrot.lane.b32.xlu0 %v2434_v30, %s2748_s21  ;;  %v4734_v23 = vsel %vm3422_vm5, 4294967295, %v4733_v23  ;;  %v771_v4 = vperm.slane %v3357_v0, 2  ;;  %vm3448_vm3 = vcmp.eq.s32.totalorder %v768_v60, 1  ;;  %v4735_v48 = vmov 0 }
 0x313   :  { %v4736_v48 = vsel %vm3448_vm3, 4294967295, %v4735_v48  ;;  %v805_v18 = vperm.slane %v3354_v15, 3  ;;  %v802_v30 = vperm.slane %v3326_v56, 3  ;;  %v4749_v60 = vmov 0 }
 0x314   :  { %vm3452_vm8 = vcmp.eq.s32.totalorder %v771_v4, 1 }
 0x315   :  { %vm3475_vm7 = vcmp.eq.s32.totalorder %v802_v30, 1 }
 0x364   :  { %v2426_v58 = vpop.permute.xlu2 %2425 }
 0x365   :  { %v2428_v49 = vunpack.i.h.bf16 %v2426_v58  ;;  %v2427_v59 = vunpack.i.l.bf16 %v2426_v58 }
 0x367   :  { %v764_v8 = vsel %vm4676_vm2, %v2427_v59, %v2428_v49 }
 0x368   :  { %v779_v55 = vsel %vm3422_vm5, %v764_v8, %v743_v39 }
 0x384   :  { %v2431_v54 = vpop.permute.xlu1 %2430  ;;  %v2436_v25 = vpop.permute.xlu0 %2435 }
 0x385   :  { %v2433_v57 = vunpack.i.h.bf16 %v2431_v54  ;;  %v2432_v7 = vunpack.i.l.bf16 %v2431_v54  ;;  %v2438_v45 = vunpack.i.h.bf16 %v2436_v25  ;;  %v2437_v14 = vunpack.i.l.bf16 %v2436_v25 }
 0x387   :  { %v761_v38 = vsel %vm4676_vm2, %v2438_v45, %v2433_v57  ;;  %v762_v27 = vsel %vm4676_vm2, %v2432_v7, %v2438_v45  ;;  %v765_v61 = vsel %vm4676_vm2, %v2437_v14, %v2427_v59  ;;  %v763_v53 = vsel %vm4676_vm2, %v2428_v49, %v2432_v7 }
 0x388   :  { %v781_v19 = vsel %vm3408_vm9, %v762_v27, %v745_v51  ;;  %v782_v34 = vsel %vm3412_vm4, %v761_v38, %v746_v47  ;;  %v778_v21 = vsel %vm3418_vm0, %v765_v61, %v742_v3  ;;  %v760_v36 = vsel %vm4676_vm2, %v2433_v57, %v2437_v14 }
 0x389   :  { %v2449_v5 = vpack.i.bf16 %v782_v34, %v781_v19  ;;  %v2439_v33 = vpack.i.bf16 %v779_v55, %v778_v21  ;;  %v4737_v3 = vmov 0  ;;  %v780_v39 = vsel %vm3448_vm3, %v763_v53, %v744_v31 }
 0x38a   :  { %v4738_v3 = vsel %vm3452_vm8, 4294967295, %v4737_v3  ;;  %v783_v42 = vsel %vm3452_vm8, %v760_v36, %v747_v50  ;;  %v806_v59 = vperm.slane %v3351_v10, 3  ;;  %v804_v31 = vperm.slane %v3346_v2, 3 }
 0x38b   :  { %2450 = vrot.lane.b32.xlu2 %v2449_v5, %s2751_s24  ;;  %2440 = vrot.lane.b32.xlu1 %v2439_v33, %s2751_s24  ;;  %v2444_v16 = vpack.i.bf16 %v783_v42, %v780_v39  ;;  %v803_v50 = vperm.slane %v3329_v37, 3  ;;  %vm3471_vm2 = vcmp.eq.s32.totalorder %v805_v18, 1  ;;  %v4743_v45 = vmov 0 }
 0x38c   :  { %vm3479_vm1 = vcmp.eq.s32.totalorder %v806_v59, 1  ;;  %vm3483_vm0 = vcmp.eq.s32.totalorder %v804_v31, 1  ;;  %v4747_v27 = vmov 0  ;;  %vm4751_vm4 = vcmp.lt.s32.totalorder %v2957_v22, 110 }
 0x38d   :  { %v4744_v45 = vsel %vm3479_vm1, 4294967295, %v4743_v45  ;;  %vm3491_vm8 = vcmp.eq.s32.totalorder %v803_v50, 1  ;;  %vm4752_vm5 = vmmov %vm4751_vm4  ;;  %v4757_v50 = vmov 0 }
 0x38e   :  { %v4750_v60 = vsel %vm3491_vm8, 4294967295, %v4749_v60  ;;  %vm4753_vm3 = vmmov %vm4751_vm4 }
 0x38f   :  { %vm4754_vm9 = vmmov %vm4753_vm3 }
 0x393   :  { %2445 = vrot.lane.b32.xlu1 %v2444_v16, %s2751_s24 }
 0x3e5   :  { %v2451_v47 = vpop.permute.xlu2 %2450 }
 0x3e6   :  { %v2453_v58 = vunpack.i.h.bf16 %v2451_v47  ;;  %v2452_v13 = vunpack.i.l.bf16 %v2451_v47 }
 0x3e8   :  { %v797_v6 = vsel %vm4680_vm6, %v2452_v13, %v2453_v58 }
 0x3e9   :  { %v817_v61 = vsel %vm3471_vm2, %v797_v6, %v781_v19  ;;  %v4760_v6 = vmov 0 }
 0x3fd   :  { %v2441_v51 = vpop.permute.xlu1 %2440 }
 0x3fe   :  { %v2443_v35 = vunpack.i.h.bf16 %v2441_v51  ;;  %v2442_v49 = vunpack.i.l.bf16 %v2441_v51 }
 0x400   :  { %v800_v54 = vsel %vm4680_vm6, %v2442_v49, %v2443_v35  ;;  %vm3487_vm6 = vcmp.eq.s32.totalorder %v807_v12, 1 }
 0x401   :  { %v4748_v27 = vsel %vm3487_vm6, 4294967295, %v4747_v27  ;;  %v814_v4 = vsel %vm3475_vm7, %v800_v54, %v778_v21  ;;  %v4762_v54 = vmov 0 }
 0x405   :  { %v2446_v7 = vpop.permute.xlu1 %2445 }
 0x406   :  { %v2448_v8 = vunpack.i.h.bf16 %v2446_v7  ;;  %v2447_v38 = vunpack.i.l.bf16 %v2446_v7 }
 0x408   :  { %v796_v5 = vsel %vm4751_vm4, %v2453_v58, %v2448_v8  ;;  %v798_v33 = vsel %vm4752_vm5, %v2447_v38, %v2452_v13  ;;  %v799_v53 = vsel %vm4753_vm3, %v2443_v35, %v2447_v38  ;;  %v801_v36 = vsel %vm4754_vm9, %v2448_v8, %v2442_v49 }
 0x409   :  { %v818_v16 = vsel %vm3479_vm1, %v796_v5, %v782_v34  ;;  %v816_v19 = vsel %vm3483_vm0, %v798_v33, %v780_v39  ;;  %v819_v21 = vsel %vm3487_vm6, %v801_v36, %v783_v42  ;;  %v815_v47 = vsel %vm3491_vm8, %v799_v53, %v779_v55 }
 0x40a   :  { %v2464_v51 = vpack.i.bf16 %v818_v16, %v817_v61  ;;  %v2459_v18 = vpack.i.bf16 %v816_v19, %v819_v21  ;;  %v2454_v30 = vpack.i.bf16 %v815_v47, %v814_v4  ;;  %v842_v34 = vperm.slane %v3351_v10, 4 }
 0x40b   :  { %v839_v39 = vperm.slane %v3329_v37, 4  ;;  %v840_v42 = vperm.slane %v3346_v2, 4  ;;  %v838_v55 = vperm.slane %v3326_v56, 4  ;;  %vm4759_vm5 = vcmp.lt.s32.totalorder %v2957_v22, 18 }
 0x40c   :  { %2465 = vrot.lane.b32.xlu2 %v2464_v51, %s2746_s19  ;;  %2460 = vrot.lane.b32.xlu1 %v2459_v18, %s2746_s19  ;;  %vm3522_vm3 = vcmp.eq.s32.totalorder %v842_v34, 1  ;;  %vm4764_vm1 = vmmov %vm4759_vm5 }
 0x40d   :  { %2455 = vrot.lane.b32.xlu0 %v2454_v30, %s2746_s19  ;;  %vm3526_vm4 = vcmp.eq.s32.totalorder %v839_v39, 1  ;;  %vm3532_vm9 = vcmp.eq.s32.totalorder %v840_v42, 1  ;;  %vm3536_vm6 = vcmp.eq.s32.totalorder %v838_v55, 1  ;;  %vm4765_vm8 = vmmov %vm4764_vm1 }
 0x40e   :  { %v4758_v50 = vsel %vm3526_vm4, 4294967295, %v4757_v50  ;;  %v4761_v6 = vsel %vm3532_vm9, 4294967295, %v4760_v6  ;;  %v4763_v54 = vsel %vm3536_vm6, 4294967295, %v4762_v54 }
 0x466   :  { %v2466_v58 = vpop.permute.xlu2 %2465 }
 0x467   :  { %v2468_v13 = vunpack.i.h.bf16 %v2466_v58  ;;  %v2467_v35 = vunpack.i.l.bf16 %v2466_v58 }
 0x469   :  { %v833_v37 = vsel %vm4759_vm5, %v2467_v35, %v2468_v13  ;;  %vm4766_vm5 = vmmov %vm4764_vm1 }
 0x46a   :  { %v3546_v38 = vsel %vm3522_vm3, %v833_v37, %v818_v16 }
 0x47e   :  { %v2461_v49 = vpop.permute.xlu1 %2460 }
 0x47f   :  { %v2463_v31 = vunpack.i.h.bf16 %v2461_v49  ;;  %v2462_v12 = vunpack.i.l.bf16 %v2461_v49  ;;  %v2456_v10 = vpop.permute.xlu0 %2455 }
 0x480   :  { %v2458_v56 = vunpack.i.h.bf16 %v2456_v10  ;;  %v2457_v2 = vunpack.i.l.bf16 %v2456_v10 }
 0x481   :  { %v834_v30 = vsel %vm4766_vm5, %v2463_v31, %v2467_v35 }
 0x482   :  { %v835_v7 = vsel %vm4764_vm1, %v2458_v56, %v2463_v31  ;;  %v836_v8 = vsel %vm4765_vm8, %v2457_v2, %v2458_v56  ;;  %v837_v33 = vsel %vm4766_vm5, %v2462_v12, %v2457_v2 }
 0x483   :  { %v3550_v5 = vsel %vm3532_vm9, %v835_v7, %v816_v19  ;;  %v3556_v53 = vsel %vm3526_vm4, %v836_v8, %v815_v47  ;;  %v3560_v36 = vsel %vm3536_vm6, %v837_v33, %v814_v4  ;;  %v841_v19 = vperm.slane %v3354_v15, 4  ;;  %vm4772_vm6 = vmmov %vm4766_vm5 }
 0x484   :  { %v2479_v51 = vpack.i.bf16 %v3546_v38, %v3550_v5  ;;  %v2474_v16 = vpack.i.bf16 %v3556_v53, %v3560_v36  ;;  %v843_v47 = vperm.slane %v3357_v0, 4  ;;  %v4769_v4 = vmov 0 }
 0x485   :  { %vm3571_vm1 = vcmp.eq.s32.totalorder %v841_v19, 1  ;;  %v832_v58 = vsel %vm4772_vm6, %v2468_v13, %v2462_v12  ;;  %vm4773_vm6 = vcmp.lt.s32.totalorder %v2957_v22, 109  ;;  %vm4783_vm4 = vcmp.lt.s32.totalorder %v2957_v22, 17 }
 0x486   :  { %2480 = vrot.lane.b32.xlu2 %v2479_v51, %s2752_s25  ;;  %2475 = vrot.lane.b32.xlu1 %v2474_v16, %s2751_s24  ;;  %vm3575_vm8 = vcmp.eq.s32.totalorder %v843_v47, 1  ;;  %v3588_v15 = vsel %vm3571_vm1, %v834_v30, %v817_v61  ;;  %vm4774_vm5 = vmmov %vm4773_vm6 }
 0x487   :  { %2470 = vrot.lane.b32.xlu0 %v2474_v16, %s2752_s25  ;;  %v4770_v4 = vsel %vm3575_vm8, 4294967295, %v4769_v4  ;;  %v3592_v0 = vsel %vm3575_vm8, %v832_v58, %v819_v21  ;;  %v2529_v61 = vpack.i.bf16 %v3588_v15, %v3556_v53  ;;  %v2569_v21 = vpack.i.bf16 %v3550_v5, %v3546_v38 }
 0x488   :  { %4771 = vst [vmem:[#allocation2_spill] sm:$0xff] %v4770_v4  ;;  %v2509_v34 = vpack.i.bf16 %v3588_v15, %v3592_v0  ;;  %v2524_v39 = vpack.i.bf16 %v3592_v0, %v3560_v36  ;;  %vm4776_vm8 = vcmp.lt.s32.totalorder %v2957_v22, 110 }
 0x48e   :  { %2495 = vrot.lane.b32.xlu2 %v2474_v16, %s2749_s22  ;;  %2490 = vrot.lane.b32.xlu1 %v2479_v51, %s2751_s24 }
 0x48f   :  { %2485 = vrot.lane.b32.xlu0 %v2474_v16, %s2750_s23 }
 0x496   :  { %2510 = vrot.lane.b32.xlu2 %v2509_v34, %s2752_s25  ;;  %2505 = vrot.lane.b32.xlu1 %v2479_v51, %s2749_s22 }
 0x497   :  { %2500 = vrot.lane.b32.xlu0 %v2479_v51, %s2750_s23 }
 0x49e   :  { %2525 = vrot.lane.b32.xlu2 %v2524_v39, %s2747_s20  ;;  %2520 = vrot.lane.b32.xlu1 %v2509_v34, %s2751_s24 }
 0x49f   :  { %2515 = vrot.lane.b32.xlu0 %v2524_v39, %s2748_s21 }
 0x4a6   :  { %2540 = vrot.lane.b32.xlu2 %v2524_v39, %s2746_s19  ;;  %2535 = vrot.lane.b32.xlu1 %v2509_v34, %s2750_s23 }
 0x4a7   :  { %2530 = vrot.lane.b32.xlu0 %v2529_v61, %s2748_s21 }
 0x4ae   :  { %2555 = vrot.lane.b32.xlu2 %v2524_v39, %s2745_s0  ;;  %2550 = vrot.lane.b32.xlu1 %v2509_v34, %s2749_s22 }
 0x4af   :  { %2545 = vrot.lane.b32.xlu0 %v2529_v61, %s2747_s20 }
 0x4b6   :  { %2570 = vrot.lane.b32.xlu2 %v2569_v21, %s2748_s21  ;;  %2565 = vrot.lane.b32.xlu1 %v2529_v61, %s2745_s0 }
 0x4b7   :  { %2560 = vrot.lane.b32.xlu0 %v2529_v61, %s2746_s19 }
 0x4be   :  { %2585 = vrot.lane.b32.xlu2 %v2569_v21, %s2745_s0  ;;  %2580 = vrot.lane.b32.xlu1 %v2569_v21, %s2746_s19 }
 0x4bf   :  { %2575 = vrot.lane.b32.xlu0 %v2569_v21, %s2747_s20 }
 0x4e0   :  { %v3620_v13 = vpop.permute.xlu2 %2480 }
 0x4e1   :  { %v4703_v55 = vunpack.i.h.bf16 %v3620_v13  ;;  %v2482_v49 = vunpack.i.l.bf16 %v3620_v13 }
 0x4e8   :  { %v3622_v35 = vpop.permute.xlu2 %2495 }
 0x4e9   :  { %v2498_v30 = vunpack.i.h.bf16 %v3622_v35  ;;  %v4695_v39 = vunpack.i.l.bf16 %v3622_v35 }
 0x4f0   :  { %v3624_v42 = vpop.permute.xlu2 %2510 }
 0x4f1   :  { %v2513_v31 = vunpack.i.h.bf16 %v3624_v42 }
 0x4f3   :  { %v998_v12 = vsel %vm4773_vm6, %v2482_v49, %v2513_v31  ;;  %v997_v10 = vsel %vm4774_vm5, %v2513_v31, %v4703_v55  ;;  %vm4775_vm6 = vmmov %vm4774_vm5 }
 0x4f4   :  { %1058 = vmatpush.msrb.mxu0 %v998_v12  ;;  %1078 = vmatpush.msra.mxu1 %v997_v10 }
 0x4f8   :  { %v3635_v37 = vpop.permute.xlu1 %2475  ;;  %v3649_v19 = vpop.permute.xlu2 %2525 }
 0x4f9   :  { %v3637_v56 = vpop.permute.xlu0 %2470  ;;  %v2478_v2 = vunpack.i.h.bf16 %v3635_v37  ;;  %v4697_v7 = vunpack.i.l.bf16 %v3635_v37 }
 0x4fa   :  { %v2473_v8 = vunpack.i.h.bf16 %v3637_v56  ;;  %v4698_v33 = vunpack.i.l.bf16 %v3637_v56 }
 0x4fb   :  { %v982_v47 = vsel %vm4776_vm8, %v4697_v7, %v2478_v2 }
 0x4fc   :  { %v1000_v51 = vsel %vm4775_vm6, %v4698_v33, %v2473_v8  ;;  %v999_v16 = vsel %vm4774_vm5, %v2473_v8, %v2482_v49  ;;  %vm4777_vm6 = vcmp.lt.s32.totalorder %v2957_v22, 111  ;;  %vm4778_vm5 = vcmp.lt.s32.totalorder %v2957_v22, 127 }
 0x4fd   :  { %1018 = vmatpush.msra.mxu2 %v1000_v51  ;;  %1038 = vmatpush.msrb.mxu3 %v999_v16  ;;  %v946_v10 = vsel %vm4778_vm5, %v4695_v39, %v2498_v30 }
 0x4ff   :  { %1019 = vmatpush.msra.mxu2 %v982_v47 }
 0x500   :  { %v3656_v58 = vpop.permute.xlu1 %2490  ;;  %v3674_v8 = vpop.permute.xlu2 %2540 }
 0x501   :  { %v3658_v34 = vpop.permute.xlu0 %2485  ;;  %v2492_v61 = vunpack.i.l.bf16 %v3656_v58  ;;  %v2493_v39 = vunpack.i.h.bf16 %v3656_v58  ;;  %v4708_v7 = vunpack.i.l.bf16 %v3674_v8 }
 0x502   :  { %v2488_v21 = vunpack.i.h.bf16 %v3658_v34  ;;  %v4696_v49 = vunpack.i.l.bf16 %v3658_v34 }
 0x503   :  { %v981_v12 = vsel %vm4776_vm8, %v2478_v2, %v2492_v61  ;;  %vm4779_vm8 = vmmov %vm4778_vm5  ;;  %vm4780_vm5 = vcmp.lt.s32.totalorder %v2957_v22, 1 }
 0x504   :  { %v964_v31 = vsel %vm4777_vm6, %v4696_v49, %v2488_v21  ;;  %1039 = vmatpush.msrb.mxu3 %v981_v12  ;;  %v4705_v12 = vunpack.i.h.bf16 %v3649_v19 }
 0x505   :  { %1020 = vmatpush.msra.mxu2 %v964_v31 }
 0x507   :  { %1021 = vmatpush.msra.mxu2 %v946_v10  ;;  %v2527_v10 = vunpack.i.l.bf16 %v3649_v19 }
 0x508   :  { %v3676_v51 = vpop.permute.xlu1 %2505 }
 0x509   :  { %v2501_v16 = vpop.permute.xlu0 %2500  ;;  %1022 = vmatpush.msra.mxu2 %v3560_v36  ;;  %v4701_v47 = vunpack.i.l.bf16 %v3676_v51  ;;  %v911_v55 = vsel %vm4783_vm4, %v4705_v12, %v2527_v10  ;;  %vm4786_vm4 = vcmp.lt.s32.totalorder %v2957_v22, 19 }
 0x50a   :  { %v2502_v62 = vunpack.i.l.bf16 %v2501_v16 }
 0x50b   :  { %v945_v31 = vsel %vm4779_vm8, %v2498_v30, %v4701_v47  ;;  %v4707_v30 = vunpack.i.h.bf16 %v3674_v8 }
 0x50c   :  { %v963_v2 = vsel %vm4777_vm6, %v2488_v21, %v2502_v62  ;;  %vm4781_vm6 = vcmp.lt.s32.totalorder %v2957_v22, 110 }
 0x50d   :  { %1040 = vmatpush.msrb.mxu3 %v963_v2  ;;  %vm4782_vm8 = vmmov %vm4781_vm6 }
 0x50f   :  { %1041 = vmatpush.msrb.mxu3 %v945_v31  ;;  %v3698_v31 = vpop.permute.xlu2 %2555 }
 0x510   :  { %v3688_v24 = vpop.permute.xlu1 %2520  ;;  %v4711_v47 = vunpack.i.l.bf16 %v3698_v31 }
 0x511   :  { %v3690_v36 = vpop.permute.xlu0 %2515  ;;  %1042 = vmatpush.msrb.mxu3 %v3556_v53  ;;  %v2523_v21 = vunpack.i.h.bf16 %v3688_v24 }
 0x512   :  { %v4704_v2 = vunpack.i.h.bf16 %v3690_v36  ;;  %v2517_v49 = vunpack.i.l.bf16 %v3690_v36 }
 0x513   :  { %v980_v53 = vsel %vm4781_vm6, %v2492_v61, %v2523_v21  ;;  %v979_v58 = vsel %vm4782_vm8, %v2523_v21, %v2493_v39  ;;  %vm4789_vm6 = vcmp.lt.s32.totalorder %v2957_v22, 109  ;;  %vm4790_vm8 = vcmp.lt.s32.totalorder %v2957_v22, 1 }
 0x514   :  { %v929_v33 = vsel %vm4780_vm5, %v4704_v2, %v2517_v49  ;;  %1059 = vmatpush.msrb.mxu0 %v980_v53  ;;  %1079 = vmatpush.msra.mxu1 %v979_v58  ;;  %vm4784_vm5 = vcmp.lt.s32.totalorder %v2957_v22, 18  ;;  %v2503_v58 = vunpack.i.h.bf16 %v2501_v16 }
 0x515   :  { %1023 = vmatpush.msra.mxu2 %v929_v33  ;;  %v893_v33 = vsel %vm4784_vm5, %v4707_v30, %v4708_v7  ;;  %v4787_v30 = vunpack.i.l.bf16 %v3624_v42  ;;  %v4788_v7 = vunpack.i.h.bf16 %v3620_v13  ;;  %vm4791_vm5 = vcmp.lt.s32.totalorder %v2957_v22, 111 }
 0x516   :  { %vm4792_vm9 = vmmov %vm4791_vm5  ;;  %v4793_v13 = vunpack.i.l.bf16 %v3688_v24 }
 0x517   :  { %1024 = vmatpush.msra.mxu2 %v911_v55  ;;  %v4785_v55 = vunpack.i.h.bf16 %v3698_v31  ;;  %v996_v16 = vsel %vm4789_vm6, %v4788_v7, %v4787_v30  ;;  %vm4794_vm6 = vcmp.lt.s32.totalorder %v2957_v22, 110  ;;  %v3765_v30 = vld [vmem:[%s4660_s6] sm:$0xff] }
 0x518   :  { %v3723_v21 = vpop.permute.xlu1 %2535  ;;  %v978_v7 = vsel %vm4794_vm6, %v2493_v39, %v4793_v13  ;;  %v2508_v39 = vunpack.i.h.bf16 %v3676_v51  ;;  %1004 = vperm.xlu0 %2589, %v3765_v30   ;;  %v4797_v13 = vunpack.i.l.bf16 %v3676_v51 }
 0x519   :  { %v2531_v53 = vpop.permute.xlu0 %2530  ;;  %1025 = vmatpush.msra.mxu2 %v893_v33  ;;  %v2538_v9 = vunpack.i.h.bf16 %v3723_v21  ;;  %v875_v2 = vsel %vm4786_vm4, %v4785_v55, %v4711_v47  ;;  %v4710_v4 = vunpack.i.l.bf16 %v3723_v21  ;;  %vm4712_vm4 = vcmask 588800  }
 0x51a   :  { %v2532_v12 = vunpack.i.l.bf16 %v2531_v53 }
 0x51b   :  { %1026 = vmatpush.msra.mxu2 %v875_v2  ;;  %v962_v61 = vsel %vm4791_vm5, %v2502_v62, %v2538_v9  ;;  %v961_v55 = vsel %vm4792_vm9, %v2538_v9, %v2503_v58  ;;  %v3748_v2 = vld [vmem:[%s4659_s5] sm:$0xff]  ;;  %vm4796_vm9 = vcmp.lt.s32.totalorder %v2957_v22, 17 }
 0x51c   :  { %v928_v33 = vsel %vm4790_vm8, %v2517_v49, %v2532_v12  ;;  %1060 = vmatpush.msrb.mxu0 %v962_v61  ;;  %1080 = vmatpush.msra.mxu1 %v961_v55  ;;  %vm4795_vm8 = vmmov %vm4791_vm5  ;;  %vm4798_vm5 = vcmp.lt.s32.totalorder %v2957_v22, 127 }
 0x51d   :  { %1098 = vmatpush.msrb.mxu2 %v996_v16  ;;  %1043 = vmatpush.msrb.mxu3 %v928_v33  ;;  %v960_v62 = vsel %vm4795_vm8, %v2503_v58, %v4710_v4  ;;  %v3771_v58 = vpop.permute.xlu2 %2570  ;;  %vm4799_vm6 = vmmov %vm4798_vm5 }
 0x51e   :  { %2284 = vmatmul.msk.f32.vlgmr.msra.gmra.mxu2 %vm4712_vm4, %v3748_v2  ;;  %vm4800_vm8 = vmmov %vm4798_vm5  ;;  %v2573_v47 = vunpack.i.h.bf16 %v3771_v58 }
 0x51f   :  { %1099 = vmatpush.msrb.mxu2 %v978_v7 }
 0x520   :  { %v3760_v9 = vpop.permute.xlu1 %2550 }
 0x521   :  { %1100 = vmatpush.msrb.mxu2 %v960_v62  ;;  %v2546_v49 = vpop.permute.xlu0 %2545  ;;  %v2553_v61 = vunpack.i.h.bf16 %v3760_v9  ;;  %v2552_v16 = vunpack.i.l.bf16 %v3760_v9  ;;  %v2533_v9 = vunpack.i.h.bf16 %v2531_v53 }
 0x522   :  { %v2547_v33 = vunpack.i.l.bf16 %v2546_v49 }
 0x523   :  { %v944_v7 = vsel %vm4798_vm5, %v4797_v13, %v2553_v61  ;;  %v943_v62 = vsel %vm4799_vm6, %v2553_v61, %v2508_v39  ;;  %v942_v4 = vsel %vm4800_vm8, %v2508_v39, %v2552_v16  ;;  %vm4806_vm8 = vcmp.lt.s32.totalorder %v2957_v22, 18 }
 0x524   :  { %v910_v55 = vsel %vm4796_vm9, %v2527_v10, %v2547_v33  ;;  %1061 = vmatpush.msrb.mxu0 %v944_v7  ;;  %1081 = vmatpush.msra.mxu1 %v943_v62  ;;  %v2572_v10 = vunpack.i.l.bf16 %v3771_v58  ;;  %vm4801_vm9 = vcmp.lt.s32.totalorder %v2957_v22, 1  ;;  %v4809_v13 = vunpack.i.l.bf16 %v3637_v56 }
 0x525   :  { %1044 = vmatpush.msrb.mxu3 %v910_v55  ;;  %1101 = vmatpush.msrb.mxu2 %v942_v4  ;;  %v927_v51 = vsel %vm4801_vm9, %v2532_v12, %v2573_v47  ;;  %vm4802_vm5 = vmmov %vm4801_vm9  ;;  %v4807_v12 = vunpack.i.l.bf16 %v3698_v31  ;;  %vm4808_vm9 = vcmp.lt.s32.totalorder %v2957_v22, 19  ;;  %v4810_v7 = vunpack.i.l.bf16 %v3624_v42 }
 0x526   :  { %1062 = vmatpush.msrb.mxu0 %v3550_v5  ;;  %1082 = vmatpush.msra.mxu1 %v3588_v15  ;;  %v926_v53 = vsel %vm4802_vm5, %v2573_v47, %v2533_v9  ;;  %vm4803_vm6 = vmmov %vm4802_vm5  ;;  %v4804_v5 = vmov 1   ;;  %vm4811_vm5 = vcmp.lt.s32.totalorder %v2957_v22, 109 }
 0x527   :  { %1102 = vmatpush.msrb.mxu2 %v3546_v38  ;;  %v925_v4 = vsel %vm4803_vm6, %v2533_v9, %v2572_v10  ;;  %2590 = vset.pattern.permute.xlu0 %v4804_v5  ;;  %v4805_v38 = vunpack.i.l.bf16 %v3674_v8  ;;  %v1001_v62 = vsel %vm4811_vm5, %v4810_v7, %v4809_v13  ;;  %vm4814_vm6 = vcmp.lt.s32.totalorder %v2957_v22, 110 }
 0x528   :  { %v2566_v61 = vpop.permute.xlu1 %2565  ;;  %1063 = vmatpush.msrb.mxu0 %v927_v51  ;;  %1083 = vmatpush.msra.mxu1 %v926_v53  ;;  %v4812_v53 = vunpack.i.l.bf16 %v3635_v37  ;;  %v4816_v37 = vunpack.i.l.bf16 %v3723_v21 }
 0x529   :  { %v2561_v39 = vpop.permute.xlu0 %2560  ;;  %v2567_v55 = vunpack.i.l.bf16 %v2566_v61  ;;  %1103 = vmatpush.msrb.mxu2 %v925_v4  ;;  %1189 = vperm.xlu0 %2590, %v3765_v30   ;;  %v4813_v4 = vunpack.i.l.bf16 %v3688_v24  ;;  %v2568_v13 = vunpack.i.h.bf16 %v2566_v61 }
 0x52a   :  { %v2562_v58 = vunpack.i.l.bf16 %v2561_v39  ;;  %v2563_v5 = vunpack.i.h.bf16 %v2561_v39 }
 0x52b   :  { %v874_v47 = vsel %vm4808_vm9, %v4807_v12, %v2567_v55  ;;  %vm4818_vm9 = vcmp.lt.s32.totalorder %v2957_v22, 17 }
 0x52c   :  { %v892_v15 = vsel %vm4806_vm8, %v4805_v38, %v2562_v58  ;;  %v983_v38 = vsel %vm4814_vm6, %v4813_v4, %v4812_v53  ;;  %vm4817_vm8 = vcmp.lt.s32.totalorder %v2957_v22, 111  ;;  %vm4819_vm5 = vmmov %vm4818_vm9 }
 0x52d   :  { %1045 = vmatpush.msrb.mxu3 %v892_v15  ;;  %v2548_v15 = vunpack.i.h.bf16 %v2546_v49  ;;  %vm4820_vm6 = vmmov %vm4819_vm5 }
 0x52f   :  { %1046 = vmatpush.msrb.mxu3 %v874_v47  ;;  %v2586_v47 = vpop.permute.xlu2 %2585 }
 0x530   :  { %v2581_v9 = vpop.permute.xlu1 %2580  ;;  %2285 = vmatmul.msk.f32.vlgmr.msrb.gmra.mxu3 %vm4712_vm4, %v3748_v2  ;;  %vm4822_vm4 = vcmp.lt.s32.totalorder %v2957_v22, 127  ;;  %v2588_v61 = vunpack.i.h.bf16 %v2586_v47 }
 0x531   :  { %1118 = vmatpush.msra.mxu3 %v1001_v62  ;;  %v2576_v51 = vpop.permute.xlu0 %2575  ;;  %v2583_v56 = vunpack.i.h.bf16 %v2581_v9  ;;  %v2582_v7 = vunpack.i.l.bf16 %v2581_v9  ;;  %v4815_v62 = vunpack.i.l.bf16 %v3658_v34  ;;  %v4821_v34 = vunpack.i.l.bf16 %v3622_v35 }
 0x532   :  { %v2578_v12 = vunpack.i.h.bf16 %v2576_v51  ;;  %v2577_v42 = vunpack.i.l.bf16 %v2576_v51  ;;  %v2587_v9 = vunpack.i.l.bf16 %v2586_v47 }
 0x533   :  { %1119 = vmatpush.msra.mxu3 %v983_v38  ;;  %v965_v24 = vsel %vm4817_vm8, %v4816_v37, %v4815_v62  ;;  %v947_v21 = vsel %vm4822_vm4, %v2552_v16, %v4821_v34  ;;  %vm4823_vm8 = vcmp.lt.s32.totalorder %v2957_v22, 18  ;;  %vm4826_vm4 = vcmp.lt.s32.totalorder %v2957_v22, 19 }
 0x534   :  { %v909_v53 = vsel %vm4818_vm9, %v2547_v33, %v2578_v12  ;;  %v908_v49 = vsel %vm4819_vm5, %v2578_v12, %v2548_v15  ;;  %v907_v51 = vsel %vm4820_vm6, %v2548_v15, %v2577_v42  ;;  %v891_v39 = vsel %vm4823_vm8, %v2562_v58, %v2583_v56  ;;  %vm4824_vm9 = vmmov %vm4823_vm8 }
 0x535   :  { %1120 = vmatpush.msra.mxu3 %v965_v24  ;;  %1064 = vmatpush.msrb.mxu0 %v909_v53  ;;  %v890_v33 = vsel %vm4824_vm9, %v2583_v56, %v2563_v5  ;;  %vm4825_vm5 = vmmov %vm4823_vm8  ;;  %v873_v35 = vsel %vm4826_vm4, %v2567_v55, %v2588_v61  ;;  %v4829_v38 = vunpack.i.h.bf16 %v3690_v36  ;;  %vm4830_vm9 = vcmp.lt.s32.totalorder %v2957_v22, 1 }
 0x536   :  { %1084 = vmatpush.msra.mxu1 %v908_v49  ;;  %1104 = vmatpush.msrb.mxu2 %v907_v51  ;;  %v889_v4 = vsel %vm4825_vm5, %v2563_v5, %v2582_v7  ;;  %vm4827_vm6 = vmmov %vm4826_vm4  ;;  %vm4831_vm5 = vcmask 588800   ;;  %v4836_v36 = vunpack.i.h.bf16 %v3674_v8  ;;  %v4838_v5 = vmov 2  }
 0x537   :  { %1121 = vmatpush.msra.mxu3 %v947_v21  ;;  %1065 = vmatpush.msrb.mxu0 %v891_v39  ;;  %v872_v16 = vsel %vm4827_vm6, %v2588_v61, %v2568_v13  ;;  %vm4828_vm8 = vmmov %vm4826_vm4  ;;  %v924_v15 = vsel %vm4830_vm9, %v2572_v10, %v4829_v38  ;;  %vm4834_vm6 = vcmp.lt.s32.totalorder %v2957_v22, 17  ;;  %vm4837_vm9 = vcmp.lt.s32.totalorder %v2957_v22, 18 }
 0x538   :  { %1085 = vmatpush.msra.mxu1 %v890_v33  ;;  %1105 = vmatpush.msrb.mxu2 %v889_v4  ;;  %v871_v58 = vsel %vm4828_vm8, %v2568_v13, %v2587_v9  ;;  %vm4832_vm4 = vmmov %vm4831_vm5  ;;  %v888_v10 = vsel %vm4837_vm9, %v2582_v7, %v4836_v36  ;;  %v4839_v56 = vunpack.i.h.bf16 %v3698_v31  ;;  %v4841_v12 = vmov 0  }
 0x539   :  { %1122 = vmatpush.msra.mxu3 %v3592_v0  ;;  %1066 = vmatpush.msrb.mxu0 %v873_v35  ;;  %v4833_v0 = vunpack.i.h.bf16 %v3649_v19  ;;  %vm4835_vm8 = vmmov %vm4832_vm4 }
 0x53a   :  { %1086 = vmatpush.msra.mxu1 %v872_v16  ;;  %1106 = vmatpush.msrb.mxu2 %v871_v58 }
 0x53b   :  { %1123 = vmatpush.msra.mxu3 %v924_v15  ;;  %2288 = vmatmul.msk.f32.vlgmr.msrb.gmra.mxu2 %vm4831_vm5, %v3748_v2  ;;  %v906_v55 = vsel %vm4834_vm6, %v2577_v42, %v4833_v0  ;;  %vm4840_vm5 = vcmp.lt.s32.totalorder %v2957_v22, 19 }
 0x53c   :  { %2286 = vmatmul.msk.f32.vlgmr.msrb.gmra.mxu0 %vm4832_vm4, %v3748_v2  ;;  %2287 = vmatmul.msk.f32.vlgmr.msra.gmra.mxu1 %vm4835_vm8, %v3748_v2  ;;  %v870_v19 = vsel %vm4840_vm5, %v2587_v9, %v4839_v56  ;;  %vm4842_vm5 = vcmp.lt.s32.totalorder %v2957_v22, 127 }
 0x53d   :  { %1124 = vmatpush.msra.mxu3 %v906_v55  ;;  %2591 = vset.pattern.permute.xlu0 %v4838_v5 }
 0x53e   :  { %1199 = vperm.xlu0 %2591, %v3765_v30  }
 0x53f   :  { %1125 = vmatpush.msra.mxu3 %v888_v10 }
 0x541   :  { %1126 = vmatpush.msra.mxu3 %v870_v19 }
 0x542   :  { %2289 = vmatmul.msk.f32.vlgmr.msra.gmra.mxu3 %vm4832_vm4, %v3748_v2  ;;  %vm4843_vm4 = vmmov %vm4842_vm5 }
 0x546   :  { %2698 = vset.pattern.permute.xlu0 %v4841_v12 }
 0x58a   :  { %v1005_v8 = vpop.permute.xlu0 %1004 }
 0x5a1   :  { %v1028_v42 = vpop.f32.mrf.mxu2 }
 0x5a2   :  { %v1029_v47 = vadd.f32 %v1028_v42, %v1005_v8 }
 0x5a4   :  { %v1131_v62 = vmul.f32 %v1029_v47, %v3266_v32 }
 0x5b3   :  { %v1048_v13 = vpop.f32.mrf.mxu3 }
 0x5b4   :  { %v1049_v7 = vadd.f32 %v1048_v13, %v1005_v8 }
 0x5b6   :  { %v1132_v30 = vmul.f32 %v1049_v7, %v3269_v52 }
 0x5b8   :  { %v1137_v53 = vadd.f32 %v1132_v30, %v1131_v62 }
 0x5b9   :  { %v1068_v37 = vpop.f32.mrf.mxu0  ;;  %v1088_v24 = vpop.f32.mrf.mxu1 }
 0x5ba   :  { %v1069_v31 = vadd.f32 %v1068_v37, %v1005_v8  ;;  %v1089_v51 = vadd.f32 %v1088_v24, %v1005_v8 }
 0x5bc   :  { %v1133_v49 = vmul.f32 %v1069_v31, %v3279_v28  ;;  %v1134_v21 = vmul.f32 %v1089_v51, %v3288_v43 }
 0x5be   :  { %v1108_v34 = vpop.f32.mrf.mxu2  ;;  %v1138_v2 = vadd.f32 %v1137_v53, %v1133_v49 }
 0x5bf   :  { %v1109_v61 = vadd.f32 %v1108_v34, %v1005_v8 }
 0x5c0   :  { %v1139_v39 = vadd.f32 %v1138_v2, %v1134_v21 }
 0x5c1   :  { %v1135_v33 = vmul.f32 %v1109_v61, %v3301_v29 }
 0x5c3   :  { %v1140_v16 = vadd.f32 %v1139_v39, %v1135_v33 }
 0x5c5   :  { %v1128_v9 = vpop.f32.mrf.mxu3 }
 0x5c6   :  { %v1129_v4 = vadd.f32 %v1128_v9, %v1005_v8 }
 0x5c8   :  { %v1136_v35 = vmul.f32 %v1129_v4, %v3305_v63 }
 0x5ca   :  { %v1141_v58 = vadd.f32 %v1140_v16, %v1136_v35 }
 0x5cc   :  { %1142 = vadd.xlane.f32.xlu1 %v1141_v58 }
 0x63f   :  { %v1143_v38 = vpop.xlane.xlu1 %1142 }
 0x640   :  { %v1144_v15 = vmul.f32 0.001953125, %v1143_v38 }
 0x642   :  { %v1145_v0 = vsub.f32 %v1029_v47, %v1144_v15  ;;  %v1146_v55 = vsub.f32 %v1049_v7, %v1144_v15  ;;  %v1147_v36 = vsub.f32 %v1069_v31, %v1144_v15  ;;  %v1148_v10 = vsub.f32 %v1089_v51, %v1144_v15 }
 0x643   :  { %v1149_v56 = vsub.f32 %v1109_v61, %v1144_v15  ;;  %v1150_v62 = vsub.f32 %v1129_v4, %v1144_v15 }
 0x644   :  { %v1151_v19 = vmul.f32 %v1145_v0, %v3266_v32  ;;  %v1152_v42 = vmul.f32 %v1146_v55, %v3269_v52  ;;  %v1153_v13 = vmul.f32 %v1147_v36, %v3279_v28  ;;  %v1154_v8 = vmul.f32 %v1148_v10, %v3288_v43 }
 0x645   :  { %v1155_v24 = vmul.f32 %v1149_v56, %v3301_v29  ;;  %v1156_v47 = vmul.f32 %v1150_v62, %v3305_v63  ;;  %v1190_v29 = vpop.permute.xlu0 %1189 }
 0x646   :  { %v1157_v30 = vmul.f32 %v1151_v19, %v1151_v19  ;;  %v1158_v37 = vmul.f32 %v1152_v42, %v1152_v42  ;;  %v1159_v53 = vmul.f32 %v1153_v13, %v1153_v13  ;;  %v1160_v7 = vmul.f32 %v1154_v8, %v1154_v8 }
 0x647   :  { %v1161_v51 = vmul.f32 %v1155_v24, %v1155_v24  ;;  %v1162_v32 = vmul.f32 %v1156_v47, %v1156_v47 }
 0x648   :  { %v1163_v49 = vadd.f32 %v1158_v37, %v1157_v30 }
 0x64a   :  { %v1164_v31 = vadd.f32 %v1163_v49, %v1159_v53 }
 0x64c   :  { %v1165_v34 = vadd.f32 %v1164_v31, %v1160_v7 }
 0x64d   :  { %v1200_v19 = vpop.permute.xlu0 %1199 }
 0x64e   :  { %v1166_v2 = vadd.f32 %v1165_v34, %v1161_v51 }
 0x650   :  { %v1167_v52 = vadd.f32 %v1166_v2, %v1162_v32 }
 0x652   :  { %1168 = vadd.xlane.f32.xlu2 %v1167_v52 }
 0x6c5   :  { %v1169_v28 = vpop.xlane.xlu2 %1168 }
 0x6c6   :  { %v1170_v21 = vmul.f32 0.001953125, %v1169_v28 }
 0x6c8   :  { %v1171_v61 = vadd.f32 1e-05, %v1170_v21 }
 0x6ca   :  { %2709 = vrsqrt.f32 %v1171_v61  ;;  %vm1178_vm8 = vweird.f32 %v1171_v61 }
 0x6d0   :  { %v2710_v43 = vpop.eup %2709 }
 0x6d1   :  { %v1173_v39 = vmul.f32 %v2710_v43, %v1171_v61  ;;  %vm1179_vm6 = vweird.f32 %v2710_v43 }
 0x6d2   :  { %vm1180_vm9 = vmor %vm1178_vm8, %vm1179_vm6 }
 0x6d3   :  { %v1174_v33 = vmul.f32 %v2710_v43, %v1173_v39  ;;  %vm4844_vm6 = vmmov %vm4843_vm4 }
 0x6d4   :  { %vm4845_vm8 = vmmov %vm4843_vm4 }
 0x6d5   :  { %v1175_v9 = vmul.f32 0.5, %v1174_v33 }
 0x6d7   :  { %v1176_v4 = vsub.f32 1.5, %v1175_v9 }
 0x6d9   :  { %v1177_v63 = vmul.f32 %v2710_v43, %v1176_v4 }
 0x6db   :  { %v1181_v35 = vsel %vm1180_vm9, %v2710_v43, %v1177_v63  ;;  %vm4851_vm9 = vnez %v4736_v48 }
 0x6dc   :  { %v1184_v16 = vmul.f32 %v1181_v35, %v1147_v36  ;;  %v1183_v58 = vmul.f32 %v1181_v35, %v1146_v55  ;;  %v1182_v38 = vmul.f32 %v1181_v35, %v1145_v0  ;;  %v1185_v15 = vmul.f32 %v1181_v35, %v1148_v10 }
 0x6dd   :  { %v1187_v42 = vmul.f32 %v1181_v35, %v1150_v62  ;;  %v1186_v10 = vmul.f32 %v1181_v35, %v1149_v56 }
 0x6de   :  { %v1194_v13 = vmul.f32 %v1190_v29, %v1184_v16  ;;  %v1193_v8 = vmul.f32 %v1190_v29, %v1183_v58  ;;  %v1192_v30 = vmul.f32 %v1190_v29, %v1182_v38  ;;  %v1195_v37 = vmul.f32 %v1190_v29, %v1185_v15 }
 0x6df   :  { %v1197_v47 = vmul.f32 %v1190_v29, %v1187_v42  ;;  %v1196_v2 = vmul.f32 %v1190_v29, %v1186_v10 }
 0x6e0   :  { %v3886_v24 = vadd.f32 %v1200_v19, %v1194_v13  ;;  %v3888_v53 = vadd.f32 %v1200_v19, %v1193_v8  ;;  %v3890_v49 = vadd.f32 %v1200_v19, %v1192_v30  ;;  %v3895_v55 = vadd.f32 %v1200_v19, %v1195_v37 }
 0x6e1   :  { %v3903_v34 = vadd.f32 %v1200_v19, %v1197_v47  ;;  %v3914_v21 = vadd.f32 %v1200_v19, %v1196_v2 }
 0x6e2   :  { %v1210_v7 = vmax.f32 %v3886_v24, 0.0  ;;  %v1209_v36 = vmax.f32 %v3888_v53, 0.0  ;;  %v1208_v0 = vmax.f32 %v3890_v49, 0.0  ;;  %v4713_v32 = vmax.f32 %v3895_v55, 0.0 }
 0x6e3   :  { %v1213_v56 = vmax.f32 %v3903_v34, 0.0  ;;  %v1212_v61 = vmax.f32 %v3914_v21, 0.0 }
 0x6e4   :  { %v1222_v62 = vrot.slane %v1210_v7, 4  ;;  %v1221_v31 = vrot.slane %v1209_v36, 4  ;;  %v1220_v51 = vrot.slane %v1208_v0, 4  ;;  %v1223_v52 = vrot.slane %v4713_v32, 4 }
 0x6e5   :  { %v1225_v28 = vrot.slane %v1213_v56, 4  ;;  %v1224_v43 = vrot.slane %v1212_v61, 4 }
 0x6e6   :  { %1236 = vrot.lane.b32.xlu0 %v1222_v62, %s2749_s22  ;;  %1234 = vrot.lane.b32.xlu2 %v1221_v31, %s2749_s22 }
 0x6e7   :  { %1232 = vrot.lane.b32.xlu1 %v1220_v51, %s2749_s22 }
 0x6ee   :  { %1238 = vrot.lane.b32.xlu0 %v1223_v52, %s2749_s22  ;;  %1242 = vrot.lane.b32.xlu2 %v1225_v28, %s2749_s22 }
 0x6f6   :  { %1240 = vrot.lane.b32.xlu0 %v1224_v43, %s2749_s22 }
 0x740   :  { %v1235_v39 = vpop.permute.xlu2 %1234 }
 0x748   :  { %v1243_v58 = vpop.permute.xlu2 %1242 }
 0x758   :  { %v1237_v33 = vpop.permute.xlu0 %1236 }
 0x759   :  { %v1247_v29 = vsel %vm4842_vm5, %v1235_v39, %v1237_v33  ;;  %v1233_v16 = vpop.permute.xlu1 %1232 }
 0x75a   :  { %v1251_v9 = vsel %vm3341_vm13, %v1247_v29, %v1221_v31  ;;  %v1249_v38 = vsel %vm4844_vm6, %v1243_v58, %v1233_v16  ;;  %vm4846_vm13 = vmmov %vm4843_vm4  ;;  %vm4855_vm6 = vnez %v4734_v23 }
 0x75b   :  { %1258 = vrot.lane.b32.xlu1 %v1251_v9, %s2748_s21  ;;  %v1255_v13 = vsel %vm3384_vm12, %v1249_v38, %v1225_v28  ;;  %vm4850_vm12 = vnez %v4728_v20 }
 0x760   :  { %v1239_v4 = vpop.permute.xlu0 %1238 }
 0x761   :  { %v1246_v63 = vsel %vm4843_vm4, %v1237_v33, %v1239_v4 }
 0x762   :  { %v1252_v35 = vsel %vm3370_vm15, %v1246_v63, %v1222_v62  ;;  %vm4847_vm15 = vmmov %vm4843_vm4 }
 0x763   :  { %1260 = vrot.lane.b32.xlu0 %v1252_v35, %s2748_s21  ;;  %v1248_v8 = vsel %vm4847_vm15, %v1233_v16, %v1235_v39 }
 0x764   :  { %v1250_v30 = vsel %vm3337_vm14, %v1248_v8, %v1220_v51 }
 0x768   :  { %v1241_v15 = vpop.permute.xlu0 %1240 }
 0x769   :  { %v1244_v40 = vsel %vm4845_vm8, %v1241_v15, %v1243_v58  ;;  %v1245_v19 = vsel %vm4846_vm13, %v1239_v4, %v1241_v15  ;;  %vm4856_vm8 = vnez %v4730_v11  ;;  %vm4857_vm13 = vnez %v4738_v3 }
 0x76a   :  { %v1253_v42 = vsel %vm3378_vm11, %v1245_v19, %v1223_v52  ;;  %v1254_v1 = vsel %vm3374_vm10, %v1244_v40, %v1224_v43  ;;  %vm4848_vm10 = vcmp.lt.s32.totalorder %v2957_v22, 1 }
 0x76b   :  { %1262 = vrot.lane.b32.xlu2 %v1253_v42, %s2748_s21  ;;  %1264 = vrot.lane.b32.xlu1 %v1254_v1, %s2748_s21  ;;  %vm4849_vm11 = vmmov %vm4848_vm10 }
 0x76c   :  { %1266 = vrot.lane.b32.xlu0 %v1255_v13, %s2748_s21  ;;  %vm4852_vm14 = vmmov %vm4848_vm10 }
 0x76d   :  { %vm4853_vm5 = vmmov %vm4848_vm10 }
 0x76e   :  { %vm4854_vm4 = vmmov %vm4853_vm5 }
 0x76f   :  { %vm4858_vm15 = vmmov %vm4854_vm4 }
 0x773   :  { %1256 = vrot.lane.b32.xlu2 %v1250_v30, %s2748_s21 }
 0x7c5   :  { %v1263_v26 = vpop.permute.xlu2 %1262 }
 0x7cd   :  { %v1259_v44 = vpop.permute.xlu1 %1258  ;;  %v1257_v46 = vpop.permute.xlu2 %1256 }
 0x7ce   :  { %v1272_v31 = vsel %vm4852_vm14, %v1257_v46, %v1259_v44 }
 0x7cf   :  { %v1275_v48 = vsel %vm4855_vm6, %v1272_v31, %v1251_v9  ;;  %vm4868_vm6 = vnez %v4748_v27  ;;  %v4878_v31 = vld [vmem:[#allocation2_spill] sm:$0xff] }
 0x7d5   :  { %v1261_v37 = vpop.permute.xlu0 %1260 }
 0x7d6   :  { %v1270_v47 = vsel %vm4848_vm10, %v1261_v37, %v1263_v26  ;;  %v1271_v17 = vsel %vm4849_vm11, %v1259_v44, %v1261_v37  ;;  %vm4859_vm10 = vnez %v4732_v41  ;;  %vm4860_vm11 = vcmp.lt.s32.totalorder %v2957_v22, 110 }
 0x7d7   :  { %v1277_v10 = vsel %vm4850_vm12, %v1270_v47, %v1253_v42  ;;  %v1276_v62 = vsel %vm4851_vm9, %v1271_v17, %v1252_v35  ;;  %vm4861_vm12 = vmmov %vm4860_vm11 }
 0x7d8   :  { %1286 = vrot.lane.b32.xlu0 %v1277_v10, %s2751_s24  ;;  %1284 = vrot.lane.b32.xlu1 %v1276_v62, %s2751_s24  ;;  %vm4862_vm9 = vmmov %vm4860_vm11 }
 0x7d9   :  { %vm4863_vm14 = vmmov %vm4862_vm9 }
 0x7dd   :  { %v1265_v51 = vpop.permute.xlu1 %1264 }
 0x7de   :  { %v1267_v2 = vpop.permute.xlu0 %1266  ;;  %v1269_v52 = vsel %vm4853_vm5, %v1263_v26, %v1265_v51  ;;  %vm4864_vm5 = vmmov %vm4862_vm9 }
 0x7df   :  { %v1268_v20 = vsel %vm4854_vm4, %v1265_v51, %v1267_v2  ;;  %v1278_v28 = vsel %vm4856_vm8, %v1269_v52, %v1254_v1  ;;  %v1273_v39 = vsel %vm4858_vm15, %v1267_v2, %v1257_v46  ;;  %vm4867_vm4 = vmmov %vm4864_vm5  ;;  %vm4874_vm15 = vnez %v4758_v50 }
 0x7e0   :  { %1282 = vrot.lane.b32.xlu0 %v1275_v48, %s2751_s24  ;;  %1288 = vrot.lane.b32.xlu2 %v1278_v28, %s2751_s24  ;;  %v1279_v43 = vsel %vm4857_vm13, %v1268_v20, %v1255_v13  ;;  %v1274_v33 = vsel %vm4859_vm10, %v1273_v39, %v1250_v30 }
 0x7e1   :  { %1290 = vrot.lane.b32.xlu1 %v1279_v43, %s2751_s24 }
 0x7e8   :  { %1280 = vrot.lane.b32.xlu2 %v1274_v33, %s2751_s24 }
 0x83a   :  { %v1289_v23 = vpop.permute.xlu2 %1288 }
 0x842   :  { %v1281_v41 = vpop.permute.xlu2 %1280 }
 0x84a   :  { %v1287_v11 = vpop.permute.xlu0 %1286  ;;  %v1285_v29 = vpop.permute.xlu1 %1284 }
 0x84b   :  { %v1293_v9 = vsel %vm4860_vm11, %v1287_v11, %v1289_v23  ;;  %v1294_v3 = vsel %vm4861_vm12, %v1285_v29, %v1287_v11  ;;  %vm4876_vm11 = vnez %v4763_v54 }
 0x84c   :  { %v1301_v4 = vsel %vm3471_vm2, %v1293_v9, %v1277_v10  ;;  %v1300_v63 = vsel %vm3483_vm0, %v1294_v3, %v1276_v62  ;;  %vm4865_vm0 = vnez %v4750_v60  ;;  %vm4866_vm2 = vnez %v4744_v45 }
 0x84d   :  { %1310 = vrot.lane.b32.xlu0 %v1301_v4, %s2746_s19  ;;  %1308 = vrot.lane.b32.xlu1 %v1300_v63, %s2746_s19 }
 0x852   :  { %v1283_v35 = vpop.permute.xlu0 %1282 }
 0x853   :  { %v1295_v16 = vsel %vm4862_vm9, %v1283_v35, %v1285_v29  ;;  %v1296_v58 = vsel %vm4863_vm14, %v1281_v41, %v1283_v35  ;;  %v1291_v38 = vpop.permute.xlu1 %1290  ;;  %vm4879_vm9 = vnez %v4878_v31  ;;  %vm4880_vm14 = vcmp.lt.s32.totalorder %v2957_v22, 109 }
 0x854   :  { %v1292_v25 = vsel %vm4864_vm5, %v1289_v23, %v1291_v38  ;;  %v1298_v14 = vsel %vm3475_vm7, %v1296_v58, %v1274_v33  ;;  %v1299_v15 = vsel %vm4865_vm0, %v1295_v16, %v1275_v48  ;;  %v1297_v19 = vsel %vm4867_vm4, %v1291_v38, %v1281_v41  ;;  %vm4882_vm0 = vmmov %vm4867_vm4 }
 0x855   :  { %1304 = vrot.lane.b32.xlu0 %v1298_v14, %s2746_s19  ;;  %1306 = vrot.lane.b32.xlu1 %v1299_v15, %s2746_s19  ;;  %v1302_v40 = vsel %vm4866_vm2, %v1292_v25, %v1278_v28  ;;  %v1303_v42 = vsel %vm4868_vm6, %v1297_v19, %v1279_v43  ;;  %vm4869_vm7 = vcmp.lt.s32.totalorder %v2957_v22, 18  ;;  %v1866_v28 = vld [vmem:[%s4661_s2] sm:$0xff]  ;;  %vm4881_vm5 = vcmask 1043456  }
 0x856   :  { %1312 = vrot.lane.b32.xlu2 %v1302_v40, %s2746_s19  ;;  %vm4870_vm8 = vmmov %vm4869_vm7  ;;  %1870 = vst [vmem:[#allocation1] ss:$4 sm:$0xff] %v1866_v28  ;;  %vm4883_vm2 = vcmp.lt.s32.totalorder %v2957_v22, 111  ;;  %vm4885_vm6 = vcmp.lt.s32.totalorder %v2957_v22, 127 }
 0x857   :  { %vm4871_vm13 = vmmov %vm4869_vm7 }
 0x858   :  { %vm4884_vm4 = vmmov %vm4881_vm5 }
 0x85e   :  { %1314 = vrot.lane.b32.xlu2 %v1303_v42, %s2746_s19 }
 0x8b0   :  { %v1313_v57 = vpop.permute.xlu2 %1312 }
 0x8b8   :  { %v1315_v10 = vpop.permute.xlu2 %1314 }
 0x8bf   :  { %v1311_v60 = vpop.permute.xlu0 %1310  ;;  %v1309_v1 = vpop.permute.xlu1 %1308 }
 0x8c0   :  { %v1317_v13 = vsel %vm4869_vm7, %v1311_v60, %v1313_v57  ;;  %v1318_v45 = vsel %vm4870_vm8, %v1309_v1, %v1311_v60  ;;  %vm4887_vm8 = vmmov %vm4884_vm4 }
 0x8c1   :  { %v4018_v8 = vsel %vm3522_vm3, %v1317_v13, %v1302_v40  ;;  %v4022_v30 = vsel %vm3571_vm1, %v1318_v45, %v1301_v4  ;;  %vm4872_vm3 = vnez %v4761_v6  ;;  %vm4873_vm1 = vmmov %vm4869_vm7  ;;  %vm4886_vm7 = vcmp.lt.s32.totalorder %v2957_v22, 1 }
 0x8c2   :  { %1464 = vrot.lane.b32.xlu2 %v4018_v8, %s2752_s25  ;;  %1462 = vrot.lane.b32.xlu0 %v4022_v30, %s2752_s25  ;;  %v2592_v27 = vpack.i.bf16 %v4018_v8, %v4022_v30  ;;  %vm4875_vm10 = vmmov %vm4873_vm1 }
 0x8c3   :  { %vm4877_vm12 = vmmov %vm4873_vm1 }
 0x8c4   :  { %2593 = vrot.lane.b32.xlu1 %v2592_v27, %s2751_s24  ;;  %v1316_v54 = vsel %vm4877_vm12, %v1313_v57, %v1315_v10  ;;  %v1867_v57 = vld [vmem:[%s4661_s2 + $0x8] sm:$0xf] }
 0x8c5   :  { %v4076_v51 = vsel %vm4879_vm9, %v1316_v54, %v1303_v42  ;;  %1872 = vst [vmem:[#allocation1 + $0x20] ss:$4 sm:$0xff] %v1867_v57 }
 0x8c6   :  { %v2677_v52 = vpack.i.bf16 %v4076_v51, %v4018_v8 }
 0x8c7   :  { %v1307_v26 = vpop.permute.xlu1 %1306  ;;  %v1305_v44 = vpop.permute.xlu0 %1304 }
 0x8c8   :  { %v1319_v59 = vsel %vm4871_vm13, %v1307_v26, %v1309_v1  ;;  %v1320_v47 = vsel %vm4873_vm1, %v1305_v44, %v1307_v26  ;;  %v1321_v62 = vsel %vm4875_vm10, %v1315_v10, %v1305_v44  ;;  %vm4888_vm13 = vcmp.lt.s32.totalorder %v2957_v22, 17  ;;  %vm4891_vm10 = vmmov %vm4880_vm14 }
 0x8c9   :  { %v4035_v18 = vsel %vm4872_vm3, %v1319_v59, %v1300_v63  ;;  %v4046_v17 = vsel %vm4874_vm15, %v1320_v47, %v1299_v15  ;;  %v4061_v50 = vsel %vm4876_vm11, %v1321_v62, %v1298_v14  ;;  %vm4889_vm3 = vmmov %vm4884_vm4  ;;  %vm4892_vm11 = vcmp.lt.s32.totalorder %v2957_v22, 19 }
 0x8ca   :  { %2603 = vrot.lane.b32.xlu0 %v2592_v27, %s2750_s23  ;;  %v2607_v37 = vpack.i.bf16 %v4022_v30, %v4035_v18  ;;  %v2622_v6 = vpack.i.bf16 %v4046_v17, %v4035_v18  ;;  %v2642_v46 = vpack.i.bf16 %v4061_v50, %v4046_v17  ;;  %v2662_v2 = vpack.i.bf16 %v4076_v51, %v4061_v50  ;;  %vm4890_vm15 = vmmov %vm4880_vm14 }
 0x8cb   :  { %vm4893_vm12 = vmmov %vm4889_vm3 }
 0x8cc   :  { %2598 = vrot.lane.b32.xlu1 %v2592_v27, %s2749_s22  ;;  %2608 = vrot.lane.b32.xlu2 %v2607_v37, %s2748_s21  ;;  %vm4894_vm9 = vmmov %vm4889_vm3 }
 0x8d2   :  { %2618 = vrot.lane.b32.xlu0 %v2607_v37, %s2747_s20 }
 0x8d4   :  { %2613 = vrot.lane.b32.xlu1 %v2607_v37, %s2746_s19  ;;  %2623 = vrot.lane.b32.xlu2 %v2622_v6, %s2751_s24 }
 0x8da   :  { %2628 = vrot.lane.b32.xlu0 %v2607_v37, %s2745_s0 }
 0x8dc   :  { %1460 = vrot.lane.b32.xlu1 %v4035_v18, %s2752_s25  ;;  %2633 = vrot.lane.b32.xlu2 %v2622_v6, %s2749_s22 }
 0x8e2   :  { %2643 = vrot.lane.b32.xlu0 %v2642_v46, %s2748_s21 }
 0x8e4   :  { %2638 = vrot.lane.b32.xlu1 %v2622_v6, %s2750_s23  ;;  %1458 = vrot.lane.b32.xlu2 %v4046_v17, %s2752_s25 }
 0x8ea   :  { %2653 = vrot.lane.b32.xlu0 %v2642_v46, %s2747_s20 }
 0x8ec   :  { %2648 = vrot.lane.b32.xlu1 %v2642_v46, %s2746_s19  ;;  %2658 = vrot.lane.b32.xlu2 %v2642_v46, %s2745_s0 }
 0x8f2   :  { %1456 = vrot.lane.b32.xlu0 %v4061_v50, %s2752_s25 }
 0x8f4   :  { %2663 = vrot.lane.b32.xlu1 %v2662_v2, %s2751_s24  ;;  %1466 = vrot.lane.b32.xlu2 %v4076_v51, %s2752_s25 }
 0x8fa   :  { %2673 = vrot.lane.b32.xlu0 %v2662_v2, %s2750_s23 }
 0x8fc   :  { %2668 = vrot.lane.b32.xlu1 %v2662_v2, %s2749_s22  ;;  %2678 = vrot.lane.b32.xlu2 %v2677_v52, %s2748_s21 }
 0x902   :  { %2688 = vrot.lane.b32.xlu0 %v2677_v52, %s2747_s20 }
 0x904   :  { %2683 = vrot.lane.b32.xlu1 %v2677_v52, %s2746_s19  ;;  %2693 = vrot.lane.b32.xlu2 %v2677_v52, %s2745_s0 }
 0x91c   :  { %v4093_v20 = vpop.permute.xlu2 %1464 }
 0x926   :  { %v4095_v48 = vpop.permute.xlu2 %2608 }
 0x927   :  { %v2611_v25 = vunpack.i.h.bf16 %v4095_v48  ;;  %v2610_v14 = vunpack.i.l.bf16 %v4095_v48 }
 0x929   :  { %v1398_v60 = vsel %vm4886_vm7, %v2610_v14, %v2611_v25  ;;  %vm4900_vm7 = vcmp.lt.s32.totalorder %v2957_v22, 111 }
 0x92a   :  { %v1501_v37 = vrot.slane %v1398_v60, 4 }
 0x92e   :  { %v4106_v23 = vpop.permute.xlu2 %2623 }
 0x934   :  { %v1463_v43 = vpop.permute.xlu0 %1462 }
 0x935   :  { %v1469_v39 = vsel %vm4880_vm14, %v1463_v43, %v4093_v20  ;;  %vm4895_vm14 = vmmov %vm4889_vm3 }
 0x936   :  { %2296 = vmatpush.msk.msrb.mxu3 %vm4881_vm5, %v1469_v39  ;;  %v4104_v33 = vpop.permute.xlu1 %2593  ;;  %v4131_v40 = vpop.permute.xlu2 %2633  ;;  %vm4896_vm5 = vcmask 293888  }
 0x937   :  { %v2596_v11 = vunpack.i.h.bf16 %v4104_v33  ;;  %v2595_v29 = vunpack.i.l.bf16 %v4104_v33  ;;  %v2635_v57 = vunpack.i.l.bf16 %v4131_v40 }
 0x939   :  { %v1451_v9 = vsel %vm4882_vm0, %v2595_v29, %v2596_v11 }
 0x93a   :  { %v1537_v35 = vrot.slane %v1451_v9, 4  ;;  %v4189_v9 = vld [vmem:[%s4662_s7] sm:$0xf] }
 0x93c   :  { %v4114_v3 = vpop.permute.xlu0 %2603 }
 0x93d   :  { %v2606_v4 = vunpack.i.h.bf16 %v4114_v3  ;;  %v2605_v63 = vunpack.i.l.bf16 %v4114_v3 }
 0x93e   :  { %v4118_v41 = vpop.permute.xlu1 %2598  ;;  %v4163_v6 = vpop.permute.xlu2 %1458 }
 0x93f   :  { %v2601_v16 = vunpack.i.h.bf16 %v4118_v41  ;;  %v2600_v58 = vunpack.i.l.bf16 %v4118_v41  ;;  %v1433_v38 = vsel %vm4883_vm2, %v2605_v63, %v2606_v4  ;;  %vm4897_vm2 = vmmov %vm4885_vm6 }
 0x940   :  { %v1567_v15 = vsel %vm4884_vm4, %v1433_v38, %v1537_v35  ;;  %v1874_v35 = vld.sshfl [vmem:[#allocation1 + $0x8] sm:$0xff pattern:$0x73625140]  ;;  %v1875_v38 = vld.sshfl [vmem:[#allocation1 + $0x10] sm:$0xff pattern:$0x73625140]  ;;  %vm4898_vm4 = vmmov %vm4882_vm0 }
 0x941   :  { %v1415_v19 = vsel %vm4885_vm6, %v2600_v58, %v2601_v16  ;;  %1668 = vmatpush.msrb.mxu3 %v1567_v15  ;;  %v2626_v15 = vunpack.i.h.bf16 %v4106_v23  ;;  %vm4899_vm6 = vmmov %vm4897_vm2 }
 0x942   :  { %v1519_v42 = vrot.slane %v1415_v19, 4  ;;  %v2625_v19 = vunpack.i.l.bf16 %v4106_v23 }
 0x944   :  { %v4146_v1 = vpop.permute.xlu0 %2618  ;;  %v1561_v13 = vsel %vm4887_vm8, %v4022_v30, %v1519_v42  ;;  %v2636_v42 = vunpack.i.h.bf16 %v4131_v40  ;;  %vm4901_vm8 = vmmov %vm4900_vm7 }
 0x945   :  { %v2621_v45 = vunpack.i.h.bf16 %v4146_v1  ;;  %v2620_v27 = vunpack.i.l.bf16 %v4146_v1  ;;  %1669 = vmatpush.msrb.mxu3 %v1561_v13  ;;  %v4960_v1 = vmax.f32 %v3895_v55, 0.0 }
 0x946   :  { %v4152_v26 = vpop.permute.xlu1 %2613  ;;  %v4202_v13 = vpop.permute.xlu2 %2658 }
 0x947   :  { %v2616_v59 = vunpack.i.h.bf16 %v4152_v26  ;;  %v2615_v44 = vunpack.i.l.bf16 %v4152_v26  ;;  %v1380_v30 = vsel %vm4888_vm13, %v2620_v27, %v2621_v45  ;;  %vm4902_vm13 = vmmov %vm4889_vm3 }
 0x948   :  { %v1555_v47 = vsel %vm4889_vm3, %v1380_v30, %v1501_v37  ;;  %v1453_v37 = vsel %vm4882_vm0, %v2626_v15, %v2625_v19  ;;  %v1417_v30 = vsel %vm4897_vm2, %v2636_v42, %v2635_v57  ;;  %vm4911_vm0 = vmmov %vm4889_vm3 }
 0x949   :  { %1670 = vmatpush.msrb.mxu3 %v1555_v47  ;;  %v1362_v10 = vsel %vm4873_vm1, %v2615_v44, %v2616_v59  ;;  %v1452_v47 = vsel %vm4898_vm4, %v2625_v19, %v2595_v29  ;;  %v1517_v32 = vrot.slane %v1417_v30, 4  ;;  %vm4903_vm1 = vcmp.lt.s32.totalorder %v2957_v22, 1  ;;  %vm4912_vm2 = vmmov %vm4911_vm0 }
 0x94a   :  { %v1483_v2 = vrot.slane %v1362_v10, 4  ;;  %v1416_v10 = vsel %vm4899_vm6, %v2635_v57, %v2600_v58  ;;  %vm4913_vm4 = vcmp.lt.s32.totalorder %v2957_v22, 19 }
 0x94b   :  { %vm4914_vm6 = vmmov %vm4913_vm4 }
 0x94c   :  { %v4171_v62 = vpop.permute.xlu0 %2628 }
 0x94d   :  { %v4714_v46 = vunpack.i.h.bf16 %v4171_v62  ;;  %v2630_v54 = vunpack.i.l.bf16 %v4171_v62 }
 0x94e   :  { %v1461_v31 = vpop.permute.xlu1 %1460 }
 0x94f   :  { %v1470_v52 = vsel %vm4890_vm15, %v1461_v31, %v1463_v43  ;;  %v1471_v28 = vsel %vm4891_vm10, %v4163_v6, %v1461_v31  ;;  %v1344_v39 = vsel %vm4892_vm11, %v2630_v54, %v4714_v46  ;;  %v1518_v46 = vrot.slane %v1416_v10, 4  ;;  %vm4904_vm15 = vmmov %vm4903_vm1 }
 0x950   :  { %2292 = vmatpush.msk.msrb.mxu1 %vm4893_vm12, %v1471_v28  ;;  %2294 = vmatpush.msk.msra.mxu2 %vm4894_vm9, %v1470_v52  ;;  %v1549_v43 = vsel %vm4895_vm14, %v1344_v39, %v1483_v2  ;;  %vm4905_vm10 = vmmov %vm4889_vm3  ;;  %vm4907_vm12 = vcmp.lt.s32.totalorder %v2957_v22, 17  ;;  %vm4909_vm14 = vcmp.lt.s32.totalorder %v2957_v22, 18 }
 0x951   :  { %1671 = vmatpush.msrb.mxu3 %v1549_v43  ;;  %v1878_v43 = vld.sshfl [vmem:[#allocation1 + $0x28] sm:$0xff pattern:$0x73625140]  ;;  %vm4906_vm11 = vmmov %vm4889_vm3 }
 0x952   :  { %2297 = vmatmul.msk.f32.vlgmr.msrb.gmra.mxu3 %vm4896_vm5, %v4189_v9  ;;  %v1560_v10 = vsel %vm4906_vm11, %v4035_v18, %v1518_v46  ;;  %vm4908_vm9 = vmmov %vm4907_vm12 }
 0x953   :  { %1920 = vmatpush.xpose.msra.mxu3 %v1874_v35  ;;  %v1535_v35 = vrot.slane %v1453_v37, 4  ;;  %vm4910_vm5 = vmmov %vm4909_vm14 }
 0x954   :  { %v4200_v60 = vpop.permute.xlu0 %2643 }
 0x955   :  { %v2646_v2 = vunpack.i.h.bf16 %v4200_v60  ;;  %v2645_v52 = vunpack.i.l.bf16 %v4200_v60 }
 0x956   :  { %v4216_v31 = vpop.permute.xlu1 %2638 }
 0x957   :  { %1940 = vmatpush.xpose.msrb.mxu3 %v1875_v38  ;;  %v2641_v28 = vunpack.i.h.bf16 %v4216_v31  ;;  %v2640_v39 = vunpack.i.l.bf16 %v4216_v31  ;;  %v1536_v38 = vrot.slane %v1452_v47, 4  ;;  %v1399_v53 = vsel %vm4903_vm1, %v2645_v52, %v2610_v14  ;;  %vm4919_vm1 = vmmov %vm4911_vm0 }
 0x958   :  { %v1559_v47 = vsel %vm4905_vm10, %v4046_v17, %v1517_v32  ;;  %v2661_v14 = vunpack.i.h.bf16 %v4202_v13  ;;  %vm4921_vm10 = vmmov %vm4911_vm0 }
 0x959   :  { %v1435_v29 = vsel %vm4900_vm7, %v2641_v28, %v2640_v39  ;;  %v1434_v58 = vsel %vm4901_vm8, %v2640_v39, %v2605_v63  ;;  %v2660_v39 = vunpack.i.l.bf16 %v4202_v13  ;;  %vm4915_vm7 = vmmov %vm4911_vm0 }
 0x95a   :  { %1921 = vmatmul.f32.vlgmr.msra.gmra.mxu3 %v1209_v36  ;;  %v1565_v19 = vsel %vm4902_vm13, %v1435_v29, %v1535_v35  ;;  %v1566_v57 = vsel %vm4889_vm3, %v1434_v58, %v1536_v38  ;;  %v1400_v36 = vsel %vm4904_vm15, %v2646_v2, %v2645_v52  ;;  %v1500_v58 = vrot.slane %v1399_v53, 4  ;;  %vm4916_vm8 = vmmov %vm4911_vm0 }
 0x95b   :  { %2000 = vmatpush.xpose.msra.mxu3 %v1878_v43  ;;  %1628 = vmatpush.msrb.mxu1 %v1565_v19  ;;  %v4254_v43 = vpop.permute.xlu2 %1466  ;;  %v1499_v29 = vrot.slane %v1400_v36, 4  ;;  %vm4917_vm13 = vcmp.lt.s32.totalorder %v2957_v22, 109  ;;  %vm4920_vm15 = vcmask 293888  }
 0x95c   :  { %1648 = vmatpush.msra.mxu2 %v1566_v57  ;;  %v4242_v37 = vpop.permute.xlu0 %2653  ;;  %vm4918_vm3 = vmmov %vm4917_vm13 }
 0x95d   :  { %v2656_v63 = vunpack.i.h.bf16 %v4242_v37  ;;  %v2655_v30 = vunpack.i.l.bf16 %v4242_v37  ;;  %1629 = vmatpush.msrb.mxu1 %v1559_v47  ;;  %vm4922_vm11 = vmmov %vm4920_vm15 }
 0x95e   :  { %1649 = vmatpush.msra.mxu2 %v1560_v10  ;;  %v4252_v52 = vpop.permute.xlu1 %2648 }
 0x95f   :  { %v2651_v35 = vunpack.i.h.bf16 %v4252_v52  ;;  %v2650_v38 = vunpack.i.l.bf16 %v4252_v52  ;;  %v1382_v32 = vsel %vm4907_vm12, %v2656_v63, %v2655_v30  ;;  %v1381_v18 = vsel %vm4908_vm9, %v2655_v30, %v2620_v27 }
 0x960   :  { %v1553_v19 = vsel %vm4911_vm0, %v1382_v32, %v1499_v29  ;;  %v1554_v57 = vsel %vm4912_vm2, %v1381_v18, %v1500_v58  ;;  %v1346_v27 = vsel %vm4913_vm4, %v2661_v14, %v2660_v39  ;;  %v1877_v29 = vld.sshfl [vmem:[#allocation1 + $0x20] sm:$0xff pattern:$0x73625140]  ;;  %vm4923_vm12 = vcmp.lt.s32.totalorder %v2957_v22, 110  ;;  %vm4928_vm2 = vmmov %vm4919_vm1 }
 0x961   :  { %v1363_v17 = vsel %vm4909_vm14, %v2650_v38, %v2615_v44  ;;  %v1364_v46 = vsel %vm4910_vm5, %v2651_v35, %v2650_v38  ;;  %1630 = vmatpush.msrb.mxu1 %v1553_v19  ;;  %1650 = vmatpush.msra.mxu2 %v1554_v57  ;;  %v1345_v44 = vsel %vm4914_vm6, %v2660_v39, %v2630_v54  ;;  %v1873_v38 = vld.sshfl [vmem:[#allocation1] sm:$0xff pattern:$0x73625140]  ;;  %vm4924_vm9 = vmmov %vm4923_vm12  ;;  %vm4926_vm5 = vcmp.lt.s32.totalorder %v2957_v22, 111 }
 0x962   :  { %v1481_v53 = vrot.slane %v1364_v46, 4  ;;  %v1482_v36 = vrot.slane %v1363_v17, 4  ;;  %1941 = vmatmul.f32.vlgmr.msrb.gmra.mxu3 %v1210_v7  ;;  %vm4925_vm14 = vmmov %vm4924_vm9 }
 0x963   :  { %vm4927_vm0 = vmmov %vm4926_vm5 }
 0x964   :  { %v1457_v30 = vpop.permute.xlu0 %1456  ;;  %v1547_v47 = vsel %vm4915_vm7, %v1346_v27, %v1481_v53  ;;  %v1548_v10 = vsel %vm4916_vm8, %v1345_v44, %v1482_v36  ;;  %vm4929_vm4 = vmmov %vm4919_vm1  ;;  %vm4931_vm7 = vcmp.lt.s32.totalorder %v2957_v22, 127 }
 0x965   :  { %v1472_v24 = vsel %vm4917_vm13, %v1457_v30, %v4163_v6  ;;  %v1473_v7 = vsel %vm4918_vm3, %v4254_v43, %v1457_v30  ;;  %1631 = vmatpush.msrb.mxu1 %v1547_v47  ;;  %1651 = vmatpush.msra.mxu2 %v1548_v10  ;;  %v4300_v6 = vpop.permute.xlu2 %2678  ;;  %vm4930_vm6 = vmmov %vm4927_vm0  ;;  %vm4934_vm3 = vcmp.lt.s32.totalorder %v2957_v22, 1 }
 0x966   :  { %2290 = vmatpush.msk.msra.mxu0 %vm4919_vm1, %v1472_v24  ;;  %v2664_v54 = vpop.permute.xlu1 %2663  ;;  %2295 = vmatmul.msk.f32.vlgmr.msra.gmra.mxu2 %vm4920_vm15, %v4189_v9  ;;  %v2681_v53 = vunpack.i.h.bf16 %v4300_v6  ;;  %v2680_v23 = vunpack.i.l.bf16 %v4300_v6  ;;  %vm4932_vm8 = vmmov %vm4931_vm7 }
 0x967   :  { %v2666_v39 = vunpack.i.h.bf16 %v2664_v54  ;;  %v2665_v58 = vunpack.i.l.bf16 %v2664_v54  ;;  %2300 = vmatpush.msk.msra.mxu1 %vm4921_vm10, %v1473_v7  ;;  %1900 = vmatpush.xpose.msrb.mxu2 %v1873_v38  ;;  %vm4933_vm13 = vmmov %vm4919_vm1 }
 0x968   :  { %2293 = vmatmul.msk.f32.vlgmr.msrb.gmra.mxu1 %vm4922_vm11, %v4189_v9  ;;  %v1401_v3 = vsel %vm4934_vm3, %v2681_v53, %v2646_v2  ;;  %vm4935_vm1 = vmmov %vm4934_vm3  ;;  %vm4938_vm11 = vcmp.lt.s32.totalorder %v2957_v22, 17 }
 0x969   :  { %v1454_v32 = vsel %vm4923_vm12, %v2665_v58, %v2626_v15  ;;  %v1455_v18 = vsel %vm4924_vm9, %v2666_v39, %v2665_v58  ;;  %v1450_v46 = vsel %vm4925_vm14, %v2596_v11, %v2666_v39  ;;  %vm4936_vm15 = vmmov %vm4928_vm2  ;;  %v1498_v2 = vrot.slane %v1401_v3, 4 }
 0x96a   :  { %2001 = vmatmul.f32.vlgmr.msra.gmra.mxu3 %v1213_v56  ;;  %v1534_v15 = vrot.slane %v1454_v32, 4  ;;  %v1539_v27 = vrot.slane %v1455_v18, 4  ;;  %vm4937_vm10 = vmmov %vm4928_vm2  ;;  %v4963_v3 = vmov 1  }
 0x96b   :  { %1980 = vmatpush.xpose.msra.mxu2 %v1877_v29  ;;  %vm4939_vm12 = vmmov %vm4938_vm11 }
 0x96c   :  { %v2674_v17 = vpop.permute.xlu0 %2673  ;;  %vm4940_vm9 = vmmov %vm4928_vm2 }
 0x96d   :  { %v2676_v19 = vunpack.i.h.bf16 %v2674_v17  ;;  %v2675_v57 = vunpack.i.l.bf16 %v2674_v17  ;;  %v2694_v40 = vpop.permute.xlu2 %2693  ;;  %vm4941_vm14 = vmmov %vm4928_vm2 }
 0x96e   :  { %v2669_v36 = vpop.permute.xlu1 %2668  ;;  %1901 = vmatmul.f32.vlgmr.msrb.gmra.mxu2 %v1208_v0  ;;  %v1538_v0 = vrot.slane %v1450_v46, 4  ;;  %v2696_v39 = vunpack.i.h.bf16 %v2694_v40  ;;  %v2695_v60 = vunpack.i.l.bf16 %v2694_v40  ;;  %vm4950_vm3 = vmmov %vm4935_vm1  ;;  %v2011_v40 = vld [vmem:[%s4664_s9 + $0x10] sm:$0xff] }
 0x96f   :  { %v2671_v34 = vunpack.i.h.bf16 %v2669_v36  ;;  %v2670_v56 = vunpack.i.l.bf16 %v2669_v36  ;;  %v1436_v33 = vsel %vm4926_vm5, %v2675_v57, %v2641_v28  ;;  %v1437_v11 = vsel %vm4927_vm0, %v2676_v19, %v2675_v57  ;;  %v1876_v36 = vld.sshfl [vmem:[#allocation1 + $0x18] sm:$0xff pattern:$0x73625140] }
 0x970   :  { %v1564_v44 = vsel %vm4928_vm2, %v1436_v33, %v1534_v15  ;;  %v1569_v30 = vsel %vm4929_vm4, %v1437_v11, %v1539_v27  ;;  %v1432_v49 = vsel %vm4930_vm6, %v2606_v4, %v2676_v19  ;;  %v1396_v4 = vsel %vm4935_vm1, %v2680_v23, %v2681_v53  ;;  %vm4944_vm2 = vmmov %vm4931_vm7  ;;  %v4420_v27 = vld [vmem:[%s4663_s10] sm:$0xff] }
 0x971   :  { %v1418_v31 = vsel %vm4931_vm7, %v2670_v56, %v2636_v42  ;;  %v1419_v28 = vsel %vm4932_vm8, %v2671_v34, %v2670_v56  ;;  %1608 = vmatpush.msra.mxu0 %v1564_v44  ;;  %1708 = vmatpush.msra.mxu1 %v1569_v30  ;;  %v1568_v38 = vsel %vm4933_vm13, %v1432_v49, %v1538_v0  ;;  %v1503_v6 = vrot.slane %v1396_v4, 4  ;;  %vm4947_vm7 = vmmov %vm4940_vm9  ;;  %v2007_v30 = vld [vmem:[%s4663_s10 + $0x10] sm:$0xff]  ;;  %v4432_v49 = vld [vmem:[%s4663_s10 + $0x8] sm:$0xff] }
 0x972   :  { %v1516_v47 = vrot.slane %v1418_v31, 4  ;;  %v1521_v10 = vrot.slane %v1419_v28, 4  ;;  %vm4942_vm5 = vcmp.lt.s32.totalorder %v2957_v22, 18  ;;  %v1414_v37 = vsel %vm4944_vm2, %v2601_v16, %v2671_v34  ;;  %vm4948_vm8 = vmmov %vm4947_vm7  ;;  %2025 = vperm.xlu0 %2698, %v2007_v30   ;;  %2020 = vperm.xlu2 %2699, %v4432_v49   ;;  %v2010_v4 = vld [vmem:[%s4664_s9 + $0x8] sm:$0xff] }
 0x973   :  { %vm4943_vm0 = vmmov %vm4942_vm5  ;;  %vm4945_vm4 = vcmp.lt.s32.totalorder %v2957_v22, 19  ;;  %vm4949_vm13 = vcmp.lt.s32.totalorder %v2957_v22, 109  ;;  %v1520_v16 = vrot.slane %v1414_v37, 4  ;;  %v1397_v13 = vsel %vm4950_vm3, %v2611_v25, %v2680_v23 }
 0x974   :  { %v2689_v24 = vpop.permute.xlu0 %2688  ;;  %v1558_v42 = vsel %vm4936_vm15, %v4061_v50, %v1516_v47  ;;  %v1563_v7 = vsel %vm4937_vm10, %v4076_v51, %v1521_v10  ;;  %v1347_v57 = vsel %vm4945_vm4, %v2696_v39, %v2661_v14  ;;  %vm4946_vm6 = vmmov %vm4945_vm4  ;;  %v1468_v41 = vsel %vm4949_vm13, %v4093_v20, %v4254_v43 }
 0x975   :  { %v2691_v29 = vunpack.i.h.bf16 %v2689_v24  ;;  %v2690_v54 = vunpack.i.l.bf16 %v2689_v24  ;;  %1609 = vmatpush.msra.mxu0 %v1558_v42  ;;  %1709 = vmatpush.msra.mxu1 %v1563_v7  ;;  %v1342_v52 = vsel %vm4946_vm6, %v2695_v60, %v2696_v39  ;;  %vm4951_vm1 = vmmov %vm4943_vm0  ;;  %vm4953_vm10 = vcmask 293888   ;;  %v2012_v24 = vld [vmem:[%s4664_s9 + $0x18] sm:$0xff] }
 0x976   :  { %v2684_v58 = vpop.permute.xlu1 %2683  ;;  %1981 = vmatmul.f32.vlgmr.msra.gmra.mxu2 %v1212_v61  ;;  %vm4952_vm15 = vmmov %vm4947_vm7  ;;  %v1502_v25 = vrot.slane %v1397_v13, 4  ;;  %v4957_v43 = vunpack.i.h.bf16 %v4171_v62 }
 0x977   :  { %v2686_v32 = vunpack.i.h.bf16 %v2684_v58  ;;  %v2685_v18 = vunpack.i.l.bf16 %v2684_v58  ;;  %v1383_v50 = vsel %vm4938_vm11, %v2691_v29, %v2656_v63  ;;  %v1378_v51 = vsel %vm4939_vm12, %v2690_v54, %v2691_v29  ;;  %vm4954_vm11 = vmmov %vm4953_vm10 }
 0x978   :  { %v1552_v17 = vsel %vm4940_vm9, %v1383_v50, %v1498_v2  ;;  %v1557_v46 = vsel %vm4941_vm14, %v1378_v51, %v1503_v6  ;;  %v1379_v20 = vsel %vm4939_vm12, %v2621_v45, %v2690_v54  ;;  %vm4955_vm9 = vmmov %vm4947_vm7  ;;  %v2008_v45 = vld [vmem:[%s4663_s10 + $0x18] sm:$0xff] }
 0x979   :  { %v1360_v21 = vsel %vm4942_vm5, %v2685_v18, %v2686_v32  ;;  %v1365_v61 = vsel %vm4943_vm0, %v2686_v32, %v2651_v35  ;;  %1610 = vmatpush.msra.mxu0 %v1552_v17  ;;  %1710 = vmatpush.msra.mxu1 %v1557_v46  ;;  %v1361_v14 = vsel %vm4951_vm1, %v2616_v59, %v2685_v18  ;;  %vm4956_vm14 = vmmov %vm4947_vm7 }
 0x97a   :  { %v1480_v63 = vrot.slane %v1365_v61, 4  ;;  %v1485_v19 = vrot.slane %v1360_v21, 4  ;;  %v1562_v48 = vsel %vm4955_vm9, %v4018_v8, %v1520_v16  ;;  %v1484_v26 = vrot.slane %v1361_v14, 4  ;;  %vm4958_vm5 = vmmov %vm4945_vm4  ;;  %2030 = vperm.xlu1 %2697, %v2008_v45   ;;  %2701 = vset.pattern.permute.xlu2 %v4963_v3 }
 0x97b   :  { %v1556_v59 = vsel %vm4956_vm14, %v1379_v20, %v1502_v25  ;;  %v1343_v23 = vsel %vm4958_vm5, %v4957_v43, %v2695_v60  ;;  %vm4959_vm0 = vmmov %vm4947_vm7  ;;  %vm2033_vm4 = vcmask 31744   ;;  %2700 = vset.pattern.permute.xlu0 %v4963_v3 }
 0x97c   :  { %v1546_v53 = vsel %vm4947_vm7, %v1347_v57, %v1480_v63  ;;  %v1551_v35 = vsel %vm4948_vm8, %v1342_v52, %v1485_v19  ;;  %v1550_v15 = vsel %vm4959_vm0, %v1343_v23, %v1484_v26  ;;  %vm4961_vm2 = vmmov %vm4953_vm10  ;;  %vm2078_vm7 = vcmask 15360  }
 0x97d   :  { %1611 = vmatpush.msra.mxu0 %v1546_v53  ;;  %1711 = vmatpush.msra.mxu1 %v1551_v35  ;;  %vm4962_vm6 = vmmov %vm4959_vm0  ;;  %v2756_v63 = vmov 2.0  }
 0x97e   :  { %2301 = vmatmul.msk.f32.vlgmr.msra.gmra.mxu1 %vm4953_vm10, %v4189_v9  ;;  %2291 = vmatmul.msk.f32.vlgmr.msra.gmra.mxu0 %vm4954_vm11, %v4189_v9  ;;  %2711 = vrcp.f32 %v2756_v63  ;;  %vm4964_vm13 = vmmov %vm4959_vm0 }
 0x97f   :  { %2298 = vmatpush.msk.msrb.mxu0 %vm4952_vm15, %v1468_v41  ;;  %1960 = vmatpush.xpose.msrb.mxu1 %v1876_v36  ;;  %vm4965_vm3 = vmmov %vm4959_vm0 }
 0x980   :  { %vm4966_vm1 = vmmov %vm4959_vm0 }
 0x981   :  { %1688 = vmatpush.msrb.mxu0 %v1568_v38  ;;  %v2009_v38 = vld [vmem:[%s4664_s9] sm:$0xff]  ;;  %vm4967_vm15 = vmmov %vm4959_vm0 }
 0x982   :  { %2015 = vperm.xlu1 %2697, %v4420_v27   ;;  %vm4968_vm10 = vmmov %vm4959_vm0 }
 0x983   :  { %1689 = vmatpush.msrb.mxu0 %v1562_v48  ;;  %vm4969_vm11 = vmmov %vm4959_vm0 }
 0x984   :  { %v2712_v19 = vpop.eup %2711  ;;  %vm4970_vm12 = vmmov %vm4959_vm0 }
 0x985   :  { %1690 = vmatpush.msrb.mxu0 %v1556_v59  ;;  %v2092_v57 = vmul.f32 2.0, %v2712_v19  ;;  %vm2096_vm8 = vweird.f32 %v2712_v19  ;;  %vm4971_vm9 = vmmov %vm4959_vm0 }
 0x986   :  { %1961 = vmatmul.f32.vlgmr.msrb.gmra.mxu1 %v4960_v1  ;;  %vm4972_vm14 = vmmov %vm4959_vm0 }
 0x987   :  { %1691 = vmatpush.msrb.mxu0 %v1550_v15  ;;  %v2093_v52 = vsub.f32 1.0, %v2092_v57  ;;  %vm4973_vm5 = vmmov %vm4959_vm0 }
 0x988   :  { %2299 = vmatmul.msk.f32.vlgmr.msrb.gmra.mxu0 %vm4961_vm2, %v4189_v9  ;;  %vm4974_vm2 = vmmov %vm4959_vm0 }
 0x989   :  { %v2094_v53 = vmul.f32 %v2712_v19, %v2093_v52 }
 0x98a   :  { %2702 = vset.pattern.permute.xlu1 %v4838_v5 }
 0x98b   :  { %2207 = vperm.xlu1 %2702, %v2008_v45   ;;  %v2095_v35 = vadd.f32 %v2712_v19, %v2094_v53 }
 0x98d   :  { %v4460_v36 = vsel %vm2096_vm8, %v2712_v19, %v2095_v35 }
 0x9cc   :  { %v2021_v2 = vpop.permute.xlu2 %2020 }
 0x9d5   :  { %v4408_v8 = vpop.f32.mrf.mxu3 }
 0x9dd   :  { %v1922_v55 = vpop.f32.mrf.mxu3 }
 0x9e4   :  { %v2026_v50 = vpop.permute.xlu0 %2025 }
 0x9e5   :  { %v4415_v22 = vpop.f32.mrf.mxu1  ;;  %v1942_v56 = vpop.f32.mrf.mxu3 }
 0x9e9   :  { %v4413_v62 = vpop.f32.mrf.mxu2 }
 0x9ec   :  { %v2031_v7 = vpop.permute.xlu1 %2030 }
 0x9ed   :  { %v2002_v47 = vpop.f32.mrf.mxu3 }
 0x9f1   :  { %v1902_v9 = vpop.f32.mrf.mxu2 }
 0x9f2   :  { %v1923_v33 = vadd.f32 %v1922_v55, %v1902_v9  ;;  %v1329_v9 = vld [vmem:[%s4665_s8] sm:$0xf] }
 0x9f4   :  { %v1943_v11 = vadd.f32 %v1942_v56, %v1923_v33  ;;  %v2016_v54 = vpop.permute.xlu1 %2015 }
 0x9f9   :  { %v1982_v31 = vpop.f32.mrf.mxu2 }
 0x9fb   :  { %v4423_v34 = vpop.f32.mrf.mxu1  ;;  %v4450_v42 = vpop.f32.mrf.mxu0 }
 0x9fd   :  { %v4467_v14 = vpop.permute.xlu1 %2207 }
 0xa03   :  { %v1962_v44 = vpop.f32.mrf.mxu1 }
 0xa04   :  { %v1963_v0 = vadd.f32 %v1962_v44, %v1943_v11 }
 0xa05   :  { %v4452_v29 = vpop.f32.mrf.mxu0 }
 0xa06   :  { %v1983_v28 = vadd.f32 %v1982_v31, %v1963_v0 }
 0xa08   :  { %v2003_v10 = vadd.f32 %v2002_v47, %v1983_v28 }
 0xa0a   :  { %2302 = vmatpush.msk.msra.mxu0 %vm4962_vm6, %v2003_v10 }
 0xa0b   :  { %2303 = vmatmul.msk.f32.vlgmr.msra.gmra.mxu0 %vm2033_vm4, %v2009_v38 }
 0xa13   :  { %2304 = vmatmul.msk.f32.gmra.mxu0 %vm2033_vm4, %v2010_v4 }
 0xa1b   :  { %2305 = vmatmul.msk.f32.gmra.mxu0 %vm2033_vm4, %v2011_v40 }
 0xa23   :  { %2306 = vmatmul.msk.f32.gmra.mxu0 %vm2033_vm4, %v2012_v24 }
 0xa88   :  { %v2066_v39 = vpop.f32.mrf.mxu0 }
 0xa89   :  { %v2067_v60 = vadd.f32 %v2066_v39, %v2016_v54 }
 0xa8b   :  { %v2079_v58 = vsel %vm2078_vm7, %v2067_v60, 0.0 }
 0xa8c   :  { %2080 = vadd.xlane.f32.xlu2 %v2079_v58 }
 0xa90   :  { %v2069_v6 = vpop.f32.mrf.mxu0 }
 0xa91   :  { %v2070_v32 = vadd.f32 %v2069_v6, %v2021_v2 }
 0xa93   :  { %v2082_v18 = vsel %vm2078_vm7, %v2070_v32, 0.0 }
 0xa94   :  { %2083 = vadd.xlane.f32.xlu0 %v2082_v18 }
 0xa98   :  { %v2072_v51 = vpop.f32.mrf.mxu0 }
 0xa99   :  { %v2073_v17 = vadd.f32 %v2072_v51, %v2026_v50 }
 0xa9b   :  { %v2085_v46 = vsel %vm2078_vm7, %v2073_v17, 0.0 }
 0xa9c   :  { %2086 = vadd.xlane.f32.xlu1 %v2085_v46 }
 0xaa0   :  { %v2075_v21 = vpop.f32.mrf.mxu0 }
 0xaa1   :  { %v2076_v61 = vadd.f32 %v2075_v21, %v2031_v7 }
 0xaa3   :  { %v2088_v37 = vsel %vm2078_vm7, %v2076_v61, 0.0 }
 0xaa4   :  { %2183 = vperm.xlu2 %2701, %v2007_v30  }
 0xaa8   :  { %2187 = vperm.xlu0 %2700, %v2008_v45  }
 0xab0   :  { %2703 = vset.pattern.permute.xlu0 %v4838_v5 }
 0xab5   :  { %2203 = vperm.xlu1 %2702, %v2007_v30  }
 0xacd   :  { %2089 = vadd.xlane.f32.xlu2 %v2088_v37 }
 0xae5   :  { %2179 = vperm.xlu2 %2701, %v4432_v49  }
 0xaff   :  { %v2081_v41 = vpop.xlane.xlu2 %2080 }
 0xb00   :  { %v2098_v5 = vmul.f32 %v4460_v36, %v2081_v41 }
 0xb02   :  { %v4463_v16 = vsub.f32 %v2067_v60, %v2098_v5 }
 0xb04   :  { %v2106_v13 = vmul.f32 %v4463_v16, %v4463_v16 }
 0xb06   :  { %v2110_v20 = vsel %vm2078_vm7, %v2106_v13, 0.0 }
 0xb07   :  { %v2084_v48 = vpop.xlane.xlu0 %2083  ;;  %2111 = vadd.xlane.f32.xlu1 %v2110_v20  ;;  %v4489_v56 = vpop.permute.xlu2 %2183 }
 0xb08   :  { %v2099_v25 = vmul.f32 %v4460_v36, %v2084_v48 }
 0xb0a   :  { %v4471_v26 = vsub.f32 %v2070_v32, %v2099_v25 }
 0xb0c   :  { %v2107_v59 = vmul.f32 %v4471_v26, %v4471_v26 }
 0xb0e   :  { %v2113_v43 = vsel %vm2078_vm7, %v2107_v59, 0.0 }
 0xb0f   :  { %v2087_v23 = vpop.xlane.xlu1 %2086  ;;  %2114 = vadd.xlane.f32.xlu2 %v2113_v43 }
 0xb10   :  { %v2100_v15 = vmul.f32 %v4460_v36, %v2087_v23 }
 0xb12   :  { %v4477_v1 = vsub.f32 %v2073_v17, %v2100_v15 }
 0xb14   :  { %v2108_v45 = vmul.f32 %v4477_v1, %v4477_v1 }
 0xb16   :  { %v2116_v55 = vsel %vm2078_vm7, %v2108_v45, 0.0 }
 0xb17   :  { %2117 = vadd.xlane.f32.xlu0 %v2116_v55 }
 0xb1a   :  { %v4517_v2 = vpop.permute.xlu0 %2187 }
 0xb27   :  { %2175 = vperm.xlu2 %2701, %v4420_v27   ;;  %v4519_v43 = vpop.permute.xlu1 %2203 }
 0xb2b   :  { %2195 = vperm.xlu0 %2703, %v4420_v27  }
 0xb2f   :  { %2704 = vset.pattern.permute.xlu2 %v4841_v12 }
 0xb30   :  { %1572 = vperm.xlu2 %2704, %v1329_v9  }
 0xb33   :  { %2706 = vset.pattern.permute.xlu0 %v4841_v12 }
 0xb40   :  { %v2090_v33 = vpop.xlane.xlu2 %2089 }
 0xb41   :  { %v2101_v11 = vmul.f32 %v4460_v36, %v2090_v33 }
 0xb43   :  { %v4492_v44 = vsub.f32 %v2076_v61, %v2101_v11 }
 0xb45   :  { %v2109_v30 = vmul.f32 %v4492_v44, %v4492_v44 }
 0xb47   :  { %v2119_v27 = vsel %vm2078_vm7, %v2109_v30, 0.0 }
 0xb48   :  { %2120 = vadd.xlane.f32.xlu1 %v2119_v27  ;;  %v4499_v0 = vpop.permute.xlu2 %2179 }
 0xb61   :  { %2199 = vperm.xlu1 %2702, %v4432_v49  }
 0xb69   :  { %2705 = vset.pattern.permute.xlu1 %v4841_v12 }
 0xb82   :  { %v4501_v31 = vpop.xlane.xlu2 %2114 }
 0xb8a   :  { %v4503_v28 = vpop.permute.xlu2 %2175  ;;  %v2118_v11 = vpop.xlane.xlu0 %2117 }
 0xb92   :  { %v1573_v47 = vpop.permute.xlu2 %1572 }
 0xb93   :  { %v1614_v10 = vadd.f32 %v4450_v42, %v1573_v47  ;;  %v1634_v38 = vadd.f32 %v4415_v22, %v1573_v47  ;;  %v1654_v3 = vadd.f32 %v4413_v62, %v1573_v47  ;;  %v1674_v4 = vadd.f32 %v4408_v8, %v1573_v47 }
 0xb94   :  { %v1694_v40 = vadd.f32 %v4452_v29, %v1573_v47  ;;  %v1714_v49 = vadd.f32 %v4423_v34, %v1573_v47 }
 0xb95   :  { %v1716_v12 = vsel %vm4964_vm13, %v1614_v10, -inf  ;;  %v1723_v24 = vsel %vm4965_vm3, %v1634_v38, -inf  ;;  %v1730_v7 = vsel %vm4966_vm1, %v1654_v3, -inf  ;;  %v1737_v42 = vsel %vm4967_vm15, %v1674_v4, -inf  ;;  %vm4977_vm15 = vmmov %vm4959_vm0 }
 0xb96   :  { %v1717_v54 = vrot.slane %v1716_v12, 4  ;;  %v1724_v39 = vrot.slane %v1723_v24, 4  ;;  %v1731_v60 = vrot.slane %v1730_v7, 4  ;;  %v1744_v22 = vsel %vm4968_vm10, %v1694_v40, -inf }
 0xb97   :  { %v1751_v62 = vsel %vm4969_vm11, %v1714_v49, -inf  ;;  %v1738_v29 = vrot.slane %v1737_v42, 4  ;;  %v1745_v6 = vrot.slane %v1744_v22, 4 }
 0xb98   :  { %v1718_v8 = vmax.f32 %v1716_v12, %v1717_v54  ;;  %v1725_v58 = vmax.f32 %v1723_v24, %v1724_v39  ;;  %v1732_v34 = vmax.f32 %v1730_v7, %v1731_v60  ;;  %v1752_v32 = vrot.slane %v1751_v62, 4 }
 0xb99   :  { %v1739_v51 = vmax.f32 %v1737_v42, %v1738_v29  ;;  %v1746_v46 = vmax.f32 %v1744_v22, %v1745_v6  ;;  %v2124_v42 = vmul.f32 %v2118_v11, %v4460_v36 }
 0xb9a   :  { %v1719_v18 = vrot.slane %v1718_v8, 2  ;;  %v1726_v50 = vrot.slane %v1725_v58, 2  ;;  %v1733_v17 = vrot.slane %v1732_v34, 2  ;;  %v1753_v21 = vmax.f32 %v1751_v62, %v1752_v32 }
 0xb9b   :  { %v1740_v63 = vrot.slane %v1739_v51, 2  ;;  %v1747_v57 = vrot.slane %v1746_v46, 2 }
 0xb9c   :  { %v1720_v61 = vmax.f32 %v1718_v8, %v1719_v18  ;;  %v1727_v37 = vmax.f32 %v1725_v58, %v1726_v50  ;;  %v1734_v19 = vmax.f32 %v1732_v34, %v1733_v17  ;;  %v1754_v52 = vrot.slane %v1753_v21, 2 }
 0xb9d   :  { %v1741_v41 = vmax.f32 %v1739_v51, %v1740_v63  ;;  %v1748_v13 = vmax.f32 %v1746_v46, %v1747_v57 }
 0xb9e   :  { %v1721_v53 = vrot.slane %v1720_v61, 1  ;;  %v1728_v35 = vrot.slane %v1727_v37, 1  ;;  %v1735_v5 = vrot.slane %v1734_v19, 1  ;;  %v1755_v20 = vmax.f32 %v1753_v21, %v1754_v52 }
 0xb9f   :  { %v1742_v59 = vrot.slane %v1741_v41, 1  ;;  %v1749_v15 = vrot.slane %v1748_v13, 1 }
 0xba0   :  { %v1722_v48 = vmax.f32 %v1720_v61, %v1721_v53  ;;  %v1729_v25 = vmax.f32 %v1727_v37, %v1728_v35  ;;  %v1736_v23 = vmax.f32 %v1734_v19, %v1735_v5  ;;  %v1756_v45 = vrot.slane %v1755_v20, 1 }
 0xba1   :  { %v1743_v55 = vmax.f32 %v1741_v41, %v1742_v59  ;;  %v1750_v30 = vmax.f32 %v1748_v13, %v1749_v15 }
 0xba2   :  { %v1758_v9 = vsub.f32 %v1614_v10, %v1722_v48  ;;  %v1759_v33 = vsub.f32 %v1634_v38, %v1729_v25  ;;  %v1757_v27 = vmax.f32 %v1755_v20, %v1756_v45  ;;  %v1760_v47 = vsub.f32 %v1654_v3, %v1736_v23  ;;  %v2112_v10 = vpop.xlane.xlu1 %2111 }
 0xba3   :  { %v1761_v12 = vsub.f32 %v1674_v4, %v1743_v55  ;;  %v1762_v54 = vsub.f32 %v1694_v40, %v1750_v30  ;;  %v2123_v38 = vmul.f32 %v4501_v31, %v4460_v36  ;;  %v4524_v3 = vadd.f32 1e-05, %v2124_v42 }
 0xba4   :  { %v1764_v24 = vmul.f32 1.442695, %v1758_v9  ;;  %v1766_v7 = vmul.f32 1.442695, %v1759_v33  ;;  %v1763_v39 = vsub.f32 %v1714_v49, %v1757_v27  ;;  %v1768_v60 = vmul.f32 1.442695, %v1760_v47 }
 0xba5   :  { %v1770_v22 = vmul.f32 1.442695, %v1761_v12  ;;  %v1772_v62 = vmul.f32 1.442695, %v1762_v54  ;;  %v2122_v40 = vmul.f32 %v2112_v10, %v4460_v36  ;;  %v4531_v58 = vadd.f32 1e-05, %v2123_v38 }
 0xba6   :  { %2713 = vpow2.f32 %v1764_v24  ;;  %v1774_v8 = vmul.f32 1.442695, %v1763_v39  ;;  %vm2156_vm13 = vweird.f32 %v4524_v3 }
 0xba7   :  { %2715 = vpow2.f32 %v1766_v7  ;;  %v4546_v17 = vadd.f32 1e-05, %v2122_v40  ;;  %v2221_v40 = vld [vmem:[%s4666_s12 + $0x8] sm:$0xff]  ;;  %vm2146_vm10 = vweird.f32 %v4531_v58 }
 0xba8   :  { %2717 = vpow2.f32 %v1768_v60  ;;  %2229 = vperm.xlu2 %2704, %v2221_v40  }
 0xba9   :  { %2719 = vpow2.f32 %v1770_v22  ;;  %vm2136_vm6 = vweird.f32 %v4546_v17 }
 0xbaa   :  { %2721 = vpow2.f32 %v1772_v62 }
 0xbab   :  { %2723 = vpow2.f32 %v1774_v8 }
 0xbac   :  { %v4526_v4 = vpop.eup %2713  ;;  %2725 = vrsqrt.f32 %v4524_v3 }
 0xbad   :  { %v4529_v49 = vpop.eup %2715  ;;  %v1776_v29 = vsel %vm4970_vm12, %v4526_v4, 0.0  ;;  %2727 = vrsqrt.f32 %v4531_v58 }
 0xbae   :  { %v4535_v34 = vpop.eup %2717  ;;  %v1777_v31 = vrot.slane %v1776_v29, 4  ;;  %v1783_v6 = vsel %vm4971_vm9, %v4529_v49, 0.0  ;;  %2729 = vrsqrt.f32 %v4546_v17  ;;  %vm4980_vm9 = vmmov %vm4959_vm0 }
 0xbaf   :  { %v4540_v32 = vpop.eup %2719  ;;  %v1784_v18 = vrot.slane %v1783_v6, 4  ;;  %v1790_v50 = vsel %vm4972_vm14, %v4535_v34, 0.0 }
 0xbb0   :  { %v4544_v51 = vpop.eup %2721  ;;  %v1778_v46 = vadd.f32 %v1777_v31, %v1776_v29  ;;  %v1791_v21 = vrot.slane %v1790_v50, 4  ;;  %v1797_v61 = vsel %vm4973_vm5, %v4540_v32, 0.0 }
 0xbb1   :  { %v4550_v37 = vpop.eup %2723  ;;  %v1785_v63 = vadd.f32 %v1784_v18, %v1783_v6  ;;  %v1798_v19 = vrot.slane %v1797_v61, 4  ;;  %v1804_v57 = vsel %vm4959_vm0, %v4544_v51, 0.0 }
 0xbb2   :  { %v1779_v52 = vrot.slane %v1778_v46, 2  ;;  %v1792_v53 = vadd.f32 %v1791_v21, %v1790_v50  ;;  %v1805_v35 = vrot.slane %v1804_v57, 4  ;;  %v1811_v41 = vsel %vm4974_vm2, %v4550_v37, 0.0  ;;  %v4557_v48 = vpop.eup %2725 }
 0xbb3   :  { %v1786_v5 = vrot.slane %v1785_v63, 2  ;;  %v1799_v13 = vadd.f32 %v1798_v19, %v1797_v61  ;;  %v1812_v20 = vrot.slane %v1811_v41, 4  ;;  %v4560_v30 = vpop.eup %2727  ;;  %v2151_v27 = vmul.f32 %v4557_v48, %v4524_v3 }
 0xbb4   :  { %v1780_v25 = vadd.f32 %v1779_v52, %v1778_v46  ;;  %v1793_v59 = vrot.slane %v1792_v53, 2  ;;  %v1806_v23 = vadd.f32 %v1805_v35, %v1804_v57  ;;  %v4564_v62 = vpop.eup %2729  ;;  %v2141_v8 = vmul.f32 %v4560_v30, %v4531_v58 }
 0xbb5   :  { %v1787_v15 = vadd.f32 %v1786_v5, %v1785_v63  ;;  %v1800_v45 = vrot.slane %v1799_v13, 2  ;;  %v1813_v55 = vadd.f32 %v1812_v20, %v1811_v41  ;;  %v2152_v29 = vmul.f32 %v4557_v48, %v2151_v27 }
 0xbb6   :  { %v1781_v9 = vrot.slane %v1780_v25, 1  ;;  %v1794_v33 = vadd.f32 %v1793_v59, %v1792_v53  ;;  %v1807_v11 = vrot.slane %v1806_v23, 2  ;;  %v2131_v21 = vmul.f32 %v4564_v62, %v4546_v17 }
 0xbb7   :  { %v1788_v47 = vrot.slane %v1787_v15, 1  ;;  %v1801_v12 = vadd.f32 %v1800_v45, %v1799_v13  ;;  %v1814_v24 = vrot.slane %v1813_v55, 2  ;;  %v2142_v63 = vmul.f32 %v4560_v30, %v2141_v8 }
 0xbb8   :  { %v1782_v7 = vadd.f32 %v1781_v9, %v1780_v25  ;;  %v1795_v54 = vrot.slane %v1794_v33, 1  ;;  %v1808_v39 = vadd.f32 %v1807_v11, %v1806_v23  ;;  %v2153_v57 = vmul.f32 0.5, %v2152_v29 }
 0xbb9   :  { %v1789_v60 = vadd.f32 %v1788_v47, %v1787_v15  ;;  %v1802_v42 = vrot.slane %v1801_v12, 1  ;;  %v1815_v22 = vadd.f32 %v1814_v24, %v1813_v55  ;;  %v2132_v35 = vmul.f32 %v4564_v62, %v2131_v21 }
 0xbba   :  { %v1796_v10 = vadd.f32 %v1795_v54, %v1794_v33  ;;  %v1809_v38 = vrot.slane %v1808_v39, 1  ;;  %2731 = vrcp.f32 %v1782_v7  ;;  %v2143_v5 = vmul.f32 0.5, %v2142_v63 }
 0xbbb   :  { %v1803_v31 = vadd.f32 %v1802_v42, %v1801_v12  ;;  %v1816_v6 = vrot.slane %v1815_v22, 1  ;;  %2733 = vrcp.f32 %v1789_v60  ;;  %v2121_v18 = vpop.xlane.xlu1 %2120  ;;  %v2154_v25 = vsub.f32 1.5, %v2153_v57 }
 0xbbc   :  { %v1810_v50 = vadd.f32 %v1809_v38, %v1808_v39  ;;  %2735 = vrcp.f32 %v1796_v10  ;;  %v2125_v46 = vmul.f32 %v2121_v18, %v4460_v36  ;;  %vm2137_vm4 = vweird.f32 %v4564_v62  ;;  %v2220_v18 = vld [vmem:[%s4666_s12] sm:$0xff] }
 0xbbd   :  { %v1817_v61 = vadd.f32 %v1816_v6, %v1815_v22  ;;  %2737 = vrcp.f32 %v1803_v31  ;;  %v2133_v33 = vmul.f32 0.5, %v2132_v35  ;;  %v2144_v24 = vsub.f32 1.5, %v2143_v5  ;;  %2224 = vperm.xlu1 %2705, %v2220_v18   ;;  %vm2138_vm14 = vmor %vm2136_vm6, %vm2137_vm4 }
 0xbbe   :  { %2739 = vrcp.f32 %v1810_v50  ;;  %v4576_v19 = vadd.f32 1e-05, %v2125_v46  ;;  %vm2157_vm8 = vweird.f32 %v4557_v48  ;;  %vm2147_vm1 = vweird.f32 %v4560_v30 }
 0xbbf   :  { %2741 = vrcp.f32 %v1817_v61  ;;  %v2134_v29 = vsub.f32 1.5, %v2133_v33  ;;  %vm4591_vm3 = vmor %vm2156_vm13, %vm2157_vm8  ;;  %vm2232_vm4 = vcmask 261120  }
 0xbc0   :  { %v2732_v52 = vpop.eup %2731  ;;  %2743 = vrsqrt.f32 %v4576_v19  ;;  %vm4609_vm12 = vmor %vm2146_vm10, %vm2147_vm1  ;;  %vm2166_vm5 = vweird.f32 %v4576_v19 }
 0xbc1   :  { %v2734_v53 = vpop.eup %2733  ;;  %v1824_v41 = vmul.f32 %v2732_v52, %v1782_v7 }
 0xbc2   :  { %v2736_v36 = vpop.eup %2735  ;;  %v1825_v13 = vmul.f32 %v2734_v53, %v1789_v60  ;;  %v2155_v60 = vmul.f32 %v4557_v48, %v2154_v25 }
 0xbc3   :  { %v2738_v20 = vpop.eup %2737  ;;  %v1826_v59 = vmul.f32 %v2736_v36, %v1796_v10  ;;  %v1830_v23 = vsub.f32 2.0, %v1824_v41 }
 0xbc4   :  { %v2740_v15 = vpop.eup %2739  ;;  %v1827_v45 = vmul.f32 %v2738_v20, %v1803_v31  ;;  %v1831_v55 = vsub.f32 2.0, %v1825_v13  ;;  %v2159_v3 = vsel %vm4591_vm3, %v4557_v48, %v2155_v60 }
 0xbc5   :  { %v2742_v9 = vpop.eup %2741  ;;  %v1828_v11 = vmul.f32 %v2740_v15, %v1810_v50  ;;  %v1832_v27 = vsub.f32 2.0, %v1826_v59  ;;  %v1836_v47 = vmul.f32 %v2732_v52, %v1830_v23  ;;  %v2172_v5 = vmul.f32 %v2159_v3, %v4477_v1 }
 0xbc6   :  { %v2744_v12 = vpop.eup %2743  ;;  %v1829_v7 = vmul.f32 %v2742_v9, %v1817_v61  ;;  %v1833_v54 = vsub.f32 2.0, %v1827_v45  ;;  %v1837_v39 = vmul.f32 %v2734_v53, %v1831_v55  ;;  %v2196_v55 = vpop.permute.xlu0 %2195 }
 0xbc7   :  { %v1834_v42 = vsub.f32 2.0, %v1828_v11  ;;  %v2161_v22 = vmul.f32 %v2744_v12, %v4576_v19  ;;  %v1838_v10 = vmul.f32 %v2736_v36, %v1832_v27  ;;  %v1842_v31 = vmul.f32 %v4526_v4, %v1836_v47 }
 0xbc8   :  { %v1835_v8 = vsub.f32 2.0, %v1829_v7  ;;  %v1839_v38 = vmul.f32 %v2738_v20, %v1833_v54  ;;  %v1843_v40 = vmul.f32 %v4529_v49, %v1837_v39  ;;  %v2145_v49 = vmul.f32 %v4560_v30, %v2144_v24 }
 0xbc9   :  { %v2162_v6 = vmul.f32 %v2744_v12, %v2161_v22  ;;  %v1840_v46 = vmul.f32 %v2740_v15, %v1834_v42  ;;  %v1844_v57 = vmul.f32 %v4535_v34, %v1838_v10  ;;  %vm2167_vm11 = vweird.f32 %v2744_v12 }
 0xbca   :  { %v1841_v21 = vmul.f32 %v2742_v9, %v1835_v8  ;;  %v1845_v61 = vmul.f32 %v4540_v32, %v1839_v38  ;;  %v1854_v63 = vrot.slane %v1843_v40, 4  ;;  %v2135_v32 = vmul.f32 %v4564_v62, %v2134_v29  ;;  %vm2168_vm2 = vmor %vm2166_vm5, %vm2167_vm11 }
 0xbcb   :  { %v2163_v4 = vmul.f32 0.5, %v2162_v6  ;;  %v1846_v34 = vmul.f32 %v4544_v51, %v1840_v46  ;;  %v2149_v51 = vsel %vm4609_vm12, %v4560_v30, %v2145_v49  ;;  %v2192_v19 = vmul.f32 %v4489_v56, %v2172_v5 }
 0xbcc   :  { %v1847_v52 = vmul.f32 %v4550_v37, %v1841_v21  ;;  %v1855_v53 = vrot.slane %v1845_v61, 4  ;;  %v1857_v35 = vsel %vm4977_vm15, %v1842_v31, %v1854_v63  ;;  %v2139_v1 = vsel %vm2138_vm14, %v4564_v62, %v2135_v32 }
 0xbcd   :  { %1863 = vst [vmem:[%s4667_s13] sm:$0xff] %v1857_v35  ;;  %v2164_v41 = vsub.f32 1.5, %v2163_v4  ;;  %v2171_v25 = vmul.f32 %v2149_v51, %v4471_v26  ;;  %v2170_v59 = vmul.f32 %v2139_v1, %v4463_v16  ;;  %v2212_v45 = vadd.f32 %v4519_v43, %v2192_v19 }
 0xbce   :  { %v1856_v37 = vrot.slane %v1847_v52, 4  ;;  %v1858_v36 = vsel %vm4980_vm9, %v1844_v57, %v1855_v53 }
 0xbcf   :  { %1864 = vst [vmem:[%s4667_s13 + $0x8] sm:$0xff] %v1858_v36  ;;  %v2165_v58 = vmul.f32 %v2744_v12, %v2164_v41  ;;  %v2191_v15 = vmul.f32 %v4499_v0, %v2171_v25  ;;  %v2190_v9 = vmul.f32 %v4503_v28, %v2170_v59  ;;  %v2216_v26 = vmax.f32 %v2212_v45, 0.0  ;;  %v2218_v0 = vld [vmem:[%s4668_s11] sm:$0xff] }
 0xbd0   :  { %v1859_v13 = vsel %vm4959_vm0, %v1846_v34, %v1856_v37 }
 0xbd1   :  { %1865 = vst [vmem:[%s4667_s13 + $0x10] sm:$0xff] %v1859_v13  ;;  %v2169_v17 = vsel %vm2168_vm2, %v2744_v12, %v2165_v58  ;;  %v2210_v11 = vadd.f32 %v2196_v55, %v2190_v9 }
 0xbd2   :  { %v2173_v20 = vmul.f32 %v2169_v17, %v4492_v44 }
 0xbd3   :  { %v2200_v23 = vpop.permute.xlu1 %2199  ;;  %v2214_v16 = vmax.f32 %v2210_v11, 0.0 }
 0xbd4   :  { %v2193_v30 = vmul.f32 %v4517_v2, %v2173_v20  ;;  %v2211_v33 = vadd.f32 %v2200_v23, %v2191_v15 }
 0xbd6   :  { %v2213_v62 = vadd.f32 %v4467_v14, %v2193_v30  ;;  %v2215_v56 = vmax.f32 %v2211_v33, 0.0  ;;  %v2219_v14 = vld [vmem:[%s4668_s11 + $0x8] sm:$0xff] }
 0xbd8   :  { %v2217_v44 = vmax.f32 %v2213_v62, 0.0 }
 0xbda   :  { %2251 = vmatpush.msra.mxu1 %v2217_v44 }
 0xbdc   :  { %2252 = vmatpush.msra.mxu1 %v2216_v26 }
 0xbde   :  { %2253 = vmatpush.msra.mxu1 %v2215_v56 }
 0xbe0   :  { %2254 = vmatpush.msra.mxu1 %v2214_v16 }
 0xbe1   :  { %2307 = vmatmul.msk.f32.vlgmr.msra.gmra.mxu1 %vm2232_vm4, %v2218_v0 }
 0xbe9   :  { %2308 = vmatmul.msk.f32.gmra.mxu1 %vm2232_vm4, %v2219_v14 }
 0xc02   :  { %v2230_v27 = vpop.permute.xlu2 %2229 }
 0xc2f   :  { %v2225_v28 = vpop.permute.xlu1 %2224 }
 0xc5e   :  { %v2256_v2 = vpop.f32.mrf.mxu1 }
 0xc5f   :  { %v2257_v43 = vadd.f32 %v2256_v2, %v2225_v28 }
 0xc61   :  { %2262 = vst.msk [vmem:[%s4669_s14] sm:$0xff] %vm2078_vm7, %v2257_v43 }
 0xc66   :  { %v2259_v47 = vpop.f32.mrf.mxu1 }
 0xc67   :  { %v2260_v12 = vadd.f32 %v2259_v47, %v2230_v27 }
 0xc69   :  { %2263 = vst.msk [vmem:[%s4669_s14 + $0x8] sm:$0xff] %vm2078_vm7, %v2260_v12 }

</bundles_post_ra>
